<compile_context>
chip_gen: v7x
topology: tpu7x:2x2x1
jax: 0.10.0
libtpu: 0.0.40
codegen_flags: <defaults>
</compile_context>

<pallas_src>
import functools

import jax
import jax.numpy as jnp
from jax.experimental import pallas as pl
from jax.experimental.pallas import tpu as pltpu

_H = 16        # hidden width of both hidden layers
_LANES = 128   # lane width


def _mlp_kernel(x_ref, w1_ref, b1_ref, w2_ref, b2_ref, w3_ref, b3_ref, o_ref,
                *, compute_dtype, j_block):
    """Push one (tile_r, 128) lane-dense batch slab through the whole MLP."""
    x = x_ref[...]                                   # (tile_r, 128) f32
    cd = compute_dtype
    f32 = jnp.float32

    def cvt(s):
        # Weight/bias scalar (f32, from SMEM) in the compute dtype.  For bf16 we
        # splat to an f32 (1,128) row and vector-convert; the row then broadcasts
        # over sublanes like a bias add (avoids relying on bf16 scalar support).
        # ~512 single-vreg ops per grid step, <6% of the MAC work at tile_r=256.
        if cd == f32:
            return s
        return jnp.full((1, _LANES), s, f32).astype(cd)

    # ---- Layer 1 (1 -> 16): broadcast scalar MAC + ReLU on the VPU.  Kept in
    # f32 (only ~2.5% of total work), then cast to the compute dtype.
    h1 = [jnp.maximum(x * w1_ref[c] + b1_ref[c], 0.0).astype(cd) for c in range(_H)]

    # Pre-convert layer-2/3 weights & biases once per grid step.
    w2c = [[cvt(w2_ref[k, j]) for j in range(_H)] for k in range(_H)]
    b2c = [cvt(b2_ref[j]) for j in range(_H)]
    w3c = [cvt(w3_ref[j]) for j in range(_H)]

    # ---- Layers 2 (16 -> 16) + 3 (16 -> 1), fused.  j-blocked: j_block output
    # channels at a time so each h1[k] slab is read once per block, with only
    # 2*j_block accumulators (+1 h1 strip) live.  Two partial sums per channel
    # (k split in halves) form a shallow pairwise tree, halving bf16
    # accumulation error at no extra op count.
    y = None
    for j0 in range(0, _H, j_block):
        nj = min(j_block, _H - j0)
        acc_lo = [None] * nj
        acc_hi = [None] * nj
        for k in range(_H):
            hk = h1[k]
            acc = acc_lo if k < _H // 2 else acc_hi
            for jj in range(nj):
                term = hk * w2c[k][j0 + jj]
                acc[jj] = term if acc[jj] is None else acc[jj] + term
        for jj in range(nj):
            j = j0 + jj
            h2 = jnp.maximum(acc_lo[jj] + acc_hi[jj] + b2c[j], 0.0)   # ReLU
            contrib = h2 * w3c[j]
            y = contrib if y is None else y + contrib

    y = y.astype(f32) + b3_ref[0]
    o_ref[...] = y.astype(o_ref.dtype)               # full-width lane-dense store


def _round_up(a, b):
    return ((a + b - 1) // b) * b


def mlp_forward(x, params, *, compute_dtype=jnp.float32, max_tile_r=256, j_block=4):
    """x: [N, 1] float32.  params: dict of w1,b1,w2,b2,w3,b3 in [in,out] layout.

    compute_dtype=jnp.bfloat16 roughly halves the dominant layer-2/3 VALU work on
    v6e/v7x; it is OFF by default because it cannot meet the f32 2e-5 reference
    tolerance (gate on the model's real accuracy budget).  Keep f32 on v5e (its
    VPU has no bf16).
    """
    N = x.shape[0]

    w1 = params["w1"].reshape(-1).astype(jnp.float32)   # (16,)
    b1 = params["b1"].reshape(-1).astype(jnp.float32)   # (16,)
    w2 = params["w2"].astype(jnp.float32)                # (16, 16) [in, out]
    b2 = params["b2"].reshape(-1).astype(jnp.float32)   # (16,)
    w3 = params["w3"].reshape(-1).astype(jnp.float32)   # (16,)
    b3 = params["b3"].reshape(-1).astype(jnp.float32)   # (1,)

    # Batch-in-lanes layout: [N,1] -> [R_pad, 128] slab.
    R = pl.cdiv(N, _LANES)
    # Row tile: target >= ~8 grid steps (the 'parallel' axis is sharded across
    # v7x's 2 TensorCores -- a single-step grid idles one of them) while keeping
    # tiles <= 256 rows (big enough to hide the ~0.35us/step overhead, small
    # enough to bound VMEM temporaries and unrolled code).  Rows multiple of 8.
    tile_r = max(8, min(max_tile_r, _round_up(pl.cdiv(R, 8), 8)))
    R_pad = _round_up(R, tile_r)
    total = R_pad * _LANES

    # Wrapper-side pad + final slice each cost one extra HBM pass; the kernel is
    # compute-bound so this is <5% wall clock.
    # TODO(synk): fold the ragged tail in-kernel (pl.when-guarded masked store on
    # the last tile) if that ~5% ever matters.
    xf = jnp.pad(x.reshape(-1), (0, total - N))
    x2 = xf.reshape(R_pad, _LANES)

    smem = pl.BlockSpec(memory_space=pltpu.MemorySpace.SMEM)
    kernel = functools.partial(_mlp_kernel, compute_dtype=compute_dtype,
                               j_block=j_block)

    out2 = pl.pallas_call(
        kernel,
        out_shape=jax.ShapeDtypeStruct((R_pad, _LANES), jnp.float32),
        grid_spec=pltpu.PrefetchScalarGridSpec(
            num_scalar_prefetch=0,
            grid=(R_pad // tile_r,),
            in_specs=[
                pl.BlockSpec((tile_r, _LANES), lambda i: (i, 0)),   # x rows
                smem, smem,                                         # w1, b1
                smem, smem,                                         # w2, b2
                smem, smem,                                         # w3, b3
            ],
            out_specs=pl.BlockSpec((tile_r, _LANES), lambda i: (i, 0)),
        ),
        compiler_params=pltpu.CompilerParams(
            dimension_semantics=("parallel",)),
    )(x2, w1, b1, w2, b2, w3, b3)

    return out2.reshape(-1)[:N].reshape(N, 1)


def init_params(key):
    """Deterministic init mimicking nn.Linear's U(-1/sqrt(fan_in), +1/sqrt(fan_in))."""
    def linear(k, fan_in, fan_out):
        kw, kb = jax.random.split(k)
        bound = 1.0 / (fan_in ** 0.5)
        w = jax.random.uniform(kw, (fan_in, fan_out), jnp.float32, -bound, bound)
        b = jax.random.uniform(kb, (1, fan_out), jnp.float32, -bound, bound)
        return w, b

    k1, k2, k3 = jax.random.split(key, 3)
    w1, b1 = linear(k1, 1, 16)
    w2, b2 = linear(k2, 16, 16)
    w3, b3 = linear(k3, 16, 1)
    return {"w1": w1, "b1": b1, "w2": w2, "b2": b2, "w3": w3, "b3": b3}


def mlp_reference(x, p):
    hi = jax.lax.Precision.HIGHEST
    h = jnp.maximum(jnp.matmul(x, p["w1"], precision=hi) + p["b1"], 0.0)
    h = jnp.maximum(jnp.matmul(h, p["w2"], precision=hi) + p["b2"], 0.0)
    return jnp.matmul(h, p["w3"], precision=hi) + p["b3"]


if __name__ == "__main__":
    key = jax.random.PRNGKey(0)
    kx, kp = jax.random.split(key)
    params = init_params(kp)

    # Ragged batch sizes (not multiples of 128 / tile rows); the larger one yields
    # a multi-step grid so the 'parallel' axis actually has work to shard.
    for n in (300, 5000):
        x = jax.random.normal(jax.random.fold_in(kx, n), (n, 1), jnp.float32)
        out = jax.block_until_ready(mlp_forward(x, params))
        ref = mlp_reference(x, params)
        assert out.shape == (n, 1)
        assert jnp.allclose(out, ref, atol=2e-5, rtol=1e-4), f"f32 mismatch at N={n}"

    # Reduced-precision (v6e/v7x) path: same kernel, bf16 MACs for layers 2/3.
    # Loose sanity bound only -- bf16 cannot meet the 2e-5 f32 tolerance, which is
    # exactly why this path is opt-in and gated on the real accuracy budget.
    x = jax.random.normal(kx, (300, 1), jnp.float32)
    out_bf = jax.block_until_ready(
        mlp_forward(x, params, compute_dtype=jnp.bfloat16))
    ref = mlp_reference(x, params)
    assert out_bf.shape == (300, 1)
    assert float(jnp.max(jnp.abs(out_bf - ref))) < 0.25, "bf16 path sanity check"

    print("KERNEL_OK")
</pallas_src>

<mosaic_0001>
module attributes {stable_mosaic.version = 11 : i64} {
  func.func @_mlp_kernel(%arg0: i32, %arg1: memref<8x128xf32, #tpu.memory_space<vmem>>, %arg2: memref<16xf32, #tpu.memory_space<smem>>, %arg3: memref<16xf32, #tpu.memory_space<smem>>, %arg4: memref<16x16xf32, #tpu.memory_space<smem>>, %arg5: memref<16xf32, #tpu.memory_space<smem>>, %arg6: memref<16xf32, #tpu.memory_space<smem>>, %arg7: memref<1xf32, #tpu.memory_space<smem>>, %arg8: memref<8x128xf32, #tpu.memory_space<vmem>>) attributes {dimension_semantics = [#tpu.dimension_semantics<parallel>], iteration_bounds = array<i64: 1>, scalar_prefetch = 0 : i64, scratch_operands = 0 : i64, tpu.core_type = #tpu.core_type<tc>, window_params = [{transform_indices = @transform_0, window_bounds = array<i64: 8, 128>}, {transform_indices = @transform_1, window_bounds = array<i64: 16>}, {transform_indices = @transform_2, window_bounds = array<i64: 16>}, {transform_indices = @transform_3, window_bounds = array<i64: 16, 16>}, {transform_indices = @transform_4, window_bounds = array<i64: 16>}, {transform_indices = @transform_5, window_bounds = array<i64: 16>}, {transform_indices = @transform_6, window_bounds = array<i64: 1>}, {transform_indices = @transform_7, window_bounds = array<i64: 8, 128>}]} {
    %c0 = arith.constant 0 : index
    %c0_0 = arith.constant 0 : index
    %0 = vector.load %arg1[%c0, %c0_0] : memref<8x128xf32, #tpu.memory_space<vmem>>, vector<8x128xf32>
    %c0_1 = arith.constant 0 : index
    %1 = memref.load %arg2[%c0_1] : memref<16xf32, #tpu.memory_space<smem>>
    %2 = vector.broadcast %1 : f32 to vector<8x128xf32>
    %3 = arith.mulf %0, %2 : vector<8x128xf32>
    %c0_2 = arith.constant 0 : index
    %4 = memref.load %arg3[%c0_2] : memref<16xf32, #tpu.memory_space<smem>>
    %5 = vector.broadcast %4 : f32 to vector<8x128xf32>
    %6 = arith.addf %3, %5 : vector<8x128xf32>
    %cst = arith.constant 0.000000e+00 : f32
    %7 = vector.broadcast %cst : f32 to vector<8x128xf32>
    %8 = arith.maximumf %6, %7 : vector<8x128xf32>
    %c1 = arith.constant 1 : index
    %9 = memref.load %arg2[%c1] : memref<16xf32, #tpu.memory_space<smem>>
    %10 = vector.broadcast %9 : f32 to vector<8x128xf32>
    %11 = arith.mulf %0, %10 : vector<8x128xf32>
    %c1_3 = arith.constant 1 : index
    %12 = memref.load %arg3[%c1_3] : memref<16xf32, #tpu.memory_space<smem>>
    %13 = vector.broadcast %12 : f32 to vector<8x128xf32>
    %14 = arith.addf %11, %13 : vector<8x128xf32>
    %cst_4 = arith.constant 0.000000e+00 : f32
    %15 = vector.broadcast %cst_4 : f32 to vector<8x128xf32>
    %16 = arith.maximumf %14, %15 : vector<8x128xf32>
    %c2 = arith.constant 2 : index
    %17 = memref.load %arg2[%c2] : memref<16xf32, #tpu.memory_space<smem>>
    %18 = vector.broadcast %17 : f32 to vector<8x128xf32>
    %19 = arith.mulf %0, %18 : vector<8x128xf32>
    %c2_5 = arith.constant 2 : index
    %20 = memref.load %arg3[%c2_5] : memref<16xf32, #tpu.memory_space<smem>>
    %21 = vector.broadcast %20 : f32 to vector<8x128xf32>
    %22 = arith.addf %19, %21 : vector<8x128xf32>
    %cst_6 = arith.constant 0.000000e+00 : f32
    %23 = vector.broadcast %cst_6 : f32 to vector<8x128xf32>
    %24 = arith.maximumf %22, %23 : vector<8x128xf32>
    %c3 = arith.constant 3 : index
    %25 = memref.load %arg2[%c3] : memref<16xf32, #tpu.memory_space<smem>>
    %26 = vector.broadcast %25 : f32 to vector<8x128xf32>
    %27 = arith.mulf %0, %26 : vector<8x128xf32>
    %c3_7 = arith.constant 3 : index
    %28 = memref.load %arg3[%c3_7] : memref<16xf32, #tpu.memory_space<smem>>
    %29 = vector.broadcast %28 : f32 to vector<8x128xf32>
    %30 = arith.addf %27, %29 : vector<8x128xf32>
    %cst_8 = arith.constant 0.000000e+00 : f32
    %31 = vector.broadcast %cst_8 : f32 to vector<8x128xf32>
    %32 = arith.maximumf %30, %31 : vector<8x128xf32>
    %c4 = arith.constant 4 : index
    %33 = memref.load %arg2[%c4] : memref<16xf32, #tpu.memory_space<smem>>
    %34 = vector.broadcast %33 : f32 to vector<8x128xf32>
    %35 = arith.mulf %0, %34 : vector<8x128xf32>
    %c4_9 = arith.constant 4 : index
    %36 = memref.load %arg3[%c4_9] : memref<16xf32, #tpu.memory_space<smem>>
    %37 = vector.broadcast %36 : f32 to vector<8x128xf32>
    %38 = arith.addf %35, %37 : vector<8x128xf32>
    %cst_10 = arith.constant 0.000000e+00 : f32
    %39 = vector.broadcast %cst_10 : f32 to vector<8x128xf32>
    %40 = arith.maximumf %38, %39 : vector<8x128xf32>
    %c5 = arith.constant 5 : index
    %41 = memref.load %arg2[%c5] : memref<16xf32, #tpu.memory_space<smem>>
    %42 = vector.broadcast %41 : f32 to vector<8x128xf32>
    %43 = arith.mulf %0, %42 : vector<8x128xf32>
    %c5_11 = arith.constant 5 : index
    %44 = memref.load %arg3[%c5_11] : memref<16xf32, #tpu.memory_space<smem>>
    %45 = vector.broadcast %44 : f32 to vector<8x128xf32>
    %46 = arith.addf %43, %45 : vector<8x128xf32>
    %cst_12 = arith.constant 0.000000e+00 : f32
    %47 = vector.broadcast %cst_12 : f32 to vector<8x128xf32>
    %48 = arith.maximumf %46, %47 : vector<8x128xf32>
    %c6 = arith.constant 6 : index
    %49 = memref.load %arg2[%c6] : memref<16xf32, #tpu.memory_space<smem>>
    %50 = vector.broadcast %49 : f32 to vector<8x128xf32>
    %51 = arith.mulf %0, %50 : vector<8x128xf32>
    %c6_13 = arith.constant 6 : index
    %52 = memref.load %arg3[%c6_13] : memref<16xf32, #tpu.memory_space<smem>>
    %53 = vector.broadcast %52 : f32 to vector<8x128xf32>
    %54 = arith.addf %51, %53 : vector<8x128xf32>
    %cst_14 = arith.constant 0.000000e+00 : f32
    %55 = vector.broadcast %cst_14 : f32 to vector<8x128xf32>
    %56 = arith.maximumf %54, %55 : vector<8x128xf32>
    %c7 = arith.constant 7 : index
    %57 = memref.load %arg2[%c7] : memref<16xf32, #tpu.memory_space<smem>>
    %58 = vector.broadcast %57 : f32 to vector<8x128xf32>
    %59 = arith.mulf %0, %58 : vector<8x128xf32>
    %c7_15 = arith.constant 7 : index
    %60 = memref.load %arg3[%c7_15] : memref<16xf32, #tpu.memory_space<smem>>
    %61 = vector.broadcast %60 : f32 to vector<8x128xf32>
    %62 = arith.addf %59, %61 : vector<8x128xf32>
    %cst_16 = arith.constant 0.000000e+00 : f32
    %63 = vector.broadcast %cst_16 : f32 to vector<8x128xf32>
    %64 = arith.maximumf %62, %63 : vector<8x128xf32>
    %c8 = arith.constant 8 : index
    %65 = memref.load %arg2[%c8] : memref<16xf32, #tpu.memory_space<smem>>
    %66 = vector.broadcast %65 : f32 to vector<8x128xf32>
    %67 = arith.mulf %0, %66 : vector<8x128xf32>
    %c8_17 = arith.constant 8 : index
    %68 = memref.load %arg3[%c8_17] : memref<16xf32, #tpu.memory_space<smem>>
    %69 = vector.broadcast %68 : f32 to vector<8x128xf32>
    %70 = arith.addf %67, %69 : vector<8x128xf32>
    %cst_18 = arith.constant 0.000000e+00 : f32
    %71 = vector.broadcast %cst_18 : f32 to vector<8x128xf32>
    %72 = arith.maximumf %70, %71 : vector<8x128xf32>
    %c9 = arith.constant 9 : index
    %73 = memref.load %arg2[%c9] : memref<16xf32, #tpu.memory_space<smem>>
    %74 = vector.broadcast %73 : f32 to vector<8x128xf32>
    %75 = arith.mulf %0, %74 : vector<8x128xf32>
    %c9_19 = arith.constant 9 : index
    %76 = memref.load %arg3[%c9_19] : memref<16xf32, #tpu.memory_space<smem>>
    %77 = vector.broadcast %76 : f32 to vector<8x128xf32>
    %78 = arith.addf %75, %77 : vector<8x128xf32>
    %cst_20 = arith.constant 0.000000e+00 : f32
    %79 = vector.broadcast %cst_20 : f32 to vector<8x128xf32>
    %80 = arith.maximumf %78, %79 : vector<8x128xf32>
    %c10 = arith.constant 10 : index
    %81 = memref.load %arg2[%c10] : memref<16xf32, #tpu.memory_space<smem>>
    %82 = vector.broadcast %81 : f32 to vector<8x128xf32>
    %83 = arith.mulf %0, %82 : vector<8x128xf32>
    %c10_21 = arith.constant 10 : index
    %84 = memref.load %arg3[%c10_21] : memref<16xf32, #tpu.memory_space<smem>>
    %85 = vector.broadcast %84 : f32 to vector<8x128xf32>
    %86 = arith.addf %83, %85 : vector<8x128xf32>
    %cst_22 = arith.constant 0.000000e+00 : f32
    %87 = vector.broadcast %cst_22 : f32 to vector<8x128xf32>
    %88 = arith.maximumf %86, %87 : vector<8x128xf32>
    %c11 = arith.constant 11 : index
    %89 = memref.load %arg2[%c11] : memref<16xf32, #tpu.memory_space<smem>>
    %90 = vector.broadcast %89 : f32 to vector<8x128xf32>
    %91 = arith.mulf %0, %90 : vector<8x128xf32>
    %c11_23 = arith.constant 11 : index
    %92 = memref.load %arg3[%c11_23] : memref<16xf32, #tpu.memory_space<smem>>
    %93 = vector.broadcast %92 : f32 to vector<8x128xf32>
    %94 = arith.addf %91, %93 : vector<8x128xf32>
    %cst_24 = arith.constant 0.000000e+00 : f32
    %95 = vector.broadcast %cst_24 : f32 to vector<8x128xf32>
    %96 = arith.maximumf %94, %95 : vector<8x128xf32>
    %c12 = arith.constant 12 : index
    %97 = memref.load %arg2[%c12] : memref<16xf32, #tpu.memory_space<smem>>
    %98 = vector.broadcast %97 : f32 to vector<8x128xf32>
    %99 = arith.mulf %0, %98 : vector<8x128xf32>
    %c12_25 = arith.constant 12 : index
    %100 = memref.load %arg3[%c12_25] : memref<16xf32, #tpu.memory_space<smem>>
    %101 = vector.broadcast %100 : f32 to vector<8x128xf32>
    %102 = arith.addf %99, %101 : vector<8x128xf32>
    %cst_26 = arith.constant 0.000000e+00 : f32
    %103 = vector.broadcast %cst_26 : f32 to vector<8x128xf32>
    %104 = arith.maximumf %102, %103 : vector<8x128xf32>
    %c13 = arith.constant 13 : index
    %105 = memref.load %arg2[%c13] : memref<16xf32, #tpu.memory_space<smem>>
    %106 = vector.broadcast %105 : f32 to vector<8x128xf32>
    %107 = arith.mulf %0, %106 : vector<8x128xf32>
    %c13_27 = arith.constant 13 : index
    %108 = memref.load %arg3[%c13_27] : memref<16xf32, #tpu.memory_space<smem>>
    %109 = vector.broadcast %108 : f32 to vector<8x128xf32>
    %110 = arith.addf %107, %109 : vector<8x128xf32>
    %cst_28 = arith.constant 0.000000e+00 : f32
    %111 = vector.broadcast %cst_28 : f32 to vector<8x128xf32>
    %112 = arith.maximumf %110, %111 : vector<8x128xf32>
    %c14 = arith.constant 14 : index
    %113 = memref.load %arg2[%c14] : memref<16xf32, #tpu.memory_space<smem>>
    %114 = vector.broadcast %113 : f32 to vector<8x128xf32>
    %115 = arith.mulf %0, %114 : vector<8x128xf32>
    %c14_29 = arith.constant 14 : index
    %116 = memref.load %arg3[%c14_29] : memref<16xf32, #tpu.memory_space<smem>>
    %117 = vector.broadcast %116 : f32 to vector<8x128xf32>
    %118 = arith.addf %115, %117 : vector<8x128xf32>
    %cst_30 = arith.constant 0.000000e+00 : f32
    %119 = vector.broadcast %cst_30 : f32 to vector<8x128xf32>
    %120 = arith.maximumf %118, %119 : vector<8x128xf32>
    %c15 = arith.constant 15 : index
    %121 = memref.load %arg2[%c15] : memref<16xf32, #tpu.memory_space<smem>>
    %122 = vector.broadcast %121 : f32 to vector<8x128xf32>
    %123 = arith.mulf %0, %122 : vector<8x128xf32>
    %c15_31 = arith.constant 15 : index
    %124 = memref.load %arg3[%c15_31] : memref<16xf32, #tpu.memory_space<smem>>
    %125 = vector.broadcast %124 : f32 to vector<8x128xf32>
    %126 = arith.addf %123, %125 : vector<8x128xf32>
    %cst_32 = arith.constant 0.000000e+00 : f32
    %127 = vector.broadcast %cst_32 : f32 to vector<8x128xf32>
    %128 = arith.maximumf %126, %127 : vector<8x128xf32>
    %c0_33 = arith.constant 0 : index
    %c0_34 = arith.constant 0 : index
    %129 = memref.load %arg4[%c0_33, %c0_34] : memref<16x16xf32, #tpu.memory_space<smem>>
    %c0_35 = arith.constant 0 : index
    %c1_36 = arith.constant 1 : index
    %130 = memref.load %arg4[%c0_35, %c1_36] : memref<16x16xf32, #tpu.memory_space<smem>>
    %c0_37 = arith.constant 0 : index
    %c2_38 = arith.constant 2 : index
    %131 = memref.load %arg4[%c0_37, %c2_38] : memref<16x16xf32, #tpu.memory_space<smem>>
    %c0_39 = arith.constant 0 : index
    %c3_40 = arith.constant 3 : index
    %132 = memref.load %arg4[%c0_39, %c3_40] : memref<16x16xf32, #tpu.memory_space<smem>>
    %c0_41 = arith.constant 0 : index
    %c4_42 = arith.constant 4 : index
    %133 = memref.load %arg4[%c0_41, %c4_42] : memref<16x16xf32, #tpu.memory_space<smem>>
    %c0_43 = arith.constant 0 : index
    %c5_44 = arith.constant 5 : index
    %134 = memref.load %arg4[%c0_43, %c5_44] : memref<16x16xf32, #tpu.memory_space<smem>>
    %c0_45 = arith.constant 0 : index
    %c6_46 = arith.constant 6 : index
    %135 = memref.load %arg4[%c0_45, %c6_46] : memref<16x16xf32, #tpu.memory_space<smem>>
    %c0_47 = arith.constant 0 : index
    %c7_48 = arith.constant 7 : index
    %136 = memref.load %arg4[%c0_47, %c7_48] : memref<16x16xf32, #tpu.memory_space<smem>>
    %c0_49 = arith.constant 0 : index
    %c8_50 = arith.constant 8 : index
    %137 = memref.load %arg4[%c0_49, %c8_50] : memref<16x16xf32, #tpu.memory_space<smem>>
    %c0_51 = arith.constant 0 : index
    %c9_52 = arith.constant 9 : index
    %138 = memref.load %arg4[%c0_51, %c9_52] : memref<16x16xf32, #tpu.memory_space<smem>>
    %c0_53 = arith.constant 0 : index
    %c10_54 = arith.constant 10 : index
    %139 = memref.load %arg4[%c0_53, %c10_54] : memref<16x16xf32, #tpu.memory_space<smem>>
    %c0_55 = arith.constant 0 : index
    %c11_56 = arith.constant 11 : index
    %140 = memref.load %arg4[%c0_55, %c11_56] : memref<16x16xf32, #tpu.memory_space<smem>>
    %c0_57 = arith.constant 0 : index
    %c12_58 = arith.constant 12 : index
    %141 = memref.load %arg4[%c0_57, %c12_58] : memref<16x16xf32, #tpu.memory_space<smem>>
    %c0_59 = arith.constant 0 : index
    %c13_60 = arith.constant 13 : index
    %142 = memref.load %arg4[%c0_59, %c13_60] : memref<16x16xf32, #tpu.memory_space<smem>>
    %c0_61 = arith.constant 0 : index
    %c14_62 = arith.constant 14 : index
    %143 = memref.load %arg4[%c0_61, %c14_62] : memref<16x16xf32, #tpu.memory_space<smem>>
    %c0_63 = arith.constant 0 : index
    %c15_64 = arith.constant 15 : index
    %144 = memref.load %arg4[%c0_63, %c15_64] : memref<16x16xf32, #tpu.memory_space<smem>>
    %c1_65 = arith.constant 1 : index
    %c0_66 = arith.constant 0 : index
    %145 = memref.load %arg4[%c1_65, %c0_66] : memref<16x16xf32, #tpu.memory_space<smem>>
    %c1_67 = arith.constant 1 : index
    %c1_68 = arith.constant 1 : index
    %146 = memref.load %arg4[%c1_67, %c1_68] : memref<16x16xf32, #tpu.memory_space<smem>>
    %c1_69 = arith.constant 1 : index
    %c2_70 = arith.constant 2 : index
    %147 = memref.load %arg4[%c1_69, %c2_70] : memref<16x16xf32, #tpu.memory_space<smem>>
    %c1_71 = arith.constant 1 : index
    %c3_72 = arith.constant 3 : index
    %148 = memref.load %arg4[%c1_71, %c3_72] : memref<16x16xf32, #tpu.memory_space<smem>>
    %c1_73 = arith.constant 1 : index
    %c4_74 = arith.constant 4 : index
    %149 = memref.load %arg4[%c1_73, %c4_74] : memref<16x16xf32, #tpu.memory_space<smem>>
    %c1_75 = arith.constant 1 : index
    %c5_76 = arith.constant 5 : index
    %150 = memref.load %arg4[%c1_75, %c5_76] : memref<16x16xf32, #tpu.memory_space<smem>>
    %c1_77 = arith.constant 1 : index
    %c6_78 = arith.constant 6 : index
    %151 = memref.load %arg4[%c1_77, %c6_78] : memref<16x16xf32, #tpu.memory_space<smem>>
    %c1_79 = arith.constant 1 : index
    %c7_80 = arith.constant 7 : index
    %152 = memref.load %arg4[%c1_79, %c7_80] : memref<16x16xf32, #tpu.memory_space<smem>>
    %c1_81 = arith.constant 1 : index
    %c8_82 = arith.constant 8 : index
    %153 = memref.load %arg4[%c1_81, %c8_82] : memref<16x16xf32, #tpu.memory_space<smem>>
    %c1_83 = arith.constant 1 : index
    %c9_84 = arith.constant 9 : index
    %154 = memref.load %arg4[%c1_83, %c9_84] : memref<16x16xf32, #tpu.memory_space<smem>>
    %c1_85 = arith.constant 1 : index
    %c10_86 = arith.constant 10 : index
    %155 = memref.load %arg4[%c1_85, %c10_86] : memref<16x16xf32, #tpu.memory_space<smem>>
    %c1_87 = arith.constant 1 : index
    %c11_88 = arith.constant 11 : index
    %156 = memref.load %arg4[%c1_87, %c11_88] : memref<16x16xf32, #tpu.memory_space<smem>>
    %c1_89 = arith.constant 1 : index
    %c12_90 = arith.constant 12 : index
    %157 = memref.load %arg4[%c1_89, %c12_90] : memref<16x16xf32, #tpu.memory_space<smem>>
    %c1_91 = arith.constant 1 : index
    %c13_92 = arith.constant 13 : index
    %158 = memref.load %arg4[%c1_91, %c13_92] : memref<16x16xf32, #tpu.memory_space<smem>>
    %c1_93 = arith.constant 1 : index
    %c14_94 = arith.constant 14 : index
    %159 = memref.load %arg4[%c1_93, %c14_94] : memref<16x16xf32, #tpu.memory_space<smem>>
    %c1_95 = arith.constant 1 : index
    %c15_96 = arith.constant 15 : index
    %160 = memref.load %arg4[%c1_95, %c15_96] : memref<16x16xf32, #tpu.memory_space<smem>>
    %c2_97 = arith.constant 2 : index
    %c0_98 = arith.constant 0 : index
    %161 = memref.load %arg4[%c2_97, %c0_98] : memref<16x16xf32, #tpu.memory_space<smem>>
    %c2_99 = arith.constant 2 : index
    %c1_100 = arith.constant 1 : index
    %162 = memref.load %arg4[%c2_99, %c1_100] : memref<16x16xf32, #tpu.memory_space<smem>>
    %c2_101 = arith.constant 2 : index
    %c2_102 = arith.constant 2 : index
    %163 = memref.load %arg4[%c2_101, %c2_102] : memref<16x16xf32, #tpu.memory_space<smem>>
    %c2_103 = arith.constant 2 : index
    %c3_104 = arith.constant 3 : index
    %164 = memref.load %arg4[%c2_103, %c3_104] : memref<16x16xf32, #tpu.memory_space<smem>>
    %c2_105 = arith.constant 2 : index
    %c4_106 = arith.constant 4 : index
    %165 = memref.load %arg4[%c2_105, %c4_106] : memref<16x16xf32, #tpu.memory_space<smem>>
    %c2_107 = arith.constant 2 : index
    %c5_108 = arith.constant 5 : index
    %166 = memref.load %arg4[%c2_107, %c5_108] : memref<16x16xf32, #tpu.memory_space<smem>>
    %c2_109 = arith.constant 2 : index
    %c6_110 = arith.constant 6 : index
    %167 = memref.load %arg4[%c2_109, %c6_110] : memref<16x16xf32, #tpu.memory_space<smem>>
    %c2_111 = arith.constant 2 : index
    %c7_112 = arith.constant 7 : index
    %168 = memref.load %arg4[%c2_111, %c7_112] : memref<16x16xf32, #tpu.memory_space<smem>>
    %c2_113 = arith.constant 2 : index
    %c8_114 = arith.constant 8 : index
    %169 = memref.load %arg4[%c2_113, %c8_114] : memref<16x16xf32, #tpu.memory_space<smem>>
    %c2_115 = arith.constant 2 : index
    %c9_116 = arith.constant 9 : index
    %170 = memref.load %arg4[%c2_115, %c9_116] : memref<16x16xf32, #tpu.memory_space<smem>>
    %c2_117 = arith.constant 2 : index
    %c10_118 = arith.constant 10 : index
    %171 = memref.load %arg4[%c2_117, %c10_118] : memref<16x16xf32, #tpu.memory_space<smem>>
    %c2_119 = arith.constant 2 : index
    %c11_120 = arith.constant 11 : index
    %172 = memref.load %arg4[%c2_119, %c11_120] : memref<16x16xf32, #tpu.memory_space<smem>>
    %c2_121 = arith.constant 2 : index
    %c12_122 = arith.constant 12 : index
    %173 = memref.load %arg4[%c2_121, %c12_122] : memref<16x16xf32, #tpu.memory_space<smem>>
    %c2_123 = arith.constant 2 : index
    %c13_124 = arith.constant 13 : index
    %174 = memref.load %arg4[%c2_123, %c13_124] : memref<16x16xf32, #tpu.memory_space<smem>>
    %c2_125 = arith.constant 2 : index
    %c14_126 = arith.constant 14 : index
    %175 = memref.load %arg4[%c2_125, %c14_126] : memref<16x16xf32, #tpu.memory_space<smem>>
    %c2_127 = arith.constant 2 : index
    %c15_128 = arith.constant 15 : index
    %176 = memref.load %arg4[%c2_127, %c15_128] : memref<16x16xf32, #tpu.memory_space<smem>>
    %c3_129 = arith.constant 3 : index
    %c0_130 = arith.constant 0 : index
    %177 = memref.load %arg4[%c3_129, %c0_130] : memref<16x16xf32, #tpu.memory_space<smem>>
    %c3_131 = arith.constant 3 : index
    %c1_132 = arith.constant 1 : index
    %178 = memref.load %arg4[%c3_131, %c1_132] : memref<16x16xf32, #tpu.memory_space<smem>>
    %c3_133 = arith.constant 3 : index
    %c2_134 = arith.constant 2 : index
    %179 = memref.load %arg4[%c3_133, %c2_134] : memref<16x16xf32, #tpu.memory_space<smem>>
    %c3_135 = arith.constant 3 : index
    %c3_136 = arith.constant 3 : index
    %180 = memref.load %arg4[%c3_135, %c3_136] : memref<16x16xf32, #tpu.memory_space<smem>>
    %c3_137 = arith.constant 3 : index
    %c4_138 = arith.constant 4 : index
    %181 = memref.load %arg4[%c3_137, %c4_138] : memref<16x16xf32, #tpu.memory_space<smem>>
    %c3_139 = arith.constant 3 : index
    %c5_140 = arith.constant 5 : index
    %182 = memref.load %arg4[%c3_139, %c5_140] : memref<16x16xf32, #tpu.memory_space<smem>>
    %c3_141 = arith.constant 3 : index
    %c6_142 = arith.constant 6 : index
    %183 = memref.load %arg4[%c3_141, %c6_142] : memref<16x16xf32, #tpu.memory_space<smem>>
    %c3_143 = arith.constant 3 : index
    %c7_144 = arith.constant 7 : index
    %184 = memref.load %arg4[%c3_143, %c7_144] : memref<16x16xf32, #tpu.memory_space<smem>>
    %c3_145 = arith.constant 3 : index
    %c8_146 = arith.constant 8 : index
    %185 = memref.load %arg4[%c3_145, %c8_146] : memref<16x16xf32, #tpu.memory_space<smem>>
    %c3_147 = arith.constant 3 : index
    %c9_148 = arith.constant 9 : index
    %186 = memref.load %arg4[%c3_147, %c9_148] : memref<16x16xf32, #tpu.memory_space<smem>>
    %c3_149 = arith.constant 3 : index
    %c10_150 = arith.constant 10 : index
    %187 = memref.load %arg4[%c3_149, %c10_150] : memref<16x16xf32, #tpu.memory_space<smem>>
    %c3_151 = arith.constant 3 : index
    %c11_152 = arith.constant 11 : index
    %188 = memref.load %arg4[%c3_151, %c11_152] : memref<16x16xf32, #tpu.memory_space<smem>>
    %c3_153 = arith.constant 3 : index
    %c12_154 = arith.constant 12 : index
    %189 = memref.load %arg4[%c3_153, %c12_154] : memref<16x16xf32, #tpu.memory_space<smem>>
    %c3_155 = arith.constant 3 : index
    %c13_156 = arith.constant 13 : index
    %190 = memref.load %arg4[%c3_155, %c13_156] : memref<16x16xf32, #tpu.memory_space<smem>>
    %c3_157 = arith.constant 3 : index
    %c14_158 = arith.constant 14 : index
    %191 = memref.load %arg4[%c3_157, %c14_158] : memref<16x16xf32, #tpu.memory_space<smem>>
    %c3_159 = arith.constant 3 : index
    %c15_160 = arith.constant 15 : index
    %192 = memref.load %arg4[%c3_159, %c15_160] : memref<16x16xf32, #tpu.memory_space<smem>>
    %c4_161 = arith.constant 4 : index
    %c0_162 = arith.constant 0 : index
    %193 = memref.load %arg4[%c4_161, %c0_162] : memref<16x16xf32, #tpu.memory_space<smem>>
    %c4_163 = arith.constant 4 : index
    %c1_164 = arith.constant 1 : index
    %194 = memref.load %arg4[%c4_163, %c1_164] : memref<16x16xf32, #tpu.memory_space<smem>>
    %c4_165 = arith.constant 4 : index
    %c2_166 = arith.constant 2 : index
    %195 = memref.load %arg4[%c4_165, %c2_166] : memref<16x16xf32, #tpu.memory_space<smem>>
    %c4_167 = arith.constant 4 : index
    %c3_168 = arith.constant 3 : index
    %196 = memref.load %arg4[%c4_167, %c3_168] : memref<16x16xf32, #tpu.memory_space<smem>>
    %c4_169 = arith.constant 4 : index
    %c4_170 = arith.constant 4 : index
    %197 = memref.load %arg4[%c4_169, %c4_170] : memref<16x16xf32, #tpu.memory_space<smem>>
    %c4_171 = arith.constant 4 : index
    %c5_172 = arith.constant 5 : index
    %198 = memref.load %arg4[%c4_171, %c5_172] : memref<16x16xf32, #tpu.memory_space<smem>>
    %c4_173 = arith.constant 4 : index
    %c6_174 = arith.constant 6 : index
    %199 = memref.load %arg4[%c4_173, %c6_174] : memref<16x16xf32, #tpu.memory_space<smem>>
    %c4_175 = arith.constant 4 : index
    %c7_176 = arith.constant 7 : index
    %200 = memref.load %arg4[%c4_175, %c7_176] : memref<16x16xf32, #tpu.memory_space<smem>>
    %c4_177 = arith.constant 4 : index
    %c8_178 = arith.constant 8 : index
    %201 = memref.load %arg4[%c4_177, %c8_178] : memref<16x16xf32, #tpu.memory_space<smem>>
    %c4_179 = arith.constant 4 : index
    %c9_180 = arith.constant 9 : index
    %202 = memref.load %arg4[%c4_179, %c9_180] : memref<16x16xf32, #tpu.memory_space<smem>>
    %c4_181 = arith.constant 4 : index
    %c10_182 = arith.constant 10 : index
    %203 = memref.load %arg4[%c4_181, %c10_182] : memref<16x16xf32, #tpu.memory_space<smem>>
    %c4_183 = arith.constant 4 : index
    %c11_184 = arith.constant 11 : index
    %204 = memref.load %arg4[%c4_183, %c11_184] : memref<16x16xf32, #tpu.memory_space<smem>>
    %c4_185 = arith.constant 4 : index
    %c12_186 = arith.constant 12 : index
    %205 = memref.load %arg4[%c4_185, %c12_186] : memref<16x16xf32, #tpu.memory_space<smem>>
    %c4_187 = arith.constant 4 : index
    %c13_188 = arith.constant 13 : index
    %206 = memref.load %arg4[%c4_187, %c13_188] : memref<16x16xf32, #tpu.memory_space<smem>>
    %c4_189 = arith.constant 4 : index
    %c14_190 = arith.constant 14 : index
    %207 = memref.load %arg4[%c4_189, %c14_190] : memref<16x16xf32, #tpu.memory_space<smem>>
    %c4_191 = arith.constant 4 : index
    %c15_192 = arith.constant 15 : index
    %208 = memref.load %arg4[%c4_191, %c15_192] : memref<16x16xf32, #tpu.memory_space<smem>>
    %c5_193 = arith.constant 5 : index
    %c0_194 = arith.constant 0 : index
    %209 = memref.load %arg4[%c5_193, %c0_194] : memref<16x16xf32, #tpu.memory_space<smem>>
    %c5_195 = arith.constant 5 : index
    %c1_196 = arith.constant 1 : index
    %210 = memref.load %arg4[%c5_195, %c1_196] : memref<16x16xf32, #tpu.memory_space<smem>>
    %c5_197 = arith.constant 5 : index
    %c2_198 = arith.constant 2 : index
    %211 = memref.load %arg4[%c5_197, %c2_198] : memref<16x16xf32, #tpu.memory_space<smem>>
    %c5_199 = arith.constant 5 : index
    %c3_200 = arith.constant 3 : index
    %212 = memref.load %arg4[%c5_199, %c3_200] : memref<16x16xf32, #tpu.memory_space<smem>>
    %c5_201 = arith.constant 5 : index
    %c4_202 = arith.constant 4 : index
    %213 = memref.load %arg4[%c5_201, %c4_202] : memref<16x16xf32, #tpu.memory_space<smem>>
    %c5_203 = arith.constant 5 : index
    %c5_204 = arith.constant 5 : index
    %214 = memref.load %arg4[%c5_203, %c5_204] : memref<16x16xf32, #tpu.memory_space<smem>>
    %c5_205 = arith.constant 5 : index
    %c6_206 = arith.constant 6 : index
    %215 = memref.load %arg4[%c5_205, %c6_206] : memref<16x16xf32, #tpu.memory_space<smem>>
    %c5_207 = arith.constant 5 : index
    %c7_208 = arith.constant 7 : index
    %216 = memref.load %arg4[%c5_207, %c7_208] : memref<16x16xf32, #tpu.memory_space<smem>>
    %c5_209 = arith.constant 5 : index
    %c8_210 = arith.constant 8 : index
    %217 = memref.load %arg4[%c5_209, %c8_210] : memref<16x16xf32, #tpu.memory_space<smem>>
    %c5_211 = arith.constant 5 : index
    %c9_212 = arith.constant 9 : index
    %218 = memref.load %arg4[%c5_211, %c9_212] : memref<16x16xf32, #tpu.memory_space<smem>>
    %c5_213 = arith.constant 5 : index
    %c10_214 = arith.constant 10 : index
    %219 = memref.load %arg4[%c5_213, %c10_214] : memref<16x16xf32, #tpu.memory_space<smem>>
    %c5_215 = arith.constant 5 : index
    %c11_216 = arith.constant 11 : index
    %220 = memref.load %arg4[%c5_215, %c11_216] : memref<16x16xf32, #tpu.memory_space<smem>>
    %c5_217 = arith.constant 5 : index
    %c12_218 = arith.constant 12 : index
    %221 = memref.load %arg4[%c5_217, %c12_218] : memref<16x16xf32, #tpu.memory_space<smem>>
    %c5_219 = arith.constant 5 : index
    %c13_220 = arith.constant 13 : index
    %222 = memref.load %arg4[%c5_219, %c13_220] : memref<16x16xf32, #tpu.memory_space<smem>>
    %c5_221 = arith.constant 5 : index
    %c14_222 = arith.constant 14 : index
    %223 = memref.load %arg4[%c5_221, %c14_222] : memref<16x16xf32, #tpu.memory_space<smem>>
    %c5_223 = arith.constant 5 : index
    %c15_224 = arith.constant 15 : index
    %224 = memref.load %arg4[%c5_223, %c15_224] : memref<16x16xf32, #tpu.memory_space<smem>>
    %c6_225 = arith.constant 6 : index
    %c0_226 = arith.constant 0 : index
    %225 = memref.load %arg4[%c6_225, %c0_226] : memref<16x16xf32, #tpu.memory_space<smem>>
    %c6_227 = arith.constant 6 : index
    %c1_228 = arith.constant 1 : index
    %226 = memref.load %arg4[%c6_227, %c1_228] : memref<16x16xf32, #tpu.memory_space<smem>>
    %c6_229 = arith.constant 6 : index
    %c2_230 = arith.constant 2 : index
    %227 = memref.load %arg4[%c6_229, %c2_230] : memref<16x16xf32, #tpu.memory_space<smem>>
    %c6_231 = arith.constant 6 : index
    %c3_232 = arith.constant 3 : index
    %228 = memref.load %arg4[%c6_231, %c3_232] : memref<16x16xf32, #tpu.memory_space<smem>>
    %c6_233 = arith.constant 6 : index
    %c4_234 = arith.constant 4 : index
    %229 = memref.load %arg4[%c6_233, %c4_234] : memref<16x16xf32, #tpu.memory_space<smem>>
    %c6_235 = arith.constant 6 : index
    %c5_236 = arith.constant 5 : index
    %230 = memref.load %arg4[%c6_235, %c5_236] : memref<16x16xf32, #tpu.memory_space<smem>>
    %c6_237 = arith.constant 6 : index
    %c6_238 = arith.constant 6 : index
    %231 = memref.load %arg4[%c6_237, %c6_238] : memref<16x16xf32, #tpu.memory_space<smem>>
    %c6_239 = arith.constant 6 : index
    %c7_240 = arith.constant 7 : index
    %232 = memref.load %arg4[%c6_239, %c7_240] : memref<16x16xf32, #tpu.memory_space<smem>>
    %c6_241 = arith.constant 6 : index
    %c8_242 = arith.constant 8 : index
    %233 = memref.load %arg4[%c6_241, %c8_242] : memref<16x16xf32, #tpu.memory_space<smem>>
    %c6_243 = arith.constant 6 : index
    %c9_244 = arith.constant 9 : index
    %234 = memref.load %arg4[%c6_243, %c9_244] : memref<16x16xf32, #tpu.memory_space<smem>>
    %c6_245 = arith.constant 6 : index
    %c10_246 = arith.constant 10 : index
    %235 = memref.load %arg4[%c6_245, %c10_246] : memref<16x16xf32, #tpu.memory_space<smem>>
    %c6_247 = arith.constant 6 : index
    %c11_248 = arith.constant 11 : index
    %236 = memref.load %arg4[%c6_247, %c11_248] : memref<16x16xf32, #tpu.memory_space<smem>>
    %c6_249 = arith.constant 6 : index
    %c12_250 = arith.constant 12 : index
    %237 = memref.load %arg4[%c6_249, %c12_250] : memref<16x16xf32, #tpu.memory_space<smem>>
    %c6_251 = arith.constant 6 : index
    %c13_252 = arith.constant 13 : index
    %238 = memref.load %arg4[%c6_251, %c13_252] : memref<16x16xf32, #tpu.memory_space<smem>>
    %c6_253 = arith.constant 6 : index
    %c14_254 = arith.constant 14 : index
    %239 = memref.load %arg4[%c6_253, %c14_254] : memref<16x16xf32, #tpu.memory_space<smem>>
    %c6_255 = arith.constant 6 : index
    %c15_256 = arith.constant 15 : index
    %240 = memref.load %arg4[%c6_255, %c15_256] : memref<16x16xf32, #tpu.memory_space<smem>>
    %c7_257 = arith.constant 7 : index
    %c0_258 = arith.constant 0 : index
    %241 = memref.load %arg4[%c7_257, %c0_258] : memref<16x16xf32, #tpu.memory_space<smem>>
    %c7_259 = arith.constant 7 : index
    %c1_260 = arith.constant 1 : index
    %242 = memref.load %arg4[%c7_259, %c1_260] : memref<16x16xf32, #tpu.memory_space<smem>>
    %c7_261 = arith.constant 7 : index
    %c2_262 = arith.constant 2 : index
    %243 = memref.load %arg4[%c7_261, %c2_262] : memref<16x16xf32, #tpu.memory_space<smem>>
    %c7_263 = arith.constant 7 : index
    %c3_264 = arith.constant 3 : index
    %244 = memref.load %arg4[%c7_263, %c3_264] : memref<16x16xf32, #tpu.memory_space<smem>>
    %c7_265 = arith.constant 7 : index
    %c4_266 = arith.constant 4 : index
    %245 = memref.load %arg4[%c7_265, %c4_266] : memref<16x16xf32, #tpu.memory_space<smem>>
    %c7_267 = arith.constant 7 : index
    %c5_268 = arith.constant 5 : index
    %246 = memref.load %arg4[%c7_267, %c5_268] : memref<16x16xf32, #tpu.memory_space<smem>>
    %c7_269 = arith.constant 7 : index
    %c6_270 = arith.constant 6 : index
    %247 = memref.load %arg4[%c7_269, %c6_270] : memref<16x16xf32, #tpu.memory_space<smem>>
    %c7_271 = arith.constant 7 : index
    %c7_272 = arith.constant 7 : index
    %248 = memref.load %arg4[%c7_271, %c7_272] : memref<16x16xf32, #tpu.memory_space<smem>>
    %c7_273 = arith.constant 7 : index
    %c8_274 = arith.constant 8 : index
    %249 = memref.load %arg4[%c7_273, %c8_274] : memref<16x16xf32, #tpu.memory_space<smem>>
    %c7_275 = arith.constant 7 : index
    %c9_276 = arith.constant 9 : index
    %250 = memref.load %arg4[%c7_275, %c9_276] : memref<16x16xf32, #tpu.memory_space<smem>>
    %c7_277 = arith.constant 7 : index
    %c10_278 = arith.constant 10 : index
    %251 = memref.load %arg4[%c7_277, %c10_278] : memref<16x16xf32, #tpu.memory_space<smem>>
    %c7_279 = arith.constant 7 : index
    %c11_280 = arith.constant 11 : index
    %252 = memref.load %arg4[%c7_279, %c11_280] : memref<16x16xf32, #tpu.memory_space<smem>>
    %c7_281 = arith.constant 7 : index
    %c12_282 = arith.constant 12 : index
    %253 = memref.load %arg4[%c7_281, %c12_282] : memref<16x16xf32, #tpu.memory_space<smem>>
    %c7_283 = arith.constant 7 : index
    %c13_284 = arith.constant 13 : index
    %254 = memref.load %arg4[%c7_283, %c13_284] : memref<16x16xf32, #tpu.memory_space<smem>>
    %c7_285 = arith.constant 7 : index
    %c14_286 = arith.constant 14 : index
    %255 = memref.load %arg4[%c7_285, %c14_286] : memref<16x16xf32, #tpu.memory_space<smem>>
    %c7_287 = arith.constant 7 : index
    %c15_288 = arith.constant 15 : index
    %256 = memref.load %arg4[%c7_287, %c15_288] : memref<16x16xf32, #tpu.memory_space<smem>>
    %c8_289 = arith.constant 8 : index
    %c0_290 = arith.constant 0 : index
    %257 = memref.load %arg4[%c8_289, %c0_290] : memref<16x16xf32, #tpu.memory_space<smem>>
    %c8_291 = arith.constant 8 : index
    %c1_292 = arith.constant 1 : index
    %258 = memref.load %arg4[%c8_291, %c1_292] : memref<16x16xf32, #tpu.memory_space<smem>>
    %c8_293 = arith.constant 8 : index
    %c2_294 = arith.constant 2 : index
    %259 = memref.load %arg4[%c8_293, %c2_294] : memref<16x16xf32, #tpu.memory_space<smem>>
    %c8_295 = arith.constant 8 : index
    %c3_296 = arith.constant 3 : index
    %260 = memref.load %arg4[%c8_295, %c3_296] : memref<16x16xf32, #tpu.memory_space<smem>>
    %c8_297 = arith.constant 8 : index
    %c4_298 = arith.constant 4 : index
    %261 = memref.load %arg4[%c8_297, %c4_298] : memref<16x16xf32, #tpu.memory_space<smem>>
    %c8_299 = arith.constant 8 : index
    %c5_300 = arith.constant 5 : index
    %262 = memref.load %arg4[%c8_299, %c5_300] : memref<16x16xf32, #tpu.memory_space<smem>>
    %c8_301 = arith.constant 8 : index
    %c6_302 = arith.constant 6 : index
    %263 = memref.load %arg4[%c8_301, %c6_302] : memref<16x16xf32, #tpu.memory_space<smem>>
    %c8_303 = arith.constant 8 : index
    %c7_304 = arith.constant 7 : index
    %264 = memref.load %arg4[%c8_303, %c7_304] : memref<16x16xf32, #tpu.memory_space<smem>>
    %c8_305 = arith.constant 8 : index
    %c8_306 = arith.constant 8 : index
    %265 = memref.load %arg4[%c8_305, %c8_306] : memref<16x16xf32, #tpu.memory_space<smem>>
    %c8_307 = arith.constant 8 : index
    %c9_308 = arith.constant 9 : index
    %266 = memref.load %arg4[%c8_307, %c9_308] : memref<16x16xf32, #tpu.memory_space<smem>>
    %c8_309 = arith.constant 8 : index
    %c10_310 = arith.constant 10 : index
    %267 = memref.load %arg4[%c8_309, %c10_310] : memref<16x16xf32, #tpu.memory_space<smem>>
    %c8_311 = arith.constant 8 : index
    %c11_312 = arith.constant 11 : index
    %268 = memref.load %arg4[%c8_311, %c11_312] : memref<16x16xf32, #tpu.memory_space<smem>>
    %c8_313 = arith.constant 8 : index
    %c12_314 = arith.constant 12 : index
    %269 = memref.load %arg4[%c8_313, %c12_314] : memref<16x16xf32, #tpu.memory_space<smem>>
    %c8_315 = arith.constant 8 : index
    %c13_316 = arith.constant 13 : index
    %270 = memref.load %arg4[%c8_315, %c13_316] : memref<16x16xf32, #tpu.memory_space<smem>>
    %c8_317 = arith.constant 8 : index
    %c14_318 = arith.constant 14 : index
    %271 = memref.load %arg4[%c8_317, %c14_318] : memref<16x16xf32, #tpu.memory_space<smem>>
    %c8_319 = arith.constant 8 : index
    %c15_320 = arith.constant 15 : index
    %272 = memref.load %arg4[%c8_319, %c15_320] : memref<16x16xf32, #tpu.memory_space<smem>>
    %c9_321 = arith.constant 9 : index
    %c0_322 = arith.constant 0 : index
    %273 = memref.load %arg4[%c9_321, %c0_322] : memref<16x16xf32, #tpu.memory_space<smem>>
    %c9_323 = arith.constant 9 : index
    %c1_324 = arith.constant 1 : index
    %274 = memref.load %arg4[%c9_323, %c1_324] : memref<16x16xf32, #tpu.memory_space<smem>>
    %c9_325 = arith.constant 9 : index
    %c2_326 = arith.constant 2 : index
    %275 = memref.load %arg4[%c9_325, %c2_326] : memref<16x16xf32, #tpu.memory_space<smem>>
    %c9_327 = arith.constant 9 : index
    %c3_328 = arith.constant 3 : index
    %276 = memref.load %arg4[%c9_327, %c3_328] : memref<16x16xf32, #tpu.memory_space<smem>>
    %c9_329 = arith.constant 9 : index
    %c4_330 = arith.constant 4 : index
    %277 = memref.load %arg4[%c9_329, %c4_330] : memref<16x16xf32, #tpu.memory_space<smem>>
    %c9_331 = arith.constant 9 : index
    %c5_332 = arith.constant 5 : index
    %278 = memref.load %arg4[%c9_331, %c5_332] : memref<16x16xf32, #tpu.memory_space<smem>>
    %c9_333 = arith.constant 9 : index
    %c6_334 = arith.constant 6 : index
    %279 = memref.load %arg4[%c9_333, %c6_334] : memref<16x16xf32, #tpu.memory_space<smem>>
    %c9_335 = arith.constant 9 : index
    %c7_336 = arith.constant 7 : index
    %280 = memref.load %arg4[%c9_335, %c7_336] : memref<16x16xf32, #tpu.memory_space<smem>>
    %c9_337 = arith.constant 9 : index
    %c8_338 = arith.constant 8 : index
    %281 = memref.load %arg4[%c9_337, %c8_338] : memref<16x16xf32, #tpu.memory_space<smem>>
    %c9_339 = arith.constant 9 : index
    %c9_340 = arith.constant 9 : index
    %282 = memref.load %arg4[%c9_339, %c9_340] : memref<16x16xf32, #tpu.memory_space<smem>>
    %c9_341 = arith.constant 9 : index
    %c10_342 = arith.constant 10 : index
    %283 = memref.load %arg4[%c9_341, %c10_342] : memref<16x16xf32, #tpu.memory_space<smem>>
    %c9_343 = arith.constant 9 : index
    %c11_344 = arith.constant 11 : index
    %284 = memref.load %arg4[%c9_343, %c11_344] : memref<16x16xf32, #tpu.memory_space<smem>>
    %c9_345 = arith.constant 9 : index
    %c12_346 = arith.constant 12 : index
    %285 = memref.load %arg4[%c9_345, %c12_346] : memref<16x16xf32, #tpu.memory_space<smem>>
    %c9_347 = arith.constant 9 : index
    %c13_348 = arith.constant 13 : index
    %286 = memref.load %arg4[%c9_347, %c13_348] : memref<16x16xf32, #tpu.memory_space<smem>>
    %c9_349 = arith.constant 9 : index
    %c14_350 = arith.constant 14 : index
    %287 = memref.load %arg4[%c9_349, %c14_350] : memref<16x16xf32, #tpu.memory_space<smem>>
    %c9_351 = arith.constant 9 : index
    %c15_352 = arith.constant 15 : index
    %288 = memref.load %arg4[%c9_351, %c15_352] : memref<16x16xf32, #tpu.memory_space<smem>>
    %c10_353 = arith.constant 10 : index
    %c0_354 = arith.constant 0 : index
    %289 = memref.load %arg4[%c10_353, %c0_354] : memref<16x16xf32, #tpu.memory_space<smem>>
    %c10_355 = arith.constant 10 : index
    %c1_356 = arith.constant 1 : index
    %290 = memref.load %arg4[%c10_355, %c1_356] : memref<16x16xf32, #tpu.memory_space<smem>>
    %c10_357 = arith.constant 10 : index
    %c2_358 = arith.constant 2 : index
    %291 = memref.load %arg4[%c10_357, %c2_358] : memref<16x16xf32, #tpu.memory_space<smem>>
    %c10_359 = arith.constant 10 : index
    %c3_360 = arith.constant 3 : index
    %292 = memref.load %arg4[%c10_359, %c3_360] : memref<16x16xf32, #tpu.memory_space<smem>>
    %c10_361 = arith.constant 10 : index
    %c4_362 = arith.constant 4 : index
    %293 = memref.load %arg4[%c10_361, %c4_362] : memref<16x16xf32, #tpu.memory_space<smem>>
    %c10_363 = arith.constant 10 : index
    %c5_364 = arith.constant 5 : index
    %294 = memref.load %arg4[%c10_363, %c5_364] : memref<16x16xf32, #tpu.memory_space<smem>>
    %c10_365 = arith.constant 10 : index
    %c6_366 = arith.constant 6 : index
    %295 = memref.load %arg4[%c10_365, %c6_366] : memref<16x16xf32, #tpu.memory_space<smem>>
    %c10_367 = arith.constant 10 : index
    %c7_368 = arith.constant 7 : index
    %296 = memref.load %arg4[%c10_367, %c7_368] : memref<16x16xf32, #tpu.memory_space<smem>>
    %c10_369 = arith.constant 10 : index
    %c8_370 = arith.constant 8 : index
    %297 = memref.load %arg4[%c10_369, %c8_370] : memref<16x16xf32, #tpu.memory_space<smem>>
    %c10_371 = arith.constant 10 : index
    %c9_372 = arith.constant 9 : index
    %298 = memref.load %arg4[%c10_371, %c9_372] : memref<16x16xf32, #tpu.memory_space<smem>>
    %c10_373 = arith.constant 10 : index
    %c10_374 = arith.constant 10 : index
    %299 = memref.load %arg4[%c10_373, %c10_374] : memref<16x16xf32, #tpu.memory_space<smem>>
    %c10_375 = arith.constant 10 : index
    %c11_376 = arith.constant 11 : index
    %300 = memref.load %arg4[%c10_375, %c11_376] : memref<16x16xf32, #tpu.memory_space<smem>>
    %c10_377 = arith.constant 10 : index
    %c12_378 = arith.constant 12 : index
    %301 = memref.load %arg4[%c10_377, %c12_378] : memref<16x16xf32, #tpu.memory_space<smem>>
    %c10_379 = arith.constant 10 : index
    %c13_380 = arith.constant 13 : index
    %302 = memref.load %arg4[%c10_379, %c13_380] : memref<16x16xf32, #tpu.memory_space<smem>>
    %c10_381 = arith.constant 10 : index
    %c14_382 = arith.constant 14 : index
    %303 = memref.load %arg4[%c10_381, %c14_382] : memref<16x16xf32, #tpu.memory_space<smem>>
    %c10_383 = arith.constant 10 : index
    %c15_384 = arith.constant 15 : index
    %304 = memref.load %arg4[%c10_383, %c15_384] : memref<16x16xf32, #tpu.memory_space<smem>>
    %c11_385 = arith.constant 11 : index
    %c0_386 = arith.constant 0 : index
    %305 = memref.load %arg4[%c11_385, %c0_386] : memref<16x16xf32, #tpu.memory_space<smem>>
    %c11_387 = arith.constant 11 : index
    %c1_388 = arith.constant 1 : index
    %306 = memref.load %arg4[%c11_387, %c1_388] : memref<16x16xf32, #tpu.memory_space<smem>>
    %c11_389 = arith.constant 11 : index
    %c2_390 = arith.constant 2 : index
    %307 = memref.load %arg4[%c11_389, %c2_390] : memref<16x16xf32, #tpu.memory_space<smem>>
    %c11_391 = arith.constant 11 : index
    %c3_392 = arith.constant 3 : index
    %308 = memref.load %arg4[%c11_391, %c3_392] : memref<16x16xf32, #tpu.memory_space<smem>>
    %c11_393 = arith.constant 11 : index
    %c4_394 = arith.constant 4 : index
    %309 = memref.load %arg4[%c11_393, %c4_394] : memref<16x16xf32, #tpu.memory_space<smem>>
    %c11_395 = arith.constant 11 : index
    %c5_396 = arith.constant 5 : index
    %310 = memref.load %arg4[%c11_395, %c5_396] : memref<16x16xf32, #tpu.memory_space<smem>>
    %c11_397 = arith.constant 11 : index
    %c6_398 = arith.constant 6 : index
    %311 = memref.load %arg4[%c11_397, %c6_398] : memref<16x16xf32, #tpu.memory_space<smem>>
    %c11_399 = arith.constant 11 : index
    %c7_400 = arith.constant 7 : index
    %312 = memref.load %arg4[%c11_399, %c7_400] : memref<16x16xf32, #tpu.memory_space<smem>>
    %c11_401 = arith.constant 11 : index
    %c8_402 = arith.constant 8 : index
    %313 = memref.load %arg4[%c11_401, %c8_402] : memref<16x16xf32, #tpu.memory_space<smem>>
    %c11_403 = arith.constant 11 : index
    %c9_404 = arith.constant 9 : index
    %314 = memref.load %arg4[%c11_403, %c9_404] : memref<16x16xf32, #tpu.memory_space<smem>>
    %c11_405 = arith.constant 11 : index
    %c10_406 = arith.constant 10 : index
    %315 = memref.load %arg4[%c11_405, %c10_406] : memref<16x16xf32, #tpu.memory_space<smem>>
    %c11_407 = arith.constant 11 : index
    %c11_408 = arith.constant 11 : index
    %316 = memref.load %arg4[%c11_407, %c11_408] : memref<16x16xf32, #tpu.memory_space<smem>>
    %c11_409 = arith.constant 11 : index
    %c12_410 = arith.constant 12 : index
    %317 = memref.load %arg4[%c11_409, %c12_410] : memref<16x16xf32, #tpu.memory_space<smem>>
    %c11_411 = arith.constant 11 : index
    %c13_412 = arith.constant 13 : index
    %318 = memref.load %arg4[%c11_411, %c13_412] : memref<16x16xf32, #tpu.memory_space<smem>>
    %c11_413 = arith.constant 11 : index
    %c14_414 = arith.constant 14 : index
    %319 = memref.load %arg4[%c11_413, %c14_414] : memref<16x16xf32, #tpu.memory_space<smem>>
    %c11_415 = arith.constant 11 : index
    %c15_416 = arith.constant 15 : index
    %320 = memref.load %arg4[%c11_415, %c15_416] : memref<16x16xf32, #tpu.memory_space<smem>>
    %c12_417 = arith.constant 12 : index
    %c0_418 = arith.constant 0 : index
    %321 = memref.load %arg4[%c12_417, %c0_418] : memref<16x16xf32, #tpu.memory_space<smem>>
    %c12_419 = arith.constant 12 : index
    %c1_420 = arith.constant 1 : index
    %322 = memref.load %arg4[%c12_419, %c1_420] : memref<16x16xf32, #tpu.memory_space<smem>>
    %c12_421 = arith.constant 12 : index
    %c2_422 = arith.constant 2 : index
    %323 = memref.load %arg4[%c12_421, %c2_422] : memref<16x16xf32, #tpu.memory_space<smem>>
    %c12_423 = arith.constant 12 : index
    %c3_424 = arith.constant 3 : index
    %324 = memref.load %arg4[%c12_423, %c3_424] : memref<16x16xf32, #tpu.memory_space<smem>>
    %c12_425 = arith.constant 12 : index
    %c4_426 = arith.constant 4 : index
    %325 = memref.load %arg4[%c12_425, %c4_426] : memref<16x16xf32, #tpu.memory_space<smem>>
    %c12_427 = arith.constant 12 : index
    %c5_428 = arith.constant 5 : index
    %326 = memref.load %arg4[%c12_427, %c5_428] : memref<16x16xf32, #tpu.memory_space<smem>>
    %c12_429 = arith.constant 12 : index
    %c6_430 = arith.constant 6 : index
    %327 = memref.load %arg4[%c12_429, %c6_430] : memref<16x16xf32, #tpu.memory_space<smem>>
    %c12_431 = arith.constant 12 : index
    %c7_432 = arith.constant 7 : index
    %328 = memref.load %arg4[%c12_431, %c7_432] : memref<16x16xf32, #tpu.memory_space<smem>>
    %c12_433 = arith.constant 12 : index
    %c8_434 = arith.constant 8 : index
    %329 = memref.load %arg4[%c12_433, %c8_434] : memref<16x16xf32, #tpu.memory_space<smem>>
    %c12_435 = arith.constant 12 : index
    %c9_436 = arith.constant 9 : index
    %330 = memref.load %arg4[%c12_435, %c9_436] : memref<16x16xf32, #tpu.memory_space<smem>>
    %c12_437 = arith.constant 12 : index
    %c10_438 = arith.constant 10 : index
    %331 = memref.load %arg4[%c12_437, %c10_438] : memref<16x16xf32, #tpu.memory_space<smem>>
    %c12_439 = arith.constant 12 : index
    %c11_440 = arith.constant 11 : index
    %332 = memref.load %arg4[%c12_439, %c11_440] : memref<16x16xf32, #tpu.memory_space<smem>>
    %c12_441 = arith.constant 12 : index
    %c12_442 = arith.constant 12 : index
    %333 = memref.load %arg4[%c12_441, %c12_442] : memref<16x16xf32, #tpu.memory_space<smem>>
    %c12_443 = arith.constant 12 : index
    %c13_444 = arith.constant 13 : index
    %334 = memref.load %arg4[%c12_443, %c13_444] : memref<16x16xf32, #tpu.memory_space<smem>>
    %c12_445 = arith.constant 12 : index
    %c14_446 = arith.constant 14 : index
    %335 = memref.load %arg4[%c12_445, %c14_446] : memref<16x16xf32, #tpu.memory_space<smem>>
    %c12_447 = arith.constant 12 : index
    %c15_448 = arith.constant 15 : index
    %336 = memref.load %arg4[%c12_447, %c15_448] : memref<16x16xf32, #tpu.memory_space<smem>>
    %c13_449 = arith.constant 13 : index
    %c0_450 = arith.constant 0 : index
    %337 = memref.load %arg4[%c13_449, %c0_450] : memref<16x16xf32, #tpu.memory_space<smem>>
    %c13_451 = arith.constant 13 : index
    %c1_452 = arith.constant 1 : index
    %338 = memref.load %arg4[%c13_451, %c1_452] : memref<16x16xf32, #tpu.memory_space<smem>>
    %c13_453 = arith.constant 13 : index
    %c2_454 = arith.constant 2 : index
    %339 = memref.load %arg4[%c13_453, %c2_454] : memref<16x16xf32, #tpu.memory_space<smem>>
    %c13_455 = arith.constant 13 : index
    %c3_456 = arith.constant 3 : index
    %340 = memref.load %arg4[%c13_455, %c3_456] : memref<16x16xf32, #tpu.memory_space<smem>>
    %c13_457 = arith.constant 13 : index
    %c4_458 = arith.constant 4 : index
    %341 = memref.load %arg4[%c13_457, %c4_458] : memref<16x16xf32, #tpu.memory_space<smem>>
    %c13_459 = arith.constant 13 : index
    %c5_460 = arith.constant 5 : index
    %342 = memref.load %arg4[%c13_459, %c5_460] : memref<16x16xf32, #tpu.memory_space<smem>>
    %c13_461 = arith.constant 13 : index
    %c6_462 = arith.constant 6 : index
    %343 = memref.load %arg4[%c13_461, %c6_462] : memref<16x16xf32, #tpu.memory_space<smem>>
    %c13_463 = arith.constant 13 : index
    %c7_464 = arith.constant 7 : index
    %344 = memref.load %arg4[%c13_463, %c7_464] : memref<16x16xf32, #tpu.memory_space<smem>>
    %c13_465 = arith.constant 13 : index
    %c8_466 = arith.constant 8 : index
    %345 = memref.load %arg4[%c13_465, %c8_466] : memref<16x16xf32, #tpu.memory_space<smem>>
    %c13_467 = arith.constant 13 : index
    %c9_468 = arith.constant 9 : index
    %346 = memref.load %arg4[%c13_467, %c9_468] : memref<16x16xf32, #tpu.memory_space<smem>>
    %c13_469 = arith.constant 13 : index
    %c10_470 = arith.constant 10 : index
    %347 = memref.load %arg4[%c13_469, %c10_470] : memref<16x16xf32, #tpu.memory_space<smem>>
    %c13_471 = arith.constant 13 : index
    %c11_472 = arith.constant 11 : index
    %348 = memref.load %arg4[%c13_471, %c11_472] : memref<16x16xf32, #tpu.memory_space<smem>>
    %c13_473 = arith.constant 13 : index
    %c12_474 = arith.constant 12 : index
    %349 = memref.load %arg4[%c13_473, %c12_474] : memref<16x16xf32, #tpu.memory_space<smem>>
    %c13_475 = arith.constant 13 : index
    %c13_476 = arith.constant 13 : index
    %350 = memref.load %arg4[%c13_475, %c13_476] : memref<16x16xf32, #tpu.memory_space<smem>>
    %c13_477 = arith.constant 13 : index
    %c14_478 = arith.constant 14 : index
    %351 = memref.load %arg4[%c13_477, %c14_478] : memref<16x16xf32, #tpu.memory_space<smem>>
    %c13_479 = arith.constant 13 : index
    %c15_480 = arith.constant 15 : index
    %352 = memref.load %arg4[%c13_479, %c15_480] : memref<16x16xf32, #tpu.memory_space<smem>>
    %c14_481 = arith.constant 14 : index
    %c0_482 = arith.constant 0 : index
    %353 = memref.load %arg4[%c14_481, %c0_482] : memref<16x16xf32, #tpu.memory_space<smem>>
    %c14_483 = arith.constant 14 : index
    %c1_484 = arith.constant 1 : index
    %354 = memref.load %arg4[%c14_483, %c1_484] : memref<16x16xf32, #tpu.memory_space<smem>>
    %c14_485 = arith.constant 14 : index
    %c2_486 = arith.constant 2 : index
    %355 = memref.load %arg4[%c14_485, %c2_486] : memref<16x16xf32, #tpu.memory_space<smem>>
    %c14_487 = arith.constant 14 : index
    %c3_488 = arith.constant 3 : index
    %356 = memref.load %arg4[%c14_487, %c3_488] : memref<16x16xf32, #tpu.memory_space<smem>>
    %c14_489 = arith.constant 14 : index
    %c4_490 = arith.constant 4 : index
    %357 = memref.load %arg4[%c14_489, %c4_490] : memref<16x16xf32, #tpu.memory_space<smem>>
    %c14_491 = arith.constant 14 : index
    %c5_492 = arith.constant 5 : index
    %358 = memref.load %arg4[%c14_491, %c5_492] : memref<16x16xf32, #tpu.memory_space<smem>>
    %c14_493 = arith.constant 14 : index
    %c6_494 = arith.constant 6 : index
    %359 = memref.load %arg4[%c14_493, %c6_494] : memref<16x16xf32, #tpu.memory_space<smem>>
    %c14_495 = arith.constant 14 : index
    %c7_496 = arith.constant 7 : index
    %360 = memref.load %arg4[%c14_495, %c7_496] : memref<16x16xf32, #tpu.memory_space<smem>>
    %c14_497 = arith.constant 14 : index
    %c8_498 = arith.constant 8 : index
    %361 = memref.load %arg4[%c14_497, %c8_498] : memref<16x16xf32, #tpu.memory_space<smem>>
    %c14_499 = arith.constant 14 : index
    %c9_500 = arith.constant 9 : index
    %362 = memref.load %arg4[%c14_499, %c9_500] : memref<16x16xf32, #tpu.memory_space<smem>>
    %c14_501 = arith.constant 14 : index
    %c10_502 = arith.constant 10 : index
    %363 = memref.load %arg4[%c14_501, %c10_502] : memref<16x16xf32, #tpu.memory_space<smem>>
    %c14_503 = arith.constant 14 : index
    %c11_504 = arith.constant 11 : index
    %364 = memref.load %arg4[%c14_503, %c11_504] : memref<16x16xf32, #tpu.memory_space<smem>>
    %c14_505 = arith.constant 14 : index
    %c12_506 = arith.constant 12 : index
    %365 = memref.load %arg4[%c14_505, %c12_506] : memref<16x16xf32, #tpu.memory_space<smem>>
    %c14_507 = arith.constant 14 : index
    %c13_508 = arith.constant 13 : index
    %366 = memref.load %arg4[%c14_507, %c13_508] : memref<16x16xf32, #tpu.memory_space<smem>>
    %c14_509 = arith.constant 14 : index
    %c14_510 = arith.constant 14 : index
    %367 = memref.load %arg4[%c14_509, %c14_510] : memref<16x16xf32, #tpu.memory_space<smem>>
    %c14_511 = arith.constant 14 : index
    %c15_512 = arith.constant 15 : index
    %368 = memref.load %arg4[%c14_511, %c15_512] : memref<16x16xf32, #tpu.memory_space<smem>>
    %c15_513 = arith.constant 15 : index
    %c0_514 = arith.constant 0 : index
    %369 = memref.load %arg4[%c15_513, %c0_514] : memref<16x16xf32, #tpu.memory_space<smem>>
    %c15_515 = arith.constant 15 : index
    %c1_516 = arith.constant 1 : index
    %370 = memref.load %arg4[%c15_515, %c1_516] : memref<16x16xf32, #tpu.memory_space<smem>>
    %c15_517 = arith.constant 15 : index
    %c2_518 = arith.constant 2 : index
    %371 = memref.load %arg4[%c15_517, %c2_518] : memref<16x16xf32, #tpu.memory_space<smem>>
    %c15_519 = arith.constant 15 : index
    %c3_520 = arith.constant 3 : index
    %372 = memref.load %arg4[%c15_519, %c3_520] : memref<16x16xf32, #tpu.memory_space<smem>>
    %c15_521 = arith.constant 15 : index
    %c4_522 = arith.constant 4 : index
    %373 = memref.load %arg4[%c15_521, %c4_522] : memref<16x16xf32, #tpu.memory_space<smem>>
    %c15_523 = arith.constant 15 : index
    %c5_524 = arith.constant 5 : index
    %374 = memref.load %arg4[%c15_523, %c5_524] : memref<16x16xf32, #tpu.memory_space<smem>>
    %c15_525 = arith.constant 15 : index
    %c6_526 = arith.constant 6 : index
    %375 = memref.load %arg4[%c15_525, %c6_526] : memref<16x16xf32, #tpu.memory_space<smem>>
    %c15_527 = arith.constant 15 : index
    %c7_528 = arith.constant 7 : index
    %376 = memref.load %arg4[%c15_527, %c7_528] : memref<16x16xf32, #tpu.memory_space<smem>>
    %c15_529 = arith.constant 15 : index
    %c8_530 = arith.constant 8 : index
    %377 = memref.load %arg4[%c15_529, %c8_530] : memref<16x16xf32, #tpu.memory_space<smem>>
    %c15_531 = arith.constant 15 : index
    %c9_532 = arith.constant 9 : index
    %378 = memref.load %arg4[%c15_531, %c9_532] : memref<16x16xf32, #tpu.memory_space<smem>>
    %c15_533 = arith.constant 15 : index
    %c10_534 = arith.constant 10 : index
    %379 = memref.load %arg4[%c15_533, %c10_534] : memref<16x16xf32, #tpu.memory_space<smem>>
    %c15_535 = arith.constant 15 : index
    %c11_536 = arith.constant 11 : index
    %380 = memref.load %arg4[%c15_535, %c11_536] : memref<16x16xf32, #tpu.memory_space<smem>>
    %c15_537 = arith.constant 15 : index
    %c12_538 = arith.constant 12 : index
    %381 = memref.load %arg4[%c15_537, %c12_538] : memref<16x16xf32, #tpu.memory_space<smem>>
    %c15_539 = arith.constant 15 : index
    %c13_540 = arith.constant 13 : index
    %382 = memref.load %arg4[%c15_539, %c13_540] : memref<16x16xf32, #tpu.memory_space<smem>>
    %c15_541 = arith.constant 15 : index
    %c14_542 = arith.constant 14 : index
    %383 = memref.load %arg4[%c15_541, %c14_542] : memref<16x16xf32, #tpu.memory_space<smem>>
    %c15_543 = arith.constant 15 : index
    %c15_544 = arith.constant 15 : index
    %384 = memref.load %arg4[%c15_543, %c15_544] : memref<16x16xf32, #tpu.memory_space<smem>>
    %c0_545 = arith.constant 0 : index
    %385 = memref.load %arg5[%c0_545] : memref<16xf32, #tpu.memory_space<smem>>
    %c1_546 = arith.constant 1 : index
    %386 = memref.load %arg5[%c1_546] : memref<16xf32, #tpu.memory_space<smem>>
    %c2_547 = arith.constant 2 : index
    %387 = memref.load %arg5[%c2_547] : memref<16xf32, #tpu.memory_space<smem>>
    %c3_548 = arith.constant 3 : index
    %388 = memref.load %arg5[%c3_548] : memref<16xf32, #tpu.memory_space<smem>>
    %c4_549 = arith.constant 4 : index
    %389 = memref.load %arg5[%c4_549] : memref<16xf32, #tpu.memory_space<smem>>
    %c5_550 = arith.constant 5 : index
    %390 = memref.load %arg5[%c5_550] : memref<16xf32, #tpu.memory_space<smem>>
    %c6_551 = arith.constant 6 : index
    %391 = memref.load %arg5[%c6_551] : memref<16xf32, #tpu.memory_space<smem>>
    %c7_552 = arith.constant 7 : index
    %392 = memref.load %arg5[%c7_552] : memref<16xf32, #tpu.memory_space<smem>>
    %c8_553 = arith.constant 8 : index
    %393 = memref.load %arg5[%c8_553] : memref<16xf32, #tpu.memory_space<smem>>
    %c9_554 = arith.constant 9 : index
    %394 = memref.load %arg5[%c9_554] : memref<16xf32, #tpu.memory_space<smem>>
    %c10_555 = arith.constant 10 : index
    %395 = memref.load %arg5[%c10_555] : memref<16xf32, #tpu.memory_space<smem>>
    %c11_556 = arith.constant 11 : index
    %396 = memref.load %arg5[%c11_556] : memref<16xf32, #tpu.memory_space<smem>>
    %c12_557 = arith.constant 12 : index
    %397 = memref.load %arg5[%c12_557] : memref<16xf32, #tpu.memory_space<smem>>
    %c13_558 = arith.constant 13 : index
    %398 = memref.load %arg5[%c13_558] : memref<16xf32, #tpu.memory_space<smem>>
    %c14_559 = arith.constant 14 : index
    %399 = memref.load %arg5[%c14_559] : memref<16xf32, #tpu.memory_space<smem>>
    %c15_560 = arith.constant 15 : index
    %400 = memref.load %arg5[%c15_560] : memref<16xf32, #tpu.memory_space<smem>>
    %c0_561 = arith.constant 0 : index
    %401 = memref.load %arg6[%c0_561] : memref<16xf32, #tpu.memory_space<smem>>
    %c1_562 = arith.constant 1 : index
    %402 = memref.load %arg6[%c1_562] : memref<16xf32, #tpu.memory_space<smem>>
    %c2_563 = arith.constant 2 : index
    %403 = memref.load %arg6[%c2_563] : memref<16xf32, #tpu.memory_space<smem>>
    %c3_564 = arith.constant 3 : index
    %404 = memref.load %arg6[%c3_564] : memref<16xf32, #tpu.memory_space<smem>>
    %c4_565 = arith.constant 4 : index
    %405 = memref.load %arg6[%c4_565] : memref<16xf32, #tpu.memory_space<smem>>
    %c5_566 = arith.constant 5 : index
    %406 = memref.load %arg6[%c5_566] : memref<16xf32, #tpu.memory_space<smem>>
    %c6_567 = arith.constant 6 : index
    %407 = memref.load %arg6[%c6_567] : memref<16xf32, #tpu.memory_space<smem>>
    %c7_568 = arith.constant 7 : index
    %408 = memref.load %arg6[%c7_568] : memref<16xf32, #tpu.memory_space<smem>>
    %c8_569 = arith.constant 8 : index
    %409 = memref.load %arg6[%c8_569] : memref<16xf32, #tpu.memory_space<smem>>
    %c9_570 = arith.constant 9 : index
    %410 = memref.load %arg6[%c9_570] : memref<16xf32, #tpu.memory_space<smem>>
    %c10_571 = arith.constant 10 : index
    %411 = memref.load %arg6[%c10_571] : memref<16xf32, #tpu.memory_space<smem>>
    %c11_572 = arith.constant 11 : index
    %412 = memref.load %arg6[%c11_572] : memref<16xf32, #tpu.memory_space<smem>>
    %c12_573 = arith.constant 12 : index
    %413 = memref.load %arg6[%c12_573] : memref<16xf32, #tpu.memory_space<smem>>
    %c13_574 = arith.constant 13 : index
    %414 = memref.load %arg6[%c13_574] : memref<16xf32, #tpu.memory_space<smem>>
    %c14_575 = arith.constant 14 : index
    %415 = memref.load %arg6[%c14_575] : memref<16xf32, #tpu.memory_space<smem>>
    %c15_576 = arith.constant 15 : index
    %416 = memref.load %arg6[%c15_576] : memref<16xf32, #tpu.memory_space<smem>>
    %417 = vector.broadcast %129 : f32 to vector<8x128xf32>
    %418 = arith.mulf %8, %417 : vector<8x128xf32>
    %419 = vector.broadcast %130 : f32 to vector<8x128xf32>
    %420 = arith.mulf %8, %419 : vector<8x128xf32>
    %421 = vector.broadcast %131 : f32 to vector<8x128xf32>
    %422 = arith.mulf %8, %421 : vector<8x128xf32>
    %423 = vector.broadcast %132 : f32 to vector<8x128xf32>
    %424 = arith.mulf %8, %423 : vector<8x128xf32>
    %425 = vector.broadcast %145 : f32 to vector<8x128xf32>
    %426 = arith.mulf %16, %425 : vector<8x128xf32>
    %427 = arith.addf %418, %426 : vector<8x128xf32>
    %428 = vector.broadcast %146 : f32 to vector<8x128xf32>
    %429 = arith.mulf %16, %428 : vector<8x128xf32>
    %430 = arith.addf %420, %429 : vector<8x128xf32>
    %431 = vector.broadcast %147 : f32 to vector<8x128xf32>
    %432 = arith.mulf %16, %431 : vector<8x128xf32>
    %433 = arith.addf %422, %432 : vector<8x128xf32>
    %434 = vector.broadcast %148 : f32 to vector<8x128xf32>
    %435 = arith.mulf %16, %434 : vector<8x128xf32>
    %436 = arith.addf %424, %435 : vector<8x128xf32>
    %437 = vector.broadcast %161 : f32 to vector<8x128xf32>
    %438 = arith.mulf %24, %437 : vector<8x128xf32>
    %439 = arith.addf %427, %438 : vector<8x128xf32>
    %440 = vector.broadcast %162 : f32 to vector<8x128xf32>
    %441 = arith.mulf %24, %440 : vector<8x128xf32>
    %442 = arith.addf %430, %441 : vector<8x128xf32>
    %443 = vector.broadcast %163 : f32 to vector<8x128xf32>
    %444 = arith.mulf %24, %443 : vector<8x128xf32>
    %445 = arith.addf %433, %444 : vector<8x128xf32>
    %446 = vector.broadcast %164 : f32 to vector<8x128xf32>
    %447 = arith.mulf %24, %446 : vector<8x128xf32>
    %448 = arith.addf %436, %447 : vector<8x128xf32>
    %449 = vector.broadcast %177 : f32 to vector<8x128xf32>
    %450 = arith.mulf %32, %449 : vector<8x128xf32>
    %451 = arith.addf %439, %450 : vector<8x128xf32>
    %452 = vector.broadcast %178 : f32 to vector<8x128xf32>
    %453 = arith.mulf %32, %452 : vector<8x128xf32>
    %454 = arith.addf %442, %453 : vector<8x128xf32>
    %455 = vector.broadcast %179 : f32 to vector<8x128xf32>
    %456 = arith.mulf %32, %455 : vector<8x128xf32>
    %457 = arith.addf %445, %456 : vector<8x128xf32>
    %458 = vector.broadcast %180 : f32 to vector<8x128xf32>
    %459 = arith.mulf %32, %458 : vector<8x128xf32>
    %460 = arith.addf %448, %459 : vector<8x128xf32>
    %461 = vector.broadcast %193 : f32 to vector<8x128xf32>
    %462 = arith.mulf %40, %461 : vector<8x128xf32>
    %463 = arith.addf %451, %462 : vector<8x128xf32>
    %464 = vector.broadcast %194 : f32 to vector<8x128xf32>
    %465 = arith.mulf %40, %464 : vector<8x128xf32>
    %466 = arith.addf %454, %465 : vector<8x128xf32>
    %467 = vector.broadcast %195 : f32 to vector<8x128xf32>
    %468 = arith.mulf %40, %467 : vector<8x128xf32>
    %469 = arith.addf %457, %468 : vector<8x128xf32>
    %470 = vector.broadcast %196 : f32 to vector<8x128xf32>
    %471 = arith.mulf %40, %470 : vector<8x128xf32>
    %472 = arith.addf %460, %471 : vector<8x128xf32>
    %473 = vector.broadcast %209 : f32 to vector<8x128xf32>
    %474 = arith.mulf %48, %473 : vector<8x128xf32>
    %475 = arith.addf %463, %474 : vector<8x128xf32>
    %476 = vector.broadcast %210 : f32 to vector<8x128xf32>
    %477 = arith.mulf %48, %476 : vector<8x128xf32>
    %478 = arith.addf %466, %477 : vector<8x128xf32>
    %479 = vector.broadcast %211 : f32 to vector<8x128xf32>
    %480 = arith.mulf %48, %479 : vector<8x128xf32>
    %481 = arith.addf %469, %480 : vector<8x128xf32>
    %482 = vector.broadcast %212 : f32 to vector<8x128xf32>
    %483 = arith.mulf %48, %482 : vector<8x128xf32>
    %484 = arith.addf %472, %483 : vector<8x128xf32>
    %485 = vector.broadcast %225 : f32 to vector<8x128xf32>
    %486 = arith.mulf %56, %485 : vector<8x128xf32>
    %487 = arith.addf %475, %486 : vector<8x128xf32>
    %488 = vector.broadcast %226 : f32 to vector<8x128xf32>
    %489 = arith.mulf %56, %488 : vector<8x128xf32>
    %490 = arith.addf %478, %489 : vector<8x128xf32>
    %491 = vector.broadcast %227 : f32 to vector<8x128xf32>
    %492 = arith.mulf %56, %491 : vector<8x128xf32>
    %493 = arith.addf %481, %492 : vector<8x128xf32>
    %494 = vector.broadcast %228 : f32 to vector<8x128xf32>
    %495 = arith.mulf %56, %494 : vector<8x128xf32>
    %496 = arith.addf %484, %495 : vector<8x128xf32>
    %497 = vector.broadcast %241 : f32 to vector<8x128xf32>
    %498 = arith.mulf %64, %497 : vector<8x128xf32>
    %499 = arith.addf %487, %498 : vector<8x128xf32>
    %500 = vector.broadcast %242 : f32 to vector<8x128xf32>
    %501 = arith.mulf %64, %500 : vector<8x128xf32>
    %502 = arith.addf %490, %501 : vector<8x128xf32>
    %503 = vector.broadcast %243 : f32 to vector<8x128xf32>
    %504 = arith.mulf %64, %503 : vector<8x128xf32>
    %505 = arith.addf %493, %504 : vector<8x128xf32>
    %506 = vector.broadcast %244 : f32 to vector<8x128xf32>
    %507 = arith.mulf %64, %506 : vector<8x128xf32>
    %508 = arith.addf %496, %507 : vector<8x128xf32>
    %509 = vector.broadcast %257 : f32 to vector<8x128xf32>
    %510 = arith.mulf %72, %509 : vector<8x128xf32>
    %511 = vector.broadcast %258 : f32 to vector<8x128xf32>
    %512 = arith.mulf %72, %511 : vector<8x128xf32>
    %513 = vector.broadcast %259 : f32 to vector<8x128xf32>
    %514 = arith.mulf %72, %513 : vector<8x128xf32>
    %515 = vector.broadcast %260 : f32 to vector<8x128xf32>
    %516 = arith.mulf %72, %515 : vector<8x128xf32>
    %517 = vector.broadcast %273 : f32 to vector<8x128xf32>
    %518 = arith.mulf %80, %517 : vector<8x128xf32>
    %519 = arith.addf %510, %518 : vector<8x128xf32>
    %520 = vector.broadcast %274 : f32 to vector<8x128xf32>
    %521 = arith.mulf %80, %520 : vector<8x128xf32>
    %522 = arith.addf %512, %521 : vector<8x128xf32>
    %523 = vector.broadcast %275 : f32 to vector<8x128xf32>
    %524 = arith.mulf %80, %523 : vector<8x128xf32>
    %525 = arith.addf %514, %524 : vector<8x128xf32>
    %526 = vector.broadcast %276 : f32 to vector<8x128xf32>
    %527 = arith.mulf %80, %526 : vector<8x128xf32>
    %528 = arith.addf %516, %527 : vector<8x128xf32>
    %529 = vector.broadcast %289 : f32 to vector<8x128xf32>
    %530 = arith.mulf %88, %529 : vector<8x128xf32>
    %531 = arith.addf %519, %530 : vector<8x128xf32>
    %532 = vector.broadcast %290 : f32 to vector<8x128xf32>
    %533 = arith.mulf %88, %532 : vector<8x128xf32>
    %534 = arith.addf %522, %533 : vector<8x128xf32>
    %535 = vector.broadcast %291 : f32 to vector<8x128xf32>
    %536 = arith.mulf %88, %535 : vector<8x128xf32>
    %537 = arith.addf %525, %536 : vector<8x128xf32>
    %538 = vector.broadcast %292 : f32 to vector<8x128xf32>
    %539 = arith.mulf %88, %538 : vector<8x128xf32>
    %540 = arith.addf %528, %539 : vector<8x128xf32>
    %541 = vector.broadcast %305 : f32 to vector<8x128xf32>
    %542 = arith.mulf %96, %541 : vector<8x128xf32>
    %543 = arith.addf %531, %542 : vector<8x128xf32>
    %544 = vector.broadcast %306 : f32 to vector<8x128xf32>
    %545 = arith.mulf %96, %544 : vector<8x128xf32>
    %546 = arith.addf %534, %545 : vector<8x128xf32>
    %547 = vector.broadcast %307 : f32 to vector<8x128xf32>
    %548 = arith.mulf %96, %547 : vector<8x128xf32>
    %549 = arith.addf %537, %548 : vector<8x128xf32>
    %550 = vector.broadcast %308 : f32 to vector<8x128xf32>
    %551 = arith.mulf %96, %550 : vector<8x128xf32>
    %552 = arith.addf %540, %551 : vector<8x128xf32>
    %553 = vector.broadcast %321 : f32 to vector<8x128xf32>
    %554 = arith.mulf %104, %553 : vector<8x128xf32>
    %555 = arith.addf %543, %554 : vector<8x128xf32>
    %556 = vector.broadcast %322 : f32 to vector<8x128xf32>
    %557 = arith.mulf %104, %556 : vector<8x128xf32>
    %558 = arith.addf %546, %557 : vector<8x128xf32>
    %559 = vector.broadcast %323 : f32 to vector<8x128xf32>
    %560 = arith.mulf %104, %559 : vector<8x128xf32>
    %561 = arith.addf %549, %560 : vector<8x128xf32>
    %562 = vector.broadcast %324 : f32 to vector<8x128xf32>
    %563 = arith.mulf %104, %562 : vector<8x128xf32>
    %564 = arith.addf %552, %563 : vector<8x128xf32>
    %565 = vector.broadcast %337 : f32 to vector<8x128xf32>
    %566 = arith.mulf %112, %565 : vector<8x128xf32>
    %567 = arith.addf %555, %566 : vector<8x128xf32>
    %568 = vector.broadcast %338 : f32 to vector<8x128xf32>
    %569 = arith.mulf %112, %568 : vector<8x128xf32>
    %570 = arith.addf %558, %569 : vector<8x128xf32>
    %571 = vector.broadcast %339 : f32 to vector<8x128xf32>
    %572 = arith.mulf %112, %571 : vector<8x128xf32>
    %573 = arith.addf %561, %572 : vector<8x128xf32>
    %574 = vector.broadcast %340 : f32 to vector<8x128xf32>
    %575 = arith.mulf %112, %574 : vector<8x128xf32>
    %576 = arith.addf %564, %575 : vector<8x128xf32>
    %577 = vector.broadcast %353 : f32 to vector<8x128xf32>
    %578 = arith.mulf %120, %577 : vector<8x128xf32>
    %579 = arith.addf %567, %578 : vector<8x128xf32>
    %580 = vector.broadcast %354 : f32 to vector<8x128xf32>
    %581 = arith.mulf %120, %580 : vector<8x128xf32>
    %582 = arith.addf %570, %581 : vector<8x128xf32>
    %583 = vector.broadcast %355 : f32 to vector<8x128xf32>
    %584 = arith.mulf %120, %583 : vector<8x128xf32>
    %585 = arith.addf %573, %584 : vector<8x128xf32>
    %586 = vector.broadcast %356 : f32 to vector<8x128xf32>
    %587 = arith.mulf %120, %586 : vector<8x128xf32>
    %588 = arith.addf %576, %587 : vector<8x128xf32>
    %589 = vector.broadcast %369 : f32 to vector<8x128xf32>
    %590 = arith.mulf %128, %589 : vector<8x128xf32>
    %591 = arith.addf %579, %590 : vector<8x128xf32>
    %592 = vector.broadcast %370 : f32 to vector<8x128xf32>
    %593 = arith.mulf %128, %592 : vector<8x128xf32>
    %594 = arith.addf %582, %593 : vector<8x128xf32>
    %595 = vector.broadcast %371 : f32 to vector<8x128xf32>
    %596 = arith.mulf %128, %595 : vector<8x128xf32>
    %597 = arith.addf %585, %596 : vector<8x128xf32>
    %598 = vector.broadcast %372 : f32 to vector<8x128xf32>
    %599 = arith.mulf %128, %598 : vector<8x128xf32>
    %600 = arith.addf %588, %599 : vector<8x128xf32>
    %601 = arith.addf %499, %591 : vector<8x128xf32>
    %602 = vector.broadcast %385 : f32 to vector<8x128xf32>
    %603 = arith.addf %601, %602 : vector<8x128xf32>
    %cst_577 = arith.constant 0.000000e+00 : f32
    %604 = vector.broadcast %cst_577 : f32 to vector<8x128xf32>
    %605 = arith.maximumf %603, %604 : vector<8x128xf32>
    %606 = vector.broadcast %401 : f32 to vector<8x128xf32>
    %607 = arith.mulf %605, %606 : vector<8x128xf32>
    %608 = arith.addf %502, %594 : vector<8x128xf32>
    %609 = vector.broadcast %386 : f32 to vector<8x128xf32>
    %610 = arith.addf %608, %609 : vector<8x128xf32>
    %cst_578 = arith.constant 0.000000e+00 : f32
    %611 = vector.broadcast %cst_578 : f32 to vector<8x128xf32>
    %612 = arith.maximumf %610, %611 : vector<8x128xf32>
    %613 = vector.broadcast %402 : f32 to vector<8x128xf32>
    %614 = arith.mulf %612, %613 : vector<8x128xf32>
    %615 = arith.addf %607, %614 : vector<8x128xf32>
    %616 = arith.addf %505, %597 : vector<8x128xf32>
    %617 = vector.broadcast %387 : f32 to vector<8x128xf32>
    %618 = arith.addf %616, %617 : vector<8x128xf32>
    %cst_579 = arith.constant 0.000000e+00 : f32
    %619 = vector.broadcast %cst_579 : f32 to vector<8x128xf32>
    %620 = arith.maximumf %618, %619 : vector<8x128xf32>
    %621 = vector.broadcast %403 : f32 to vector<8x128xf32>
    %622 = arith.mulf %620, %621 : vector<8x128xf32>
    %623 = arith.addf %615, %622 : vector<8x128xf32>
    %624 = arith.addf %508, %600 : vector<8x128xf32>
    %625 = vector.broadcast %388 : f32 to vector<8x128xf32>
    %626 = arith.addf %624, %625 : vector<8x128xf32>
    %cst_580 = arith.constant 0.000000e+00 : f32
    %627 = vector.broadcast %cst_580 : f32 to vector<8x128xf32>
    %628 = arith.maximumf %626, %627 : vector<8x128xf32>
    %629 = vector.broadcast %404 : f32 to vector<8x128xf32>
    %630 = arith.mulf %628, %629 : vector<8x128xf32>
    %631 = arith.addf %623, %630 : vector<8x128xf32>
    %632 = vector.broadcast %133 : f32 to vector<8x128xf32>
    %633 = arith.mulf %8, %632 : vector<8x128xf32>
    %634 = vector.broadcast %134 : f32 to vector<8x128xf32>
    %635 = arith.mulf %8, %634 : vector<8x128xf32>
    %636 = vector.broadcast %135 : f32 to vector<8x128xf32>
    %637 = arith.mulf %8, %636 : vector<8x128xf32>
    %638 = vector.broadcast %136 : f32 to vector<8x128xf32>
    %639 = arith.mulf %8, %638 : vector<8x128xf32>
    %640 = vector.broadcast %149 : f32 to vector<8x128xf32>
    %641 = arith.mulf %16, %640 : vector<8x128xf32>
    %642 = arith.addf %633, %641 : vector<8x128xf32>
    %643 = vector.broadcast %150 : f32 to vector<8x128xf32>
    %644 = arith.mulf %16, %643 : vector<8x128xf32>
    %645 = arith.addf %635, %644 : vector<8x128xf32>
    %646 = vector.broadcast %151 : f32 to vector<8x128xf32>
    %647 = arith.mulf %16, %646 : vector<8x128xf32>
    %648 = arith.addf %637, %647 : vector<8x128xf32>
    %649 = vector.broadcast %152 : f32 to vector<8x128xf32>
    %650 = arith.mulf %16, %649 : vector<8x128xf32>
    %651 = arith.addf %639, %650 : vector<8x128xf32>
    %652 = vector.broadcast %165 : f32 to vector<8x128xf32>
    %653 = arith.mulf %24, %652 : vector<8x128xf32>
    %654 = arith.addf %642, %653 : vector<8x128xf32>
    %655 = vector.broadcast %166 : f32 to vector<8x128xf32>
    %656 = arith.mulf %24, %655 : vector<8x128xf32>
    %657 = arith.addf %645, %656 : vector<8x128xf32>
    %658 = vector.broadcast %167 : f32 to vector<8x128xf32>
    %659 = arith.mulf %24, %658 : vector<8x128xf32>
    %660 = arith.addf %648, %659 : vector<8x128xf32>
    %661 = vector.broadcast %168 : f32 to vector<8x128xf32>
    %662 = arith.mulf %24, %661 : vector<8x128xf32>
    %663 = arith.addf %651, %662 : vector<8x128xf32>
    %664 = vector.broadcast %181 : f32 to vector<8x128xf32>
    %665 = arith.mulf %32, %664 : vector<8x128xf32>
    %666 = arith.addf %654, %665 : vector<8x128xf32>
    %667 = vector.broadcast %182 : f32 to vector<8x128xf32>
    %668 = arith.mulf %32, %667 : vector<8x128xf32>
    %669 = arith.addf %657, %668 : vector<8x128xf32>
    %670 = vector.broadcast %183 : f32 to vector<8x128xf32>
    %671 = arith.mulf %32, %670 : vector<8x128xf32>
    %672 = arith.addf %660, %671 : vector<8x128xf32>
    %673 = vector.broadcast %184 : f32 to vector<8x128xf32>
    %674 = arith.mulf %32, %673 : vector<8x128xf32>
    %675 = arith.addf %663, %674 : vector<8x128xf32>
    %676 = vector.broadcast %197 : f32 to vector<8x128xf32>
    %677 = arith.mulf %40, %676 : vector<8x128xf32>
    %678 = arith.addf %666, %677 : vector<8x128xf32>
    %679 = vector.broadcast %198 : f32 to vector<8x128xf32>
    %680 = arith.mulf %40, %679 : vector<8x128xf32>
    %681 = arith.addf %669, %680 : vector<8x128xf32>
    %682 = vector.broadcast %199 : f32 to vector<8x128xf32>
    %683 = arith.mulf %40, %682 : vector<8x128xf32>
    %684 = arith.addf %672, %683 : vector<8x128xf32>
    %685 = vector.broadcast %200 : f32 to vector<8x128xf32>
    %686 = arith.mulf %40, %685 : vector<8x128xf32>
    %687 = arith.addf %675, %686 : vector<8x128xf32>
    %688 = vector.broadcast %213 : f32 to vector<8x128xf32>
    %689 = arith.mulf %48, %688 : vector<8x128xf32>
    %690 = arith.addf %678, %689 : vector<8x128xf32>
    %691 = vector.broadcast %214 : f32 to vector<8x128xf32>
    %692 = arith.mulf %48, %691 : vector<8x128xf32>
    %693 = arith.addf %681, %692 : vector<8x128xf32>
    %694 = vector.broadcast %215 : f32 to vector<8x128xf32>
    %695 = arith.mulf %48, %694 : vector<8x128xf32>
    %696 = arith.addf %684, %695 : vector<8x128xf32>
    %697 = vector.broadcast %216 : f32 to vector<8x128xf32>
    %698 = arith.mulf %48, %697 : vector<8x128xf32>
    %699 = arith.addf %687, %698 : vector<8x128xf32>
    %700 = vector.broadcast %229 : f32 to vector<8x128xf32>
    %701 = arith.mulf %56, %700 : vector<8x128xf32>
    %702 = arith.addf %690, %701 : vector<8x128xf32>
    %703 = vector.broadcast %230 : f32 to vector<8x128xf32>
    %704 = arith.mulf %56, %703 : vector<8x128xf32>
    %705 = arith.addf %693, %704 : vector<8x128xf32>
    %706 = vector.broadcast %231 : f32 to vector<8x128xf32>
    %707 = arith.mulf %56, %706 : vector<8x128xf32>
    %708 = arith.addf %696, %707 : vector<8x128xf32>
    %709 = vector.broadcast %232 : f32 to vector<8x128xf32>
    %710 = arith.mulf %56, %709 : vector<8x128xf32>
    %711 = arith.addf %699, %710 : vector<8x128xf32>
    %712 = vector.broadcast %245 : f32 to vector<8x128xf32>
    %713 = arith.mulf %64, %712 : vector<8x128xf32>
    %714 = arith.addf %702, %713 : vector<8x128xf32>
    %715 = vector.broadcast %246 : f32 to vector<8x128xf32>
    %716 = arith.mulf %64, %715 : vector<8x128xf32>
    %717 = arith.addf %705, %716 : vector<8x128xf32>
    %718 = vector.broadcast %247 : f32 to vector<8x128xf32>
    %719 = arith.mulf %64, %718 : vector<8x128xf32>
    %720 = arith.addf %708, %719 : vector<8x128xf32>
    %721 = vector.broadcast %248 : f32 to vector<8x128xf32>
    %722 = arith.mulf %64, %721 : vector<8x128xf32>
    %723 = arith.addf %711, %722 : vector<8x128xf32>
    %724 = vector.broadcast %261 : f32 to vector<8x128xf32>
    %725 = arith.mulf %72, %724 : vector<8x128xf32>
    %726 = vector.broadcast %262 : f32 to vector<8x128xf32>
    %727 = arith.mulf %72, %726 : vector<8x128xf32>
    %728 = vector.broadcast %263 : f32 to vector<8x128xf32>
    %729 = arith.mulf %72, %728 : vector<8x128xf32>
    %730 = vector.broadcast %264 : f32 to vector<8x128xf32>
    %731 = arith.mulf %72, %730 : vector<8x128xf32>
    %732 = vector.broadcast %277 : f32 to vector<8x128xf32>
    %733 = arith.mulf %80, %732 : vector<8x128xf32>
    %734 = arith.addf %725, %733 : vector<8x128xf32>
    %735 = vector.broadcast %278 : f32 to vector<8x128xf32>
    %736 = arith.mulf %80, %735 : vector<8x128xf32>
    %737 = arith.addf %727, %736 : vector<8x128xf32>
    %738 = vector.broadcast %279 : f32 to vector<8x128xf32>
    %739 = arith.mulf %80, %738 : vector<8x128xf32>
    %740 = arith.addf %729, %739 : vector<8x128xf32>
    %741 = vector.broadcast %280 : f32 to vector<8x128xf32>
    %742 = arith.mulf %80, %741 : vector<8x128xf32>
    %743 = arith.addf %731, %742 : vector<8x128xf32>
    %744 = vector.broadcast %293 : f32 to vector<8x128xf32>
    %745 = arith.mulf %88, %744 : vector<8x128xf32>
    %746 = arith.addf %734, %745 : vector<8x128xf32>
    %747 = vector.broadcast %294 : f32 to vector<8x128xf32>
    %748 = arith.mulf %88, %747 : vector<8x128xf32>
    %749 = arith.addf %737, %748 : vector<8x128xf32>
    %750 = vector.broadcast %295 : f32 to vector<8x128xf32>
    %751 = arith.mulf %88, %750 : vector<8x128xf32>
    %752 = arith.addf %740, %751 : vector<8x128xf32>
    %753 = vector.broadcast %296 : f32 to vector<8x128xf32>
    %754 = arith.mulf %88, %753 : vector<8x128xf32>
    %755 = arith.addf %743, %754 : vector<8x128xf32>
    %756 = vector.broadcast %309 : f32 to vector<8x128xf32>
    %757 = arith.mulf %96, %756 : vector<8x128xf32>
    %758 = arith.addf %746, %757 : vector<8x128xf32>
    %759 = vector.broadcast %310 : f32 to vector<8x128xf32>
    %760 = arith.mulf %96, %759 : vector<8x128xf32>
    %761 = arith.addf %749, %760 : vector<8x128xf32>
    %762 = vector.broadcast %311 : f32 to vector<8x128xf32>
    %763 = arith.mulf %96, %762 : vector<8x128xf32>
    %764 = arith.addf %752, %763 : vector<8x128xf32>
    %765 = vector.broadcast %312 : f32 to vector<8x128xf32>
    %766 = arith.mulf %96, %765 : vector<8x128xf32>
    %767 = arith.addf %755, %766 : vector<8x128xf32>
    %768 = vector.broadcast %325 : f32 to vector<8x128xf32>
    %769 = arith.mulf %104, %768 : vector<8x128xf32>
    %770 = arith.addf %758, %769 : vector<8x128xf32>
    %771 = vector.broadcast %326 : f32 to vector<8x128xf32>
    %772 = arith.mulf %104, %771 : vector<8x128xf32>
    %773 = arith.addf %761, %772 : vector<8x128xf32>
    %774 = vector.broadcast %327 : f32 to vector<8x128xf32>
    %775 = arith.mulf %104, %774 : vector<8x128xf32>
    %776 = arith.addf %764, %775 : vector<8x128xf32>
    %777 = vector.broadcast %328 : f32 to vector<8x128xf32>
    %778 = arith.mulf %104, %777 : vector<8x128xf32>
    %779 = arith.addf %767, %778 : vector<8x128xf32>
    %780 = vector.broadcast %341 : f32 to vector<8x128xf32>
    %781 = arith.mulf %112, %780 : vector<8x128xf32>
    %782 = arith.addf %770, %781 : vector<8x128xf32>
    %783 = vector.broadcast %342 : f32 to vector<8x128xf32>
    %784 = arith.mulf %112, %783 : vector<8x128xf32>
    %785 = arith.addf %773, %784 : vector<8x128xf32>
    %786 = vector.broadcast %343 : f32 to vector<8x128xf32>
    %787 = arith.mulf %112, %786 : vector<8x128xf32>
    %788 = arith.addf %776, %787 : vector<8x128xf32>
    %789 = vector.broadcast %344 : f32 to vector<8x128xf32>
    %790 = arith.mulf %112, %789 : vector<8x128xf32>
    %791 = arith.addf %779, %790 : vector<8x128xf32>
    %792 = vector.broadcast %357 : f32 to vector<8x128xf32>
    %793 = arith.mulf %120, %792 : vector<8x128xf32>
    %794 = arith.addf %782, %793 : vector<8x128xf32>
    %795 = vector.broadcast %358 : f32 to vector<8x128xf32>
    %796 = arith.mulf %120, %795 : vector<8x128xf32>
    %797 = arith.addf %785, %796 : vector<8x128xf32>
    %798 = vector.broadcast %359 : f32 to vector<8x128xf32>
    %799 = arith.mulf %120, %798 : vector<8x128xf32>
    %800 = arith.addf %788, %799 : vector<8x128xf32>
    %801 = vector.broadcast %360 : f32 to vector<8x128xf32>
    %802 = arith.mulf %120, %801 : vector<8x128xf32>
    %803 = arith.addf %791, %802 : vector<8x128xf32>
    %804 = vector.broadcast %373 : f32 to vector<8x128xf32>
    %805 = arith.mulf %128, %804 : vector<8x128xf32>
    %806 = arith.addf %794, %805 : vector<8x128xf32>
    %807 = vector.broadcast %374 : f32 to vector<8x128xf32>
    %808 = arith.mulf %128, %807 : vector<8x128xf32>
    %809 = arith.addf %797, %808 : vector<8x128xf32>
    %810 = vector.broadcast %375 : f32 to vector<8x128xf32>
    %811 = arith.mulf %128, %810 : vector<8x128xf32>
    %812 = arith.addf %800, %811 : vector<8x128xf32>
    %813 = vector.broadcast %376 : f32 to vector<8x128xf32>
    %814 = arith.mulf %128, %813 : vector<8x128xf32>
    %815 = arith.addf %803, %814 : vector<8x128xf32>
    %816 = arith.addf %714, %806 : vector<8x128xf32>
    %817 = vector.broadcast %389 : f32 to vector<8x128xf32>
    %818 = arith.addf %816, %817 : vector<8x128xf32>
    %cst_581 = arith.constant 0.000000e+00 : f32
    %819 = vector.broadcast %cst_581 : f32 to vector<8x128xf32>
    %820 = arith.maximumf %818, %819 : vector<8x128xf32>
    %821 = vector.broadcast %405 : f32 to vector<8x128xf32>
    %822 = arith.mulf %820, %821 : vector<8x128xf32>
    %823 = arith.addf %631, %822 : vector<8x128xf32>
    %824 = arith.addf %717, %809 : vector<8x128xf32>
    %825 = vector.broadcast %390 : f32 to vector<8x128xf32>
    %826 = arith.addf %824, %825 : vector<8x128xf32>
    %cst_582 = arith.constant 0.000000e+00 : f32
    %827 = vector.broadcast %cst_582 : f32 to vector<8x128xf32>
    %828 = arith.maximumf %826, %827 : vector<8x128xf32>
    %829 = vector.broadcast %406 : f32 to vector<8x128xf32>
    %830 = arith.mulf %828, %829 : vector<8x128xf32>
    %831 = arith.addf %823, %830 : vector<8x128xf32>
    %832 = arith.addf %720, %812 : vector<8x128xf32>
    %833 = vector.broadcast %391 : f32 to vector<8x128xf32>
    %834 = arith.addf %832, %833 : vector<8x128xf32>
    %cst_583 = arith.constant 0.000000e+00 : f32
    %835 = vector.broadcast %cst_583 : f32 to vector<8x128xf32>
    %836 = arith.maximumf %834, %835 : vector<8x128xf32>
    %837 = vector.broadcast %407 : f32 to vector<8x128xf32>
    %838 = arith.mulf %836, %837 : vector<8x128xf32>
    %839 = arith.addf %831, %838 : vector<8x128xf32>
    %840 = arith.addf %723, %815 : vector<8x128xf32>
    %841 = vector.broadcast %392 : f32 to vector<8x128xf32>
    %842 = arith.addf %840, %841 : vector<8x128xf32>
    %cst_584 = arith.constant 0.000000e+00 : f32
    %843 = vector.broadcast %cst_584 : f32 to vector<8x128xf32>
    %844 = arith.maximumf %842, %843 : vector<8x128xf32>
    %845 = vector.broadcast %408 : f32 to vector<8x128xf32>
    %846 = arith.mulf %844, %845 : vector<8x128xf32>
    %847 = arith.addf %839, %846 : vector<8x128xf32>
    %848 = vector.broadcast %137 : f32 to vector<8x128xf32>
    %849 = arith.mulf %8, %848 : vector<8x128xf32>
    %850 = vector.broadcast %138 : f32 to vector<8x128xf32>
    %851 = arith.mulf %8, %850 : vector<8x128xf32>
    %852 = vector.broadcast %139 : f32 to vector<8x128xf32>
    %853 = arith.mulf %8, %852 : vector<8x128xf32>
    %854 = vector.broadcast %140 : f32 to vector<8x128xf32>
    %855 = arith.mulf %8, %854 : vector<8x128xf32>
    %856 = vector.broadcast %153 : f32 to vector<8x128xf32>
    %857 = arith.mulf %16, %856 : vector<8x128xf32>
    %858 = arith.addf %849, %857 : vector<8x128xf32>
    %859 = vector.broadcast %154 : f32 to vector<8x128xf32>
    %860 = arith.mulf %16, %859 : vector<8x128xf32>
    %861 = arith.addf %851, %860 : vector<8x128xf32>
    %862 = vector.broadcast %155 : f32 to vector<8x128xf32>
    %863 = arith.mulf %16, %862 : vector<8x128xf32>
    %864 = arith.addf %853, %863 : vector<8x128xf32>
    %865 = vector.broadcast %156 : f32 to vector<8x128xf32>
    %866 = arith.mulf %16, %865 : vector<8x128xf32>
    %867 = arith.addf %855, %866 : vector<8x128xf32>
    %868 = vector.broadcast %169 : f32 to vector<8x128xf32>
    %869 = arith.mulf %24, %868 : vector<8x128xf32>
    %870 = arith.addf %858, %869 : vector<8x128xf32>
    %871 = vector.broadcast %170 : f32 to vector<8x128xf32>
    %872 = arith.mulf %24, %871 : vector<8x128xf32>
    %873 = arith.addf %861, %872 : vector<8x128xf32>
    %874 = vector.broadcast %171 : f32 to vector<8x128xf32>
    %875 = arith.mulf %24, %874 : vector<8x128xf32>
    %876 = arith.addf %864, %875 : vector<8x128xf32>
    %877 = vector.broadcast %172 : f32 to vector<8x128xf32>
    %878 = arith.mulf %24, %877 : vector<8x128xf32>
    %879 = arith.addf %867, %878 : vector<8x128xf32>
    %880 = vector.broadcast %185 : f32 to vector<8x128xf32>
    %881 = arith.mulf %32, %880 : vector<8x128xf32>
    %882 = arith.addf %870, %881 : vector<8x128xf32>
    %883 = vector.broadcast %186 : f32 to vector<8x128xf32>
    %884 = arith.mulf %32, %883 : vector<8x128xf32>
    %885 = arith.addf %873, %884 : vector<8x128xf32>
    %886 = vector.broadcast %187 : f32 to vector<8x128xf32>
    %887 = arith.mulf %32, %886 : vector<8x128xf32>
    %888 = arith.addf %876, %887 : vector<8x128xf32>
    %889 = vector.broadcast %188 : f32 to vector<8x128xf32>
    %890 = arith.mulf %32, %889 : vector<8x128xf32>
    %891 = arith.addf %879, %890 : vector<8x128xf32>
    %892 = vector.broadcast %201 : f32 to vector<8x128xf32>
    %893 = arith.mulf %40, %892 : vector<8x128xf32>
    %894 = arith.addf %882, %893 : vector<8x128xf32>
    %895 = vector.broadcast %202 : f32 to vector<8x128xf32>
    %896 = arith.mulf %40, %895 : vector<8x128xf32>
    %897 = arith.addf %885, %896 : vector<8x128xf32>
    %898 = vector.broadcast %203 : f32 to vector<8x128xf32>
    %899 = arith.mulf %40, %898 : vector<8x128xf32>
    %900 = arith.addf %888, %899 : vector<8x128xf32>
    %901 = vector.broadcast %204 : f32 to vector<8x128xf32>
    %902 = arith.mulf %40, %901 : vector<8x128xf32>
    %903 = arith.addf %891, %902 : vector<8x128xf32>
    %904 = vector.broadcast %217 : f32 to vector<8x128xf32>
    %905 = arith.mulf %48, %904 : vector<8x128xf32>
    %906 = arith.addf %894, %905 : vector<8x128xf32>
    %907 = vector.broadcast %218 : f32 to vector<8x128xf32>
    %908 = arith.mulf %48, %907 : vector<8x128xf32>
    %909 = arith.addf %897, %908 : vector<8x128xf32>
    %910 = vector.broadcast %219 : f32 to vector<8x128xf32>
    %911 = arith.mulf %48, %910 : vector<8x128xf32>
    %912 = arith.addf %900, %911 : vector<8x128xf32>
    %913 = vector.broadcast %220 : f32 to vector<8x128xf32>
    %914 = arith.mulf %48, %913 : vector<8x128xf32>
    %915 = arith.addf %903, %914 : vector<8x128xf32>
    %916 = vector.broadcast %233 : f32 to vector<8x128xf32>
    %917 = arith.mulf %56, %916 : vector<8x128xf32>
    %918 = arith.addf %906, %917 : vector<8x128xf32>
    %919 = vector.broadcast %234 : f32 to vector<8x128xf32>
    %920 = arith.mulf %56, %919 : vector<8x128xf32>
    %921 = arith.addf %909, %920 : vector<8x128xf32>
    %922 = vector.broadcast %235 : f32 to vector<8x128xf32>
    %923 = arith.mulf %56, %922 : vector<8x128xf32>
    %924 = arith.addf %912, %923 : vector<8x128xf32>
    %925 = vector.broadcast %236 : f32 to vector<8x128xf32>
    %926 = arith.mulf %56, %925 : vector<8x128xf32>
    %927 = arith.addf %915, %926 : vector<8x128xf32>
    %928 = vector.broadcast %249 : f32 to vector<8x128xf32>
    %929 = arith.mulf %64, %928 : vector<8x128xf32>
    %930 = arith.addf %918, %929 : vector<8x128xf32>
    %931 = vector.broadcast %250 : f32 to vector<8x128xf32>
    %932 = arith.mulf %64, %931 : vector<8x128xf32>
    %933 = arith.addf %921, %932 : vector<8x128xf32>
    %934 = vector.broadcast %251 : f32 to vector<8x128xf32>
    %935 = arith.mulf %64, %934 : vector<8x128xf32>
    %936 = arith.addf %924, %935 : vector<8x128xf32>
    %937 = vector.broadcast %252 : f32 to vector<8x128xf32>
    %938 = arith.mulf %64, %937 : vector<8x128xf32>
    %939 = arith.addf %927, %938 : vector<8x128xf32>
    %940 = vector.broadcast %265 : f32 to vector<8x128xf32>
    %941 = arith.mulf %72, %940 : vector<8x128xf32>
    %942 = vector.broadcast %266 : f32 to vector<8x128xf32>
    %943 = arith.mulf %72, %942 : vector<8x128xf32>
    %944 = vector.broadcast %267 : f32 to vector<8x128xf32>
    %945 = arith.mulf %72, %944 : vector<8x128xf32>
    %946 = vector.broadcast %268 : f32 to vector<8x128xf32>
    %947 = arith.mulf %72, %946 : vector<8x128xf32>
    %948 = vector.broadcast %281 : f32 to vector<8x128xf32>
    %949 = arith.mulf %80, %948 : vector<8x128xf32>
    %950 = arith.addf %941, %949 : vector<8x128xf32>
    %951 = vector.broadcast %282 : f32 to vector<8x128xf32>
    %952 = arith.mulf %80, %951 : vector<8x128xf32>
    %953 = arith.addf %943, %952 : vector<8x128xf32>
    %954 = vector.broadcast %283 : f32 to vector<8x128xf32>
    %955 = arith.mulf %80, %954 : vector<8x128xf32>
    %956 = arith.addf %945, %955 : vector<8x128xf32>
    %957 = vector.broadcast %284 : f32 to vector<8x128xf32>
    %958 = arith.mulf %80, %957 : vector<8x128xf32>
    %959 = arith.addf %947, %958 : vector<8x128xf32>
    %960 = vector.broadcast %297 : f32 to vector<8x128xf32>
    %961 = arith.mulf %88, %960 : vector<8x128xf32>
    %962 = arith.addf %950, %961 : vector<8x128xf32>
    %963 = vector.broadcast %298 : f32 to vector<8x128xf32>
    %964 = arith.mulf %88, %963 : vector<8x128xf32>
    %965 = arith.addf %953, %964 : vector<8x128xf32>
    %966 = vector.broadcast %299 : f32 to vector<8x128xf32>
    %967 = arith.mulf %88, %966 : vector<8x128xf32>
    %968 = arith.addf %956, %967 : vector<8x128xf32>
    %969 = vector.broadcast %300 : f32 to vector<8x128xf32>
    %970 = arith.mulf %88, %969 : vector<8x128xf32>
    %971 = arith.addf %959, %970 : vector<8x128xf32>
    %972 = vector.broadcast %313 : f32 to vector<8x128xf32>
    %973 = arith.mulf %96, %972 : vector<8x128xf32>
    %974 = arith.addf %962, %973 : vector<8x128xf32>
    %975 = vector.broadcast %314 : f32 to vector<8x128xf32>
    %976 = arith.mulf %96, %975 : vector<8x128xf32>
    %977 = arith.addf %965, %976 : vector<8x128xf32>
    %978 = vector.broadcast %315 : f32 to vector<8x128xf32>
    %979 = arith.mulf %96, %978 : vector<8x128xf32>
    %980 = arith.addf %968, %979 : vector<8x128xf32>
    %981 = vector.broadcast %316 : f32 to vector<8x128xf32>
    %982 = arith.mulf %96, %981 : vector<8x128xf32>
    %983 = arith.addf %971, %982 : vector<8x128xf32>
    %984 = vector.broadcast %329 : f32 to vector<8x128xf32>
    %985 = arith.mulf %104, %984 : vector<8x128xf32>
    %986 = arith.addf %974, %985 : vector<8x128xf32>
    %987 = vector.broadcast %330 : f32 to vector<8x128xf32>
    %988 = arith.mulf %104, %987 : vector<8x128xf32>
    %989 = arith.addf %977, %988 : vector<8x128xf32>
    %990 = vector.broadcast %331 : f32 to vector<8x128xf32>
    %991 = arith.mulf %104, %990 : vector<8x128xf32>
    %992 = arith.addf %980, %991 : vector<8x128xf32>
    %993 = vector.broadcast %332 : f32 to vector<8x128xf32>
    %994 = arith.mulf %104, %993 : vector<8x128xf32>
    %995 = arith.addf %983, %994 : vector<8x128xf32>
    %996 = vector.broadcast %345 : f32 to vector<8x128xf32>
    %997 = arith.mulf %112, %996 : vector<8x128xf32>
    %998 = arith.addf %986, %997 : vector<8x128xf32>
    %999 = vector.broadcast %346 : f32 to vector<8x128xf32>
    %1000 = arith.mulf %112, %999 : vector<8x128xf32>
    %1001 = arith.addf %989, %1000 : vector<8x128xf32>
    %1002 = vector.broadcast %347 : f32 to vector<8x128xf32>
    %1003 = arith.mulf %112, %1002 : vector<8x128xf32>
    %1004 = arith.addf %992, %1003 : vector<8x128xf32>
    %1005 = vector.broadcast %348 : f32 to vector<8x128xf32>
    %1006 = arith.mulf %112, %1005 : vector<8x128xf32>
    %1007 = arith.addf %995, %1006 : vector<8x128xf32>
    %1008 = vector.broadcast %361 : f32 to vector<8x128xf32>
    %1009 = arith.mulf %120, %1008 : vector<8x128xf32>
    %1010 = arith.addf %998, %1009 : vector<8x128xf32>
    %1011 = vector.broadcast %362 : f32 to vector<8x128xf32>
    %1012 = arith.mulf %120, %1011 : vector<8x128xf32>
    %1013 = arith.addf %1001, %1012 : vector<8x128xf32>
    %1014 = vector.broadcast %363 : f32 to vector<8x128xf32>
    %1015 = arith.mulf %120, %1014 : vector<8x128xf32>
    %1016 = arith.addf %1004, %1015 : vector<8x128xf32>
    %1017 = vector.broadcast %364 : f32 to vector<8x128xf32>
    %1018 = arith.mulf %120, %1017 : vector<8x128xf32>
    %1019 = arith.addf %1007, %1018 : vector<8x128xf32>
    %1020 = vector.broadcast %377 : f32 to vector<8x128xf32>
    %1021 = arith.mulf %128, %1020 : vector<8x128xf32>
    %1022 = arith.addf %1010, %1021 : vector<8x128xf32>
    %1023 = vector.broadcast %378 : f32 to vector<8x128xf32>
    %1024 = arith.mulf %128, %1023 : vector<8x128xf32>
    %1025 = arith.addf %1013, %1024 : vector<8x128xf32>
    %1026 = vector.broadcast %379 : f32 to vector<8x128xf32>
    %1027 = arith.mulf %128, %1026 : vector<8x128xf32>
    %1028 = arith.addf %1016, %1027 : vector<8x128xf32>
    %1029 = vector.broadcast %380 : f32 to vector<8x128xf32>
    %1030 = arith.mulf %128, %1029 : vector<8x128xf32>
    %1031 = arith.addf %1019, %1030 : vector<8x128xf32>
    %1032 = arith.addf %930, %1022 : vector<8x128xf32>
    %1033 = vector.broadcast %393 : f32 to vector<8x128xf32>
    %1034 = arith.addf %1032, %1033 : vector<8x128xf32>
    %cst_585 = arith.constant 0.000000e+00 : f32
    %1035 = vector.broadcast %cst_585 : f32 to vector<8x128xf32>
    %1036 = arith.maximumf %1034, %1035 : vector<8x128xf32>
    %1037 = vector.broadcast %409 : f32 to vector<8x128xf32>
    %1038 = arith.mulf %1036, %1037 : vector<8x128xf32>
    %1039 = arith.addf %847, %1038 : vector<8x128xf32>
    %1040 = arith.addf %933, %1025 : vector<8x128xf32>
    %1041 = vector.broadcast %394 : f32 to vector<8x128xf32>
    %1042 = arith.addf %1040, %1041 : vector<8x128xf32>
    %cst_586 = arith.constant 0.000000e+00 : f32
    %1043 = vector.broadcast %cst_586 : f32 to vector<8x128xf32>
    %1044 = arith.maximumf %1042, %1043 : vector<8x128xf32>
    %1045 = vector.broadcast %410 : f32 to vector<8x128xf32>
    %1046 = arith.mulf %1044, %1045 : vector<8x128xf32>
    %1047 = arith.addf %1039, %1046 : vector<8x128xf32>
    %1048 = arith.addf %936, %1028 : vector<8x128xf32>
    %1049 = vector.broadcast %395 : f32 to vector<8x128xf32>
    %1050 = arith.addf %1048, %1049 : vector<8x128xf32>
    %cst_587 = arith.constant 0.000000e+00 : f32
    %1051 = vector.broadcast %cst_587 : f32 to vector<8x128xf32>
    %1052 = arith.maximumf %1050, %1051 : vector<8x128xf32>
    %1053 = vector.broadcast %411 : f32 to vector<8x128xf32>
    %1054 = arith.mulf %1052, %1053 : vector<8x128xf32>
    %1055 = arith.addf %1047, %1054 : vector<8x128xf32>
    %1056 = arith.addf %939, %1031 : vector<8x128xf32>
    %1057 = vector.broadcast %396 : f32 to vector<8x128xf32>
    %1058 = arith.addf %1056, %1057 : vector<8x128xf32>
    %cst_588 = arith.constant 0.000000e+00 : f32
    %1059 = vector.broadcast %cst_588 : f32 to vector<8x128xf32>
    %1060 = arith.maximumf %1058, %1059 : vector<8x128xf32>
    %1061 = vector.broadcast %412 : f32 to vector<8x128xf32>
    %1062 = arith.mulf %1060, %1061 : vector<8x128xf32>
    %1063 = arith.addf %1055, %1062 : vector<8x128xf32>
    %1064 = vector.broadcast %141 : f32 to vector<8x128xf32>
    %1065 = arith.mulf %8, %1064 : vector<8x128xf32>
    %1066 = vector.broadcast %142 : f32 to vector<8x128xf32>
    %1067 = arith.mulf %8, %1066 : vector<8x128xf32>
    %1068 = vector.broadcast %143 : f32 to vector<8x128xf32>
    %1069 = arith.mulf %8, %1068 : vector<8x128xf32>
    %1070 = vector.broadcast %144 : f32 to vector<8x128xf32>
    %1071 = arith.mulf %8, %1070 : vector<8x128xf32>
    %1072 = vector.broadcast %157 : f32 to vector<8x128xf32>
    %1073 = arith.mulf %16, %1072 : vector<8x128xf32>
    %1074 = arith.addf %1065, %1073 : vector<8x128xf32>
    %1075 = vector.broadcast %158 : f32 to vector<8x128xf32>
    %1076 = arith.mulf %16, %1075 : vector<8x128xf32>
    %1077 = arith.addf %1067, %1076 : vector<8x128xf32>
    %1078 = vector.broadcast %159 : f32 to vector<8x128xf32>
    %1079 = arith.mulf %16, %1078 : vector<8x128xf32>
    %1080 = arith.addf %1069, %1079 : vector<8x128xf32>
    %1081 = vector.broadcast %160 : f32 to vector<8x128xf32>
    %1082 = arith.mulf %16, %1081 : vector<8x128xf32>
    %1083 = arith.addf %1071, %1082 : vector<8x128xf32>
    %1084 = vector.broadcast %173 : f32 to vector<8x128xf32>
    %1085 = arith.mulf %24, %1084 : vector<8x128xf32>
    %1086 = arith.addf %1074, %1085 : vector<8x128xf32>
    %1087 = vector.broadcast %174 : f32 to vector<8x128xf32>
    %1088 = arith.mulf %24, %1087 : vector<8x128xf32>
    %1089 = arith.addf %1077, %1088 : vector<8x128xf32>
    %1090 = vector.broadcast %175 : f32 to vector<8x128xf32>
    %1091 = arith.mulf %24, %1090 : vector<8x128xf32>
    %1092 = arith.addf %1080, %1091 : vector<8x128xf32>
    %1093 = vector.broadcast %176 : f32 to vector<8x128xf32>
    %1094 = arith.mulf %24, %1093 : vector<8x128xf32>
    %1095 = arith.addf %1083, %1094 : vector<8x128xf32>
    %1096 = vector.broadcast %189 : f32 to vector<8x128xf32>
    %1097 = arith.mulf %32, %1096 : vector<8x128xf32>
    %1098 = arith.addf %1086, %1097 : vector<8x128xf32>
    %1099 = vector.broadcast %190 : f32 to vector<8x128xf32>
    %1100 = arith.mulf %32, %1099 : vector<8x128xf32>
    %1101 = arith.addf %1089, %1100 : vector<8x128xf32>
    %1102 = vector.broadcast %191 : f32 to vector<8x128xf32>
    %1103 = arith.mulf %32, %1102 : vector<8x128xf32>
    %1104 = arith.addf %1092, %1103 : vector<8x128xf32>
    %1105 = vector.broadcast %192 : f32 to vector<8x128xf32>
    %1106 = arith.mulf %32, %1105 : vector<8x128xf32>
    %1107 = arith.addf %1095, %1106 : vector<8x128xf32>
    %1108 = vector.broadcast %205 : f32 to vector<8x128xf32>
    %1109 = arith.mulf %40, %1108 : vector<8x128xf32>
    %1110 = arith.addf %1098, %1109 : vector<8x128xf32>
    %1111 = vector.broadcast %206 : f32 to vector<8x128xf32>
    %1112 = arith.mulf %40, %1111 : vector<8x128xf32>
    %1113 = arith.addf %1101, %1112 : vector<8x128xf32>
    %1114 = vector.broadcast %207 : f32 to vector<8x128xf32>
    %1115 = arith.mulf %40, %1114 : vector<8x128xf32>
    %1116 = arith.addf %1104, %1115 : vector<8x128xf32>
    %1117 = vector.broadcast %208 : f32 to vector<8x128xf32>
    %1118 = arith.mulf %40, %1117 : vector<8x128xf32>
    %1119 = arith.addf %1107, %1118 : vector<8x128xf32>
    %1120 = vector.broadcast %221 : f32 to vector<8x128xf32>
    %1121 = arith.mulf %48, %1120 : vector<8x128xf32>
    %1122 = arith.addf %1110, %1121 : vector<8x128xf32>
    %1123 = vector.broadcast %222 : f32 to vector<8x128xf32>
    %1124 = arith.mulf %48, %1123 : vector<8x128xf32>
    %1125 = arith.addf %1113, %1124 : vector<8x128xf32>
    %1126 = vector.broadcast %223 : f32 to vector<8x128xf32>
    %1127 = arith.mulf %48, %1126 : vector<8x128xf32>
    %1128 = arith.addf %1116, %1127 : vector<8x128xf32>
    %1129 = vector.broadcast %224 : f32 to vector<8x128xf32>
    %1130 = arith.mulf %48, %1129 : vector<8x128xf32>
    %1131 = arith.addf %1119, %1130 : vector<8x128xf32>
    %1132 = vector.broadcast %237 : f32 to vector<8x128xf32>
    %1133 = arith.mulf %56, %1132 : vector<8x128xf32>
    %1134 = arith.addf %1122, %1133 : vector<8x128xf32>
    %1135 = vector.broadcast %238 : f32 to vector<8x128xf32>
    %1136 = arith.mulf %56, %1135 : vector<8x128xf32>
    %1137 = arith.addf %1125, %1136 : vector<8x128xf32>
    %1138 = vector.broadcast %239 : f32 to vector<8x128xf32>
    %1139 = arith.mulf %56, %1138 : vector<8x128xf32>
    %1140 = arith.addf %1128, %1139 : vector<8x128xf32>
    %1141 = vector.broadcast %240 : f32 to vector<8x128xf32>
    %1142 = arith.mulf %56, %1141 : vector<8x128xf32>
    %1143 = arith.addf %1131, %1142 : vector<8x128xf32>
    %1144 = vector.broadcast %253 : f32 to vector<8x128xf32>
    %1145 = arith.mulf %64, %1144 : vector<8x128xf32>
    %1146 = arith.addf %1134, %1145 : vector<8x128xf32>
    %1147 = vector.broadcast %254 : f32 to vector<8x128xf32>
    %1148 = arith.mulf %64, %1147 : vector<8x128xf32>
    %1149 = arith.addf %1137, %1148 : vector<8x128xf32>
    %1150 = vector.broadcast %255 : f32 to vector<8x128xf32>
    %1151 = arith.mulf %64, %1150 : vector<8x128xf32>
    %1152 = arith.addf %1140, %1151 : vector<8x128xf32>
    %1153 = vector.broadcast %256 : f32 to vector<8x128xf32>
    %1154 = arith.mulf %64, %1153 : vector<8x128xf32>
    %1155 = arith.addf %1143, %1154 : vector<8x128xf32>
    %1156 = vector.broadcast %269 : f32 to vector<8x128xf32>
    %1157 = arith.mulf %72, %1156 : vector<8x128xf32>
    %1158 = vector.broadcast %270 : f32 to vector<8x128xf32>
    %1159 = arith.mulf %72, %1158 : vector<8x128xf32>
    %1160 = vector.broadcast %271 : f32 to vector<8x128xf32>
    %1161 = arith.mulf %72, %1160 : vector<8x128xf32>
    %1162 = vector.broadcast %272 : f32 to vector<8x128xf32>
    %1163 = arith.mulf %72, %1162 : vector<8x128xf32>
    %1164 = vector.broadcast %285 : f32 to vector<8x128xf32>
    %1165 = arith.mulf %80, %1164 : vector<8x128xf32>
    %1166 = arith.addf %1157, %1165 : vector<8x128xf32>
    %1167 = vector.broadcast %286 : f32 to vector<8x128xf32>
    %1168 = arith.mulf %80, %1167 : vector<8x128xf32>
    %1169 = arith.addf %1159, %1168 : vector<8x128xf32>
    %1170 = vector.broadcast %287 : f32 to vector<8x128xf32>
    %1171 = arith.mulf %80, %1170 : vector<8x128xf32>
    %1172 = arith.addf %1161, %1171 : vector<8x128xf32>
    %1173 = vector.broadcast %288 : f32 to vector<8x128xf32>
    %1174 = arith.mulf %80, %1173 : vector<8x128xf32>
    %1175 = arith.addf %1163, %1174 : vector<8x128xf32>
    %1176 = vector.broadcast %301 : f32 to vector<8x128xf32>
    %1177 = arith.mulf %88, %1176 : vector<8x128xf32>
    %1178 = arith.addf %1166, %1177 : vector<8x128xf32>
    %1179 = vector.broadcast %302 : f32 to vector<8x128xf32>
    %1180 = arith.mulf %88, %1179 : vector<8x128xf32>
    %1181 = arith.addf %1169, %1180 : vector<8x128xf32>
    %1182 = vector.broadcast %303 : f32 to vector<8x128xf32>
    %1183 = arith.mulf %88, %1182 : vector<8x128xf32>
    %1184 = arith.addf %1172, %1183 : vector<8x128xf32>
    %1185 = vector.broadcast %304 : f32 to vector<8x128xf32>
    %1186 = arith.mulf %88, %1185 : vector<8x128xf32>
    %1187 = arith.addf %1175, %1186 : vector<8x128xf32>
    %1188 = vector.broadcast %317 : f32 to vector<8x128xf32>
    %1189 = arith.mulf %96, %1188 : vector<8x128xf32>
    %1190 = arith.addf %1178, %1189 : vector<8x128xf32>
    %1191 = vector.broadcast %318 : f32 to vector<8x128xf32>
    %1192 = arith.mulf %96, %1191 : vector<8x128xf32>
    %1193 = arith.addf %1181, %1192 : vector<8x128xf32>
    %1194 = vector.broadcast %319 : f32 to vector<8x128xf32>
    %1195 = arith.mulf %96, %1194 : vector<8x128xf32>
    %1196 = arith.addf %1184, %1195 : vector<8x128xf32>
    %1197 = vector.broadcast %320 : f32 to vector<8x128xf32>
    %1198 = arith.mulf %96, %1197 : vector<8x128xf32>
    %1199 = arith.addf %1187, %1198 : vector<8x128xf32>
    %1200 = vector.broadcast %333 : f32 to vector<8x128xf32>
    %1201 = arith.mulf %104, %1200 : vector<8x128xf32>
    %1202 = arith.addf %1190, %1201 : vector<8x128xf32>
    %1203 = vector.broadcast %334 : f32 to vector<8x128xf32>
    %1204 = arith.mulf %104, %1203 : vector<8x128xf32>
    %1205 = arith.addf %1193, %1204 : vector<8x128xf32>
    %1206 = vector.broadcast %335 : f32 to vector<8x128xf32>
    %1207 = arith.mulf %104, %1206 : vector<8x128xf32>
    %1208 = arith.addf %1196, %1207 : vector<8x128xf32>
    %1209 = vector.broadcast %336 : f32 to vector<8x128xf32>
    %1210 = arith.mulf %104, %1209 : vector<8x128xf32>
    %1211 = arith.addf %1199, %1210 : vector<8x128xf32>
    %1212 = vector.broadcast %349 : f32 to vector<8x128xf32>
    %1213 = arith.mulf %112, %1212 : vector<8x128xf32>
    %1214 = arith.addf %1202, %1213 : vector<8x128xf32>
    %1215 = vector.broadcast %350 : f32 to vector<8x128xf32>
    %1216 = arith.mulf %112, %1215 : vector<8x128xf32>
    %1217 = arith.addf %1205, %1216 : vector<8x128xf32>
    %1218 = vector.broadcast %351 : f32 to vector<8x128xf32>
    %1219 = arith.mulf %112, %1218 : vector<8x128xf32>
    %1220 = arith.addf %1208, %1219 : vector<8x128xf32>
    %1221 = vector.broadcast %352 : f32 to vector<8x128xf32>
    %1222 = arith.mulf %112, %1221 : vector<8x128xf32>
    %1223 = arith.addf %1211, %1222 : vector<8x128xf32>
    %1224 = vector.broadcast %365 : f32 to vector<8x128xf32>
    %1225 = arith.mulf %120, %1224 : vector<8x128xf32>
    %1226 = arith.addf %1214, %1225 : vector<8x128xf32>
    %1227 = vector.broadcast %366 : f32 to vector<8x128xf32>
    %1228 = arith.mulf %120, %1227 : vector<8x128xf32>
    %1229 = arith.addf %1217, %1228 : vector<8x128xf32>
    %1230 = vector.broadcast %367 : f32 to vector<8x128xf32>
    %1231 = arith.mulf %120, %1230 : vector<8x128xf32>
    %1232 = arith.addf %1220, %1231 : vector<8x128xf32>
    %1233 = vector.broadcast %368 : f32 to vector<8x128xf32>
    %1234 = arith.mulf %120, %1233 : vector<8x128xf32>
    %1235 = arith.addf %1223, %1234 : vector<8x128xf32>
    %1236 = vector.broadcast %381 : f32 to vector<8x128xf32>
    %1237 = arith.mulf %128, %1236 : vector<8x128xf32>
    %1238 = arith.addf %1226, %1237 : vector<8x128xf32>
    %1239 = vector.broadcast %382 : f32 to vector<8x128xf32>
    %1240 = arith.mulf %128, %1239 : vector<8x128xf32>
    %1241 = arith.addf %1229, %1240 : vector<8x128xf32>
    %1242 = vector.broadcast %383 : f32 to vector<8x128xf32>
    %1243 = arith.mulf %128, %1242 : vector<8x128xf32>
    %1244 = arith.addf %1232, %1243 : vector<8x128xf32>
    %1245 = vector.broadcast %384 : f32 to vector<8x128xf32>
    %1246 = arith.mulf %128, %1245 : vector<8x128xf32>
    %1247 = arith.addf %1235, %1246 : vector<8x128xf32>
    %1248 = arith.addf %1146, %1238 : vector<8x128xf32>
    %1249 = vector.broadcast %397 : f32 to vector<8x128xf32>
    %1250 = arith.addf %1248, %1249 : vector<8x128xf32>
    %cst_589 = arith.constant 0.000000e+00 : f32
    %1251 = vector.broadcast %cst_589 : f32 to vector<8x128xf32>
    %1252 = arith.maximumf %1250, %1251 : vector<8x128xf32>
    %1253 = vector.broadcast %413 : f32 to vector<8x128xf32>
    %1254 = arith.mulf %1252, %1253 : vector<8x128xf32>
    %1255 = arith.addf %1063, %1254 : vector<8x128xf32>
    %1256 = arith.addf %1149, %1241 : vector<8x128xf32>
    %1257 = vector.broadcast %398 : f32 to vector<8x128xf32>
    %1258 = arith.addf %1256, %1257 : vector<8x128xf32>
    %cst_590 = arith.constant 0.000000e+00 : f32
    %1259 = vector.broadcast %cst_590 : f32 to vector<8x128xf32>
    %1260 = arith.maximumf %1258, %1259 : vector<8x128xf32>
    %1261 = vector.broadcast %414 : f32 to vector<8x128xf32>
    %1262 = arith.mulf %1260, %1261 : vector<8x128xf32>
    %1263 = arith.addf %1255, %1262 : vector<8x128xf32>
    %1264 = arith.addf %1152, %1244 : vector<8x128xf32>
    %1265 = vector.broadcast %399 : f32 to vector<8x128xf32>
    %1266 = arith.addf %1264, %1265 : vector<8x128xf32>
    %cst_591 = arith.constant 0.000000e+00 : f32
    %1267 = vector.broadcast %cst_591 : f32 to vector<8x128xf32>
    %1268 = arith.maximumf %1266, %1267 : vector<8x128xf32>
    %1269 = vector.broadcast %415 : f32 to vector<8x128xf32>
    %1270 = arith.mulf %1268, %1269 : vector<8x128xf32>
    %1271 = arith.addf %1263, %1270 : vector<8x128xf32>
    %1272 = arith.addf %1155, %1247 : vector<8x128xf32>
    %1273 = vector.broadcast %400 : f32 to vector<8x128xf32>
    %1274 = arith.addf %1272, %1273 : vector<8x128xf32>
    %cst_592 = arith.constant 0.000000e+00 : f32
    %1275 = vector.broadcast %cst_592 : f32 to vector<8x128xf32>
    %1276 = arith.maximumf %1274, %1275 : vector<8x128xf32>
    %1277 = vector.broadcast %416 : f32 to vector<8x128xf32>
    %1278 = arith.mulf %1276, %1277 : vector<8x128xf32>
    %1279 = arith.addf %1271, %1278 : vector<8x128xf32>
    %c0_593 = arith.constant 0 : index
    %1280 = memref.load %arg7[%c0_593] : memref<1xf32, #tpu.memory_space<smem>>
    %1281 = vector.broadcast %1280 : f32 to vector<8x128xf32>
    %1282 = arith.addf %1279, %1281 : vector<8x128xf32>
    %c0_594 = arith.constant 0 : index
    %c0_595 = arith.constant 0 : index
    %1283 = vector.load %arg8[%c0_594, %c0_595] : memref<8x128xf32, #tpu.memory_space<vmem>>, vector<8x128xf32>
    tpu.vector_store %arg8[%c0_594, %c0_595], %1282 {strides = array<i32>} : memref<8x128xf32, #tpu.memory_space<vmem>>, vector<8x128xf32>,
    return
  }
  func.func @transform_0(%arg0: i32) -> (i32, i32) {
    %c0_i32 = arith.constant 0 : i32
    %c0_i32_0 = arith.constant 0 : i32
    return %arg0, %c0_i32 : i32, i32
  }
  func.func @transform_1(%arg0: i32) -> i32 {
    %c0_i32 = arith.constant 0 : i32
    %c0_i32_0 = arith.constant 0 : i32
    return %c0_i32 : i32
  }
  func.func @transform_2(%arg0: i32) -> i32 {
    %c0_i32 = arith.constant 0 : i32
    %c0_i32_0 = arith.constant 0 : i32
    return %c0_i32 : i32
  }
  func.func @transform_3(%arg0: i32) -> (i32, i32) {
    %c0_i32 = arith.constant 0 : i32
    %c0_i32_0 = arith.constant 0 : i32
    %c0_i32_1 = arith.constant 0 : i32
    return %c0_i32, %c0_i32_0 : i32, i32
  }
  func.func @transform_4(%arg0: i32) -> i32 {
    %c0_i32 = arith.constant 0 : i32
    %c0_i32_0 = arith.constant 0 : i32
    return %c0_i32 : i32
  }
  func.func @transform_5(%arg0: i32) -> i32 {
    %c0_i32 = arith.constant 0 : i32
    %c0_i32_0 = arith.constant 0 : i32
    return %c0_i32 : i32
  }
  func.func @transform_6(%arg0: i32) -> i32 {
    %c0_i32 = arith.constant 0 : i32
    %c0_i32_0 = arith.constant 0 : i32
    return %c0_i32 : i32
  }
  func.func @transform_7(%arg0: i32) -> (i32, i32) {
    %c0_i32 = arith.constant 0 : i32
    %c0_i32_0 = arith.constant 0 : i32
    return %arg0, %c0_i32 : i32, i32
  }
}

</mosaic_0001>

<bundles_post_ra>
// kernel: tpu_custom_call.1
= control target key start
LH: loop header
LB: loop body
LE: loop exit
PB: predicated region body
PF: predicated region fallthrough
CT: control target
= control target key end

     0   :  { %13 = vsyncpa [#allocation4], 0  ;;  %s3301_s0 = inlined_call_operand.hbm [shape: f32[8,128], index: 0, kind: input, shape index: {}]   ;;  %s3302_s1 = inlined_call_operand.vmem [shape: f32[16], index: 1, kind: input, shape index: {}]   ;;  %s3303_s2 = inlined_call_operand.vmem [shape: f32[16], index: 2, kind: input, shape index: {}]   ;;  %s3304_s3 = inlined_call_operand.hbm [shape: f32[16,16], index: 3, kind: input, shape index: {}]   ;;  %s3305_s4 = inlined_call_operand.vmem [shape: f32[16], index: 4, kind: input, shape index: {}]   ;;  %s3306_s5 = inlined_call_operand.vmem [shape: f32[16], index: 5, kind: input, shape index: {}]   ;;  %s3307_s6 = inlined_call_operand.<no memory space> [shape: f32[1], index: 6, kind: input, shape index: {}]   ;;  %s3308_s7 = inlined_call_operand.hbm [shape: f32[8,128], index: 7, kind: output, shape index: {}]  }
   0x1   :  { %14 = vsyncpa [#allocation7], 0 }
   0x2   :  { %15 = vsyncpa [#allocation10], 0 }
   0x3   :  { %16 = vsyncpa [#allocation6], 0 }
   0x4   :  { %17 = vsyncpa [#allocation14], 0  ;;  %s45_s26 = sshll.u32 %s3303_s2, 4  ;;  %s46_s26 = int_to_ptr.vmem [resolvable:$true] %s45_s26 }
   0x5   :  { %18 = vsyncpa [#allocation5], 0  ;;  %s1695_s27 = scalar_lea.vmem %s46_s26, 16  ;;  %p1700_p1 = scmp.lt.s32.totalorder %s46_s26, %s46_s26 }
   0x6   :  { %p1696_p0 = scmp.ne.s32.totalorder %s46_s26, %s1695_s27  ;;  %p1701_p2 = scmp.lt.s32.totalorder %s1695_s27, %s1695_s27 }
   0x8   :  { %p1702_p3 = por %p1701_p2, %p1700_p1 }
   0xa   :  { %p1703_p4 = pnand %p1702_p3, %p1696_p0 }
   0xc   :  { %1706 = shalt.err (!%p1703_p4)
}
   0xd   :  { %s1811_s28 = smov [#allocation9]   ;;  %s1812_s29 = smov [#allocation3]  }
   0xe   :  { %48 = dma.vmem_to_smem %s46_s26, 16, %s1811_s28, [#allocation10]  }
   0xf   :  { %s25_s30 = sshll.u32 %s1812_s29, 4  ;;  %s35_s10 = sshll.u32 %s3302_s1, 4  ;;  %s26_s30 = int_to_ptr.vmem [resolvable:$true] %s25_s30  ;;  %s36_s10 = int_to_ptr.vmem [resolvable:$true] %s35_s10 }
  0x10   :  { %s1707_s12 = scalar_lea.hbm %s3301_s0, 128 }
  0x11   :  { %p1708_p5 = scmp.ne.s32.totalorder %s3301_s0, %s1707_s12  ;;  %p1711_p6 = scmp.lt.u32.totalorder %s1707_s12, %s3301_s0 }
  0x13   :  { %p1713_p7 = pnand %p1711_p6, %p1708_p5 }
  0x15   :  { %1716 = shalt.err (!%p1713_p7)
}
  0x16   :  { %s1717_s17 = scalar_lea.vmem %s26_s30, 128  ;;  %p1722_p9 = scmp.lt.s32.totalorder %s26_s30, %s26_s30 }
  0x17   :  { %p1718_p8 = scmp.ne.s32.totalorder %s26_s30, %s1717_s17  ;;  %p1723_p10 = scmp.lt.s32.totalorder %s1717_s17, %s1717_s17 }
  0x19   :  { %p1724_p11 = por %p1723_p10, %p1722_p9 }
  0x1b   :  { %p1725_p12 = pnand %p1724_p11, %p1718_p8 }
  0x1d   :  { %1728 = shalt.err (!%p1725_p12)
}
  0x1e   :  { %28 = dma.hbm_to_vmem [thread:$0]  %s3301_s0, 128, %s26_s30, [#allocation4]  }
  0x1f   :  { %s1729_s19 = scalar_lea.vmem %s36_s10, 16  ;;  %p1734_p0 = scmp.lt.s32.totalorder %s36_s10, %s36_s10 }
  0x20   :  { %p1730_p13 = scmp.ne.s32.totalorder %s36_s10, %s1729_s19  ;;  %p1735_p1 = scmp.lt.s32.totalorder %s1729_s19, %s1729_s19 }
  0x22   :  { %p1736_p2 = por %p1735_p1, %p1734_p0 }
  0x24   :  { %p1737_p3 = pnand %p1736_p2, %p1730_p13 }
  0x26   :  { %1740 = shalt.err (!%p1737_p3)
}
  0x27   :  { %s1813_s20 = smov [#allocation8]   ;;  %s1741_s23 = scalar_lea.hbm %s3304_s3, 256 }
  0x28   :  { %38 = dma.vmem_to_smem %s36_s10, 16, %s1813_s20, [#allocation7]  }
  0x29   :  { %p1742_p4 = scmp.ne.s32.totalorder %s3304_s3, %s1741_s23  ;;  %p1745_p5 = scmp.lt.u32.totalorder %s1741_s23, %s3304_s3 }
  0x2b   :  { %p1747_p6 = pnand %p1745_p5, %p1742_p4 }
  0x2d   :  { %1750 = shalt.err (!%p1747_p6)
}
  0x2e   :  { %s1814_s0 = smov [#allocation11]   ;;  %s1815_s28 = smov 128  }
  0x2f   :  { %s1816_s29 = smov 8   ;;  %s65_s2 = sshll.u32 %s3305_s4, 4  ;;  %s66_s2 = int_to_ptr.vmem [resolvable:$true] %s65_s2 }
  0x30   :  { %58 = dma.hbm_to_smem %s3304_s3, 256, %s1814_s0, [#allocation6], %s1815_s28, %s1815_s28, %s1816_s29  }
  0x31   :  { %s75_s13 = sshll.u32 %s3306_s5, 4  ;;  %s1751_s14 = scalar_lea.vmem %s66_s2, 16  ;;  %s76_s13 = int_to_ptr.vmem [resolvable:$true] %s75_s13 }
  0x32   :  { %p1752_p7 = scmp.ne.s32.totalorder %s66_s2, %s1751_s14  ;;  %p1756_p8 = scmp.lt.s32.totalorder %s66_s2, %s66_s2 }
  0x33   :  { %p1757_p9 = scmp.lt.s32.totalorder %s1751_s14, %s1751_s14 }
  0x35   :  { %p1758_p10 = por %p1757_p9, %p1756_p8 }
  0x37   :  { %p1759_p11 = pnand %p1758_p10, %p1752_p7 }
  0x39   :  { %1762 = shalt.err (!%p1759_p11)
}
  0x3a   :  { %s1817_s15 = smov [#allocation12]   ;;  %s1763_s3 = scalar_lea.vmem %s76_s13, 16 }
  0x3b   :  { %68 = dma.vmem_to_smem %s66_s2, 16, %s1817_s15, [#allocation10]  }
  0x3c   :  { %p1764_p12 = scmp.ne.s32.totalorder %s76_s13, %s1763_s3  ;;  %p1768_p13 = scmp.lt.s32.totalorder %s76_s13, %s76_s13 }
  0x3d   :  { %p1769_p0 = scmp.lt.s32.totalorder %s1763_s3, %s1763_s3 }
  0x3f   :  { %p1770_p1 = por %p1769_p0, %p1768_p13 }
  0x41   :  { %p1771_p2 = pnand %p1770_p1, %p1764_p12 }
  0x43   :  { %1774 = shalt.err (!%p1771_p2)
}
  0x44   :  { %s1818_s4 = smov [#allocation13]  }
  0x45   :  { %78 = dma.vmem_to_smem %s76_s13, 16, %s1818_s4, [#allocation14]  }
  0x46   :  { %1797 = dma.done.wait [#allocation4], 128  }
  0x47   :  { %1798 = vsyncadd [#allocation4], 4294967168 }
  0x48   :  { %1799 = dma.done.wait [#allocation7], 16  }
  0x49   :  { %1800 = vsyncadd [#allocation7], 4294967280 }
  0x4a   :  { %1801 = dma.done.wait [#allocation10], 16  }
  0x4b   :  { %1802 = vsyncadd [#allocation10], 4294967280 }
  0x4c   :  { %1803 = dma.done.wait [#allocation6], 256  }
  0x4d   :  { %1804 = vsyncadd [#allocation6], 4294967040 }
  0x4e   :  { %1805 = dma.done.wait [#allocation10], 16  }
  0x4f   :  { %1806 = vsyncadd [#allocation10], 4294967280 }
  0x50   :  { %1807 = dma.done.wait [#allocation14], 16  }
  0x51   :  { %1808 = vsyncadd [#allocation14], 4294967280 }
  0x52   :  { %99 = sfence }
  0x53   :  { %s101_s5 = sld [smem:[#allocation8]]  ;;  %s1371_s17 = sld [smem:[#allocation8 + $0x1]]  ;;  %v1900_v0 = vld [vmem:[#allocation3] sm:$0xff] }
  0x54   :  { %s104_s16 = sld [smem:[#allocation9]]  ;;  %s1372_s1 = sld [smem:[#allocation9 + $0x1]] }
  0x55   :  { %s1373_s18 = sld [smem:[#allocation8 + $0x2]]  ;;  %s1375_s20 = sld [smem:[#allocation8 + $0x3]] }
  0x56   :  { %s1896_s19 = sld [smem:[#allocation9 + $0x2]]  ;;  %s1898_s21 = sld [smem:[#allocation9 + $0x3]] }
  0x57   :  { %s1902_s22 = sld [smem:[#allocation8 + $0x4]]  ;;  %s1906_s24 = sld [smem:[#allocation8 + $0x5]] }
  0x58   :  { %s1904_s23 = sld [smem:[#allocation9 + $0x4]]  ;;  %s1908_s25 = sld [smem:[#allocation9 + $0x5]] }
  0x59   :  { %v102_v1 = vstv %s101_s5  ;;  %s1910_s26 = sld [smem:[#allocation8 + $0x6]]  ;;  %v109_v4 = vstv %s1371_s17  ;;  %s1915_s0 = sld [smem:[#allocation8 + $0x7]] }
  0x5a   :  { %v105_v2 = vstv %s104_s16  ;;  %s1912_s27 = sld [smem:[#allocation9 + $0x6]]  ;;  %v103_v3 = vmul.f32 %v102_v1, %v1900_v0  ;;  %v112_v5 = vstv %s1372_s1  ;;  %s1917_s28 = sld [smem:[#allocation9 + $0x7]]  ;;  %v110_v6 = vmul.f32 %v109_v4, %v1900_v0 }
  0x5b   :  { %v116_v7 = vstv %s1373_s18  ;;  %s1921_s29 = sld [smem:[#allocation8 + $0x8]]  ;;  %v123_v11 = vstv %s1375_s20  ;;  %s1927_s8 = sld [smem:[#allocation8 + $0x9]] }
  0x5c   :  { %v119_v8 = vstv %s1896_s19  ;;  %s1923_s30 = sld [smem:[#allocation9 + $0x8]]  ;;  %v106_v9 = vadd.f32 %v105_v2, %v103_v3  ;;  %v117_v10 = vmul.f32 %v116_v7, %v1900_v0  ;;  %v126_v12 = vstv %s1898_s21  ;;  %s1929_s9 = sld [smem:[#allocation9 + $0x9]] }
  0x5d   :  { %v113_v13 = vadd.f32 %v112_v5, %v110_v6  ;;  %v124_v14 = vmul.f32 %v123_v11, %v1900_v0  ;;  %v130_v15 = vstv %s1902_s22  ;;  %s1934_s10 = sld [smem:[#allocation8 + $0xa]]  ;;  %v137_v19 = vstv %s1906_s24  ;;  %s1940_s11 = sld [smem:[#allocation8 + $0xb]] }
  0x5e   :  { %v133_v16 = vstv %s1904_s23  ;;  %s1936_s2 = sld [smem:[#allocation9 + $0xa]]  ;;  %v120_v17 = vadd.f32 %v119_v8, %v117_v10  ;;  %v131_v18 = vmul.f32 %v130_v15, %v1900_v0  ;;  %s1942_s12 = sld [smem:[#allocation9 + $0xb]]  ;;  %v1944_v20 = vmax.f32 %v106_v9, 0.0 }
  0x5f   :  { %v127_v21 = vadd.f32 %v126_v12, %v124_v14  ;;  %v138_v22 = vmul.f32 %v137_v19, %v1900_v0  ;;  %v140_v23 = vstv %s1908_s25  ;;  %s1948_s13 = sld [smem:[#allocation8 + $0xc]]  ;;  %v1950_v24 = vmax.f32 %v113_v13, 0.0  ;;  %s1956_s15 = sld [smem:[#allocation8 + $0xd]] }
  0x60   :  { %v134_v25 = vadd.f32 %v133_v16, %v131_v18  ;;  %v144_v26 = vstv %s1910_s26  ;;  %v147_v27 = vstv %s1912_s27  ;;  %s1954_s14 = sld [smem:[#allocation9 + $0xc]]  ;;  %v1958_v28 = vmax.f32 %v120_v17, 0.0  ;;  %s1962_s3 = sld [smem:[#allocation9 + $0xd]] }
  0x61   :  { %v141_v29 = vadd.f32 %v140_v23, %v138_v22  ;;  %v145_v30 = vmul.f32 %v144_v26, %v1900_v0  ;;  %v151_v31 = vstv %s1915_s0  ;;  %s1964_s4 = sld [smem:[#allocation8 + $0xe]]  ;;  %v1966_v32 = vmax.f32 %v127_v21, 0.0  ;;  %s1973_s16 = sld [smem:[#allocation8 + $0xf]] }
  0x62   :  { %v152_v33 = vmul.f32 %v151_v31, %v1900_v0  ;;  %v154_v34 = vstv %s1917_s28  ;;  %v158_v35 = vstv %s1921_s29  ;;  %s1971_s5 = sld [smem:[#allocation9 + $0xe]]  ;;  %v1975_v36 = vmax.f32 %v134_v25, 0.0  ;;  %s1979_s17 = sld [smem:[#allocation9 + $0xf]] }
  0x63   :  { %v148_v37 = vadd.f32 %v147_v27, %v145_v30  ;;  %v159_v38 = vmul.f32 %v158_v35, %v1900_v0  ;;  %v161_v39 = vstv %s1923_s30  ;;  %v165_v41 = vstv %s1927_s8  ;;  %s1984_s1 = sld [smem:[#allocation11]]  ;;  %s1986_s18 = sld [smem:[#allocation11 + $0x1]] }
  0x64   :  { %v155_v40 = vadd.f32 %v154_v34, %v152_v33  ;;  %v168_v42 = vstv %s1929_s9  ;;  %v172_v43 = vstv %s1934_s10  ;;  %v1988_v44 = vmax.f32 %v141_v29, 0.0  ;;  %s1997_s19 = sld [smem:[#allocation11 + $0x2]]  ;;  %s1999_s20 = sld [smem:[#allocation11 + $0x3]] }
  0x65   :  { %v162_v45 = vadd.f32 %v161_v39, %v159_v38  ;;  %v166_v46 = vmul.f32 %v165_v41, %v1900_v0  ;;  %v173_v47 = vmul.f32 %v172_v43, %v1900_v0  ;;  %v1992_v48 = vmax.f32 %v148_v37, 0.0  ;;  %s2004_s21 = sld [smem:[#allocation11 + $0x4]]  ;;  %s2011_s22 = sld [smem:[#allocation11 + $0x5]] }
  0x66   :  { %v175_v49 = vstv %s1936_s2  ;;  %v179_v50 = vstv %s1940_s11  ;;  %v182_v51 = vstv %s1942_s12  ;;  %v2001_v52 = vmax.f32 %v155_v40, 0.0  ;;  %s2013_s23 = sld [smem:[#allocation11 + $0x6]]  ;;  %s2019_s24 = sld [smem:[#allocation11 + $0x7]] }
  0x67   :  { %v169_v53 = vadd.f32 %v168_v42, %v166_v46  ;;  %v176_v54 = vadd.f32 %v175_v49, %v173_v47  ;;  %v180_v55 = vmul.f32 %v179_v50, %v1900_v0  ;;  %v2006_v56 = vmax.f32 %v162_v45, 0.0  ;;  %s2025_s25 = sld [smem:[#allocation11 + $0x8]]  ;;  %s2027_s26 = sld [smem:[#allocation11 + $0x9]] }
  0x68   :  { %v186_v57 = vstv %s1948_s13  ;;  %v189_v58 = vstv %s1954_s14  ;;  %v193_v59 = vstv %s1956_s15  ;;  %v196_v63 = vstv %s1962_s3  ;;  %s2033_s27 = sld [smem:[#allocation11 + $0x80]]  ;;  %s2035_s0 = sld [smem:[#allocation11 + $0x81]] }
  0x69   :  { %v2015_v60 = vmax.f32 %v169_v53, 0.0  ;;  %v183_v61 = vadd.f32 %v182_v51, %v180_v55  ;;  %v187_v62 = vmul.f32 %v186_v57, %v1900_v0  ;;  %v194_v1 = vmul.f32 %v193_v59, %v1900_v0  ;;  %s2038_s28 = sld [smem:[#allocation11 + $0x82]]  ;;  %s2040_s29 = sld [smem:[#allocation11 + $0x83]] }
  0x6a   :  { %v200_v2 = vstv %s1964_s4  ;;  %v203_v3 = vstv %s1971_s5  ;;  %v207_v4 = vstv %s1973_s16  ;;  %v2029_v5 = vmax.f32 %v176_v54, 0.0  ;;  %s2048_s30 = sld [smem:[#allocation11 + $0x84]]  ;;  %s2050_s8 = sld [smem:[#allocation11 + $0x85]] }
  0x6b   :  { %v190_v6 = vadd.f32 %v189_v58, %v187_v62  ;;  %v201_v7 = vmul.f32 %v200_v2, %v1900_v0  ;;  %v208_v8 = vmul.f32 %v207_v4, %v1900_v0  ;;  %v197_v9 = vadd.f32 %v196_v63, %v194_v1  ;;  %s2054_s9 = sld [smem:[#allocation11 + $0x86]]  ;;  %s2056_s10 = sld [smem:[#allocation11 + $0x87]] }
  0x6c   :  { %v210_v10 = vstv %s1979_s17  ;;  %v501_v11 = vstv %s1984_s1  ;;  %v503_v12 = vstv %s1986_s18  ;;  %v2044_v13 = vmax.f32 %v183_v61, 0.0  ;;  %s2067_s2 = sld [smem:[#allocation11 + $0xa]]  ;;  %s2073_s11 = sld [smem:[#allocation11 + $0xb]] }
  0x6d   :  { %v2046_v14 = vmax.f32 %v190_v6, 0.0  ;;  %v204_v15 = vadd.f32 %v203_v3, %v201_v7  ;;  %v211_v0 = vadd.f32 %v210_v10, %v208_v8  ;;  %v2052_v16 = vmax.f32 %v197_v9, 0.0  ;;  %s2083_s12 = sld [smem:[#allocation11 + $0x100]]  ;;  %s2085_s13 = sld [smem:[#allocation11 + $0x101]] }
  0x6e   :  { %v502_v17 = vmul.f32 %v501_v11, %v1944_v20  ;;  %v505_v18 = vstv %s1997_s19  ;;  %v507_v19 = vstv %s1999_s20  ;;  %v504_v23 = vmul.f32 %v503_v12, %v1944_v20  ;;  %s2091_s14 = sld [smem:[#allocation11 + $0x102]]  ;;  %s2093_s15 = sld [smem:[#allocation11 + $0x103]] }
  0x6f   :  { %v2061_v21 = vmax.f32 %v204_v15, 0.0  ;;  %v2063_v22 = vmax.f32 %v211_v0, 0.0  ;;  %v506_v25 = vmul.f32 %v505_v18, %v1944_v20  ;;  %v508_v26 = vmul.f32 %v507_v19, %v1944_v20  ;;  %s2098_s3 = sld [smem:[#allocation11 + $0x104]]  ;;  %s2100_s4 = sld [smem:[#allocation11 + $0x105]] }
  0x70   :  { %v712_v27 = vstv %s2004_s21  ;;  %v714_v29 = vstv %s2011_s22  ;;  %v716_v30 = vstv %s2013_s23  ;;  %v509_v31 = vstv %s2033_s27  ;;  %s2104_s5 = sld [smem:[#allocation11 + $0x106]]  ;;  %s2106_s16 = sld [smem:[#allocation11 + $0x107]] }
  0x71   :  { %v512_v33 = vstv %s2035_s0  ;;  %v713_v34 = vmul.f32 %v712_v27, %v1944_v20  ;;  %v718_v35 = vstv %s2019_s24  ;;  %v510_v37 = vmul.f32 %v509_v31, %v1950_v24  ;;  %s2112_s17 = sld [smem:[#allocation11 + $0x88]]  ;;  %s2114_s1 = sld [smem:[#allocation11 + $0x89]] }
  0x72   :  { %v513_v38 = vmul.f32 %v512_v33, %v1950_v24  ;;  %v515_v39 = vstv %s2038_s28  ;;  %v518_v40 = vstv %s2040_s29  ;;  %v715_v43 = vmul.f32 %v714_v29, %v1944_v20  ;;  %s2125_s18 = sld [smem:[#allocation11 + $0x8a]]  ;;  %s2130_s19 = sld [smem:[#allocation11 + $0x8b]] }
  0x73   :  { %v516_v41 = vmul.f32 %v515_v39, %v1950_v24  ;;  %v519_v42 = vmul.f32 %v518_v40, %v1950_v24  ;;  %v717_v45 = vmul.f32 %v716_v30, %v1944_v20  ;;  %v511_v46 = vadd.f32 %v510_v37, %v502_v17  ;;  %s2136_s20 = sld [smem:[#allocation11 + $0x180]]  ;;  %s2138_s21 = sld [smem:[#allocation11 + $0x181]] }
  0x74   :  { %v719_v47 = vmul.f32 %v718_v35, %v1944_v20  ;;  %v720_v49 = vstv %s2048_s30  ;;  %v723_v50 = vstv %s2050_s8  ;;  %v514_v51 = vadd.f32 %v513_v38, %v504_v23  ;;  %s2144_s22 = sld [smem:[#allocation11 + $0x182]]  ;;  %s2146_s23 = sld [smem:[#allocation11 + $0x183]] }
  0x75   :  { %v517_v53 = vadd.f32 %v516_v41, %v506_v25  ;;  %v721_v54 = vmul.f32 %v720_v49, %v1950_v24  ;;  %v724_v55 = vmul.f32 %v723_v50, %v1950_v24  ;;  %v726_v57 = vstv %s2054_s9  ;;  %s2150_s24 = sld [smem:[#allocation11 + $0x184]]  ;;  %s2158_s27 = sld [smem:[#allocation11 + $0x187]] }
  0x76   :  { %v729_v58 = vstv %s2056_s10  ;;  %v924_v59 = vstv %s2025_s25  ;;  %v926_v61 = vstv %s2027_s26  ;;  %v520_v62 = vadd.f32 %v519_v42, %v508_v26  ;;  %s2152_s25 = sld [smem:[#allocation11 + $0x185]]  ;;  %s2156_s26 = sld [smem:[#allocation11 + $0x186]] }
  0x77   :  { %v722_v63 = vadd.f32 %v721_v54, %v713_v34  ;;  %v725_v1 = vadd.f32 %v724_v55, %v715_v43  ;;  %v727_v2 = vmul.f32 %v726_v57, %v1950_v24  ;;  %v730_v3 = vmul.f32 %v729_v58, %v1950_v24  ;;  %s2165_s0 = sld [smem:[#allocation11 + $0x108]]  ;;  %s2171_s28 = sld [smem:[#allocation11 + $0x109]] }
  0x78   :  { %v2119_v4 = vmul.f32 %v924_v59, %v1944_v20  ;;  %v2122_v6 = vmul.f32 %v926_v61, %v1944_v20  ;;  %v928_v7 = vstv %s2067_s2  ;;  %v521_v8 = vstv %s2083_s12  ;;  %s2181_s29 = sld [smem:[#allocation11 + $0x200]]  ;;  %s2183_s30 = sld [smem:[#allocation11 + $0x201]] }
  0x79   :  { %v524_v9 = vstv %s2085_s13  ;;  %v728_v10 = vadd.f32 %v727_v2, %v717_v45  ;;  %v930_v11 = vstv %s2073_s11  ;;  %v522_v12 = vmul.f32 %v521_v8, %v1958_v28  ;;  %s2189_s8 = sld [smem:[#allocation11 + $0x202]]  ;;  %s2191_s9 = sld [smem:[#allocation11 + $0x203]] }
  0x7a   :  { %v525_v15 = vmul.f32 %v524_v9, %v1958_v28  ;;  %v527_v0 = vstv %s2091_s14  ;;  %v530_v17 = vstv %s2093_s15  ;;  %v732_v23 = vstv %s2098_s3  ;;  %s2196_s10 = sld [smem:[#allocation11 + $0x204]]  ;;  %s2198_s2 = sld [smem:[#allocation11 + $0x205]] }
  0x7b   :  { %v528_v18 = vmul.f32 %v527_v0, %v1958_v28  ;;  %v531_v19 = vmul.f32 %v530_v17, %v1958_v28  ;;  %v735_v25 = vstv %s2100_s4  ;;  %v523_v26 = vadd.f32 %v522_v12, %v511_v46  ;;  %s2202_s11 = sld [smem:[#allocation11 + $0x206]]  ;;  %s2204_s12 = sld [smem:[#allocation11 + $0x207]] }
  0x7c   :  { %v731_v27 = vadd.f32 %v730_v3, %v719_v47  ;;  %v733_v29 = vmul.f32 %v732_v23, %v1958_v28  ;;  %v736_v30 = vmul.f32 %v735_v25, %v1958_v28  ;;  %v526_v31 = vadd.f32 %v525_v15, %v514_v51  ;;  %s2208_s13 = sld [smem:[#allocation11 + $0x10a]]  ;;  %s2210_s14 = sld [smem:[#allocation11 + $0x10b]] }
  0x7d   :  { %v529_v33 = vadd.f32 %v528_v18, %v517_v53  ;;  %v738_v34 = vstv %s2104_s5  ;;  %v741_v35 = vstv %s2106_s16  ;;  %v532_v37 = vadd.f32 %v531_v19, %v520_v62  ;;  %s2228_s15 = sld [smem:[#allocation11 + $0x280]]  ;;  %s2230_s3 = sld [smem:[#allocation11 + $0x281]] }
  0x7e   :  { %v734_v38 = vadd.f32 %v733_v29, %v722_v63  ;;  %v739_v39 = vmul.f32 %v738_v34, %v1958_v28  ;;  %v742_v40 = vmul.f32 %v741_v35, %v1958_v28  ;;  %v737_v41 = vadd.f32 %v736_v30, %v725_v1  ;;  %s2236_s4 = sld [smem:[#allocation11 + $0x282]]  ;;  %s2238_s5 = sld [smem:[#allocation11 + $0x283]] }
  0x7f   :  { %v929_v42 = vmul.f32 %v928_v7, %v1944_v20  ;;  %v932_v43 = vstv %s2112_s17  ;;  %v935_v45 = vstv %s2114_s1  ;;  %v2168_v49 = vmul.f32 %v930_v11, %v1944_v20  ;;  %s2245_s16 = sld [smem:[#allocation11 + $0x284]]  ;;  %s2247_s17 = sld [smem:[#allocation11 + $0x285]] }
  0x80   :  { %v740_v46 = vadd.f32 %v739_v39, %v728_v10  ;;  %v743_v47 = vadd.f32 %v742_v40, %v731_v27  ;;  %v933_v50 = vmul.f32 %v932_v43, %v1950_v24  ;;  %v533_v51 = vstv %s2136_s20  ;;  %s2251_s1 = sld [smem:[#allocation11 + $0x286]]  ;;  %s2259_s20 = sld [smem:[#allocation11 + $0x189]] }
  0x81   :  { %v536_v53 = vstv %s2138_s21  ;;  %v936_v54 = vmul.f32 %v935_v45, %v1950_v24  ;;  %v938_v55 = vstv %s2125_s18  ;;  %v534_v57 = vmul.f32 %v533_v51, %v1966_v32  ;;  %s2253_s18 = sld [smem:[#allocation11 + $0x287]]  ;;  %s2266_s21 = sld [smem:[#allocation11 + $0x18a]] }
  0x82   :  { %v537_v58 = vmul.f32 %v536_v53, %v1966_v32  ;;  %v539_v59 = vstv %s2144_s22  ;;  %v542_v61 = vstv %s2146_s23  ;;  %v744_v1 = vstv %s2150_s24  ;;  %s2273_s22 = sld [smem:[#allocation11 + $0x18b]]  ;;  %s2279_s23 = sld [smem:[#allocation11 + $0x300]] }
  0x83   :  { %v540_v62 = vmul.f32 %v539_v59, %v1966_v32  ;;  %v543_v63 = vmul.f32 %v542_v61, %v1966_v32  ;;  %v747_v2 = vstv %s2152_s25  ;;  %v535_v3 = vadd.f32 %v534_v57, %v523_v26  ;;  %s2281_s24 = sld [smem:[#allocation11 + $0x301]]  ;;  %s2287_s25 = sld [smem:[#allocation11 + $0x302]] }
  0x84   :  { %v745_v7 = vmul.f32 %v744_v1, %v1966_v32  ;;  %v748_v8 = vmul.f32 %v747_v2, %v1966_v32  ;;  %v941_v9 = vstv %s2130_s19  ;;  %v538_v10 = vadd.f32 %v537_v58, %v526_v31  ;;  %s2257_s19 = sld [smem:[#allocation11 + $0x188]] }
  0x85   :  { %v541_v11 = vadd.f32 %v540_v62, %v529_v33  ;;  %v750_v12 = vstv %s2156_s26  ;;  %v753_v15 = vstv %s2158_s27  ;;  %v544_v0 = vadd.f32 %v543_v63, %v532_v37  ;;  %s2289_s26 = sld [smem:[#allocation11 + $0x303]]  ;;  %s2294_s27 = sld [smem:[#allocation11 + $0x304]] }
  0x86   :  { %v746_v17 = vadd.f32 %v745_v7, %v734_v38  ;;  %v751_v18 = vmul.f32 %v750_v12, %v1966_v32  ;;  %v754_v19 = vmul.f32 %v753_v15, %v1966_v32  ;;  %v749_v23 = vadd.f32 %v748_v8, %v737_v41 }
  0x87   :  { %v934_v25 = vadd.f32 %v933_v50, %v2119_v4  ;;  %v2214_v26 = vadd.f32 %v936_v54, %v2122_v6  ;;  %v939_v27 = vmul.f32 %v938_v55, %v1950_v24  ;;  %v942_v31 = vmul.f32 %v941_v9, %v1950_v24 }
  0x88   :  { %v752_v29 = vadd.f32 %v751_v18, %v740_v46  ;;  %v755_v30 = vadd.f32 %v754_v19, %v743_v47  ;;  %v944_v33 = vstv %s2165_s0  ;;  %v545_v34 = vstv %s2181_s29  ;;  %s2296_s0 = sld [smem:[#allocation11 + $0x305]]  ;;  %s2302_s29 = sld [smem:[#allocation11 + $0x307]] }
  0x89   :  { %v548_v35 = vstv %s2183_s30  ;;  %v2221_v37 = vadd.f32 %v939_v27, %v929_v42  ;;  %v947_v38 = vstv %s2171_s28  ;;  %v546_v39 = vmul.f32 %v545_v34, %v1975_v36  ;;  %s2300_s28 = sld [smem:[#allocation11 + $0x306]]  ;;  %s2309_s30 = sld [smem:[#allocation11 + $0x208]] }
  0x8a   :  { %v549_v4 = vmul.f32 %v548_v35, %v1975_v36  ;;  %v551_v6 = vstv %s2189_s8  ;;  %v554_v40 = vstv %s2191_s9  ;;  %v756_v45 = vstv %s2196_s10  ;;  %s2315_s8 = sld [smem:[#allocation11 + $0x209]]  ;;  %s2325_s9 = sld [smem:[#allocation11 + $0x380]] }
  0x8b   :  { %v552_v41 = vmul.f32 %v551_v6, %v1975_v36  ;;  %v555_v43 = vmul.f32 %v554_v40, %v1975_v36  ;;  %v759_v42 = vstv %s2198_s2  ;;  %v547_v46 = vadd.f32 %v546_v39, %v535_v3  ;;  %s2327_s10 = sld [smem:[#allocation11 + $0x381]]  ;;  %s2333_s2 = sld [smem:[#allocation11 + $0x382]] }
  0x8c   :  { %v757_v47 = vmul.f32 %v756_v45, %v1975_v36  ;;  %v760_v50 = vmul.f32 %v759_v42, %v1975_v36  ;;  %v2243_v51 = vadd.f32 %v942_v31, %v2168_v49  ;;  %v550_v53 = vadd.f32 %v549_v4, %v538_v10 }
  0x8d   :  { %v553_v54 = vadd.f32 %v552_v41, %v541_v11  ;;  %v762_v55 = vstv %s2202_s11  ;;  %v765_v57 = vstv %s2204_s12  ;;  %v556_v58 = vadd.f32 %v555_v43, %v544_v0  ;;  %s2335_s11 = sld [smem:[#allocation11 + $0x383]]  ;;  %s2340_s12 = sld [smem:[#allocation11 + $0x384]] }
  0x8e   :  { %v758_v59 = vadd.f32 %v757_v47, %v746_v17  ;;  %v763_v49 = vmul.f32 %v762_v55, %v1975_v36  ;;  %v766_v61 = vmul.f32 %v765_v57, %v1975_v36  ;;  %v761_v62 = vadd.f32 %v760_v50, %v749_v23 }
  0x8f   :  { %v945_v63 = vmul.f32 %v944_v33, %v1958_v28  ;;  %v950_v1 = vstv %s2208_s13  ;;  %v953_v2 = vstv %s2210_s14  ;;  %v948_v8 = vmul.f32 %v947_v38, %v1958_v28  ;;  %s2342_s13 = sld [smem:[#allocation11 + $0x385]]  ;;  %s2346_s14 = sld [smem:[#allocation11 + $0x386]] }
  0x90   :  { %v764_v3 = vadd.f32 %v763_v49, %v752_v29  ;;  %v767_v7 = vadd.f32 %v766_v61, %v755_v30  ;;  %v951_v9 = vmul.f32 %v950_v1, %v1958_v28  ;;  %v557_v10 = vstv %s2228_s15  ;;  %s2348_s15 = sld [smem:[#allocation11 + $0x387]] }
  0x91   :  { %v560_v11 = vstv %s2230_s3  ;;  %v2270_v12 = vadd.f32 %v945_v63, %v934_v25  ;;  %v954_v15 = vmul.f32 %v953_v2, %v1958_v28  ;;  %v558_v0 = vmul.f32 %v557_v10, %v1988_v44  ;;  %s2352_s3 = sld [smem:[#allocation11 + $0x20a]] }
  0x92   :  { %v561_v17 = vmul.f32 %v560_v11, %v1988_v44  ;;  %v563_v18 = vstv %s2236_s4  ;;  %v566_v19 = vstv %s2238_s5  ;;  %v768_v27 = vstv %s2245_s16  ;;  %s2354_s4 = sld [smem:[#allocation11 + $0x20b]]  ;;  %s2360_s5 = sld [smem:[#allocation11 + $0x288]] }
  0x93   :  { %v564_v23 = vmul.f32 %v563_v18, %v1988_v44  ;;  %v567_v25 = vmul.f32 %v566_v19, %v1988_v44  ;;  %v771_v29 = vstv %s2247_s17  ;;  %v559_v30 = vadd.f32 %v558_v0, %v547_v46  ;;  %s2362_s16 = sld [smem:[#allocation11 + $0x289]]  ;;  %s2369_s17 = sld [smem:[#allocation11 + $0x28a]] }
  0x94   :  { %v769_v31 = vmul.f32 %v768_v27, %v1988_v44  ;;  %v772_v33 = vmul.f32 %v771_v29, %v1988_v44  ;;  %v949_v34 = vadd.f32 %v948_v8, %v2214_v26  ;;  %v562_v35 = vadd.f32 %v561_v17, %v550_v53 }
  0x95   :  { %v565_v38 = vadd.f32 %v564_v23, %v553_v54  ;;  %v774_v39 = vstv %s2251_s1  ;;  %v777_v4 = vstv %s2253_s18  ;;  %v568_v6 = vadd.f32 %v567_v25, %v556_v58  ;;  %s2371_s1 = sld [smem:[#allocation11 + $0x28b]]  ;;  %s2377_s18 = sld [smem:[#allocation11 + $0x400]] }
  0x96   :  { %v770_v40 = vadd.f32 %v769_v31, %v758_v59  ;;  %v775_v26 = vmul.f32 %v774_v39, %v1988_v44  ;;  %v778_v41 = vmul.f32 %v777_v4, %v1988_v44  ;;  %v773_v43 = vadd.f32 %v772_v33, %v761_v62 }
  0x97   :  { %v952_v45 = vadd.f32 %v951_v9, %v2221_v37  ;;  %v956_v42 = vstv %s2257_s19  ;;  %v959_v46 = vstv %s2259_s20  ;;  %v2312_v53 = vadd.f32 %v954_v15, %v2243_v51  ;;  %s2379_s19 = sld [smem:[#allocation11 + $0x401]]  ;;  %s2385_s20 = sld [smem:[#allocation11 + $0x402]] }
  0x98   :  { %v776_v47 = vadd.f32 %v775_v26, %v764_v3  ;;  %v779_v50 = vadd.f32 %v778_v41, %v767_v7  ;;  %v957_v54 = vmul.f32 %v956_v42, %v1966_v32  ;;  %v569_v55 = vstv %s2279_s23  ;;  %s2396_s23 = sld [smem:[#allocation11 + $0x405]] }
  0x99   :  { %v572_v57 = vstv %s2281_s24  ;;  %v960_v37 = vmul.f32 %v959_v46, %v1966_v32  ;;  %v962_v58 = vstv %s2266_s21  ;;  %v570_v59 = vmul.f32 %v569_v55, %v1992_v48  ;;  %s2387_s21 = sld [smem:[#allocation11 + $0x403]]  ;;  %s2404_s24 = sld [smem:[#allocation11 + $0x406]] }
  0x9a   :  { %v573_v49 = vmul.f32 %v572_v57, %v1992_v48  ;;  %v575_v61 = vstv %s2287_s25  ;;  %v578_v62 = vstv %s2289_s26  ;;  %v780_v1 = vstv %s2294_s27  ;;  %s2406_s25 = sld [smem:[#allocation11 + $0x407]]  ;;  %s2414_s26 = sld [smem:[#allocation11 + $0x308]] }
  0x9b   :  { %v576_v51 = vmul.f32 %v575_v61, %v1992_v48  ;;  %v579_v63 = vmul.f32 %v578_v62, %v1992_v48  ;;  %v783_v2 = vstv %s2296_s0  ;;  %v571_v3 = vadd.f32 %v570_v59, %v559_v30  ;;  %s2420_s27 = sld [smem:[#allocation11 + $0x309]]  ;;  %s2422_s0 = sld [smem:[#allocation11 + $0x30a]] }
  0x9c   :  { %v781_v7 = vmul.f32 %v780_v1, %v1992_v48  ;;  %v784_v8 = vmul.f32 %v783_v2, %v1992_v48  ;;  %v965_v9 = vstv %s2273_s22  ;;  %v574_v10 = vadd.f32 %v573_v49, %v562_v35  ;;  %s2394_s22 = sld [smem:[#allocation11 + $0x404]] }
  0x9d   :  { %v577_v11 = vadd.f32 %v576_v51, %v565_v38  ;;  %v786_v15 = vstv %s2300_s28  ;;  %v789_v0 = vstv %s2302_s29  ;;  %v580_v17 = vadd.f32 %v579_v63, %v568_v6  ;;  %s2431_s28 = sld [smem:[#allocation11 + $0x30b]]  ;;  %s2439_s29 = sld [smem:[#allocation11 + $0x480]] }
  0x9e   :  { %v782_v18 = vadd.f32 %v781_v7, %v770_v40  ;;  %v787_v19 = vmul.f32 %v786_v15, %v1992_v48  ;;  %v790_v23 = vmul.f32 %v789_v0, %v1992_v48  ;;  %v785_v25 = vadd.f32 %v784_v8, %v773_v43 }
  0x9f   :  { %v958_v27 = vadd.f32 %v957_v54, %v2270_v12  ;;  %v961_v29 = vadd.f32 %v960_v37, %v949_v34  ;;  %v963_v30 = vmul.f32 %v962_v58, %v1966_v32  ;;  %v966_v35 = vmul.f32 %v965_v9, %v1966_v32 }
  0xa0   :  { %v788_v31 = vadd.f32 %v787_v19, %v776_v47  ;;  %v791_v33 = vadd.f32 %v790_v23, %v779_v50  ;;  %v968_v38 = vstv %s2309_s30  ;;  %v581_v39 = vstv %s2325_s9  ;;  %s2441_s30 = sld [smem:[#allocation11 + $0x481]]  ;;  %s2449_s9 = sld [smem:[#allocation11 + $0x483]] }
  0xa1   :  { %v584_v4 = vstv %s2327_s10  ;;  %v2366_v6 = vadd.f32 %v963_v30, %v952_v45  ;;  %v971_v12 = vstv %s2315_s8  ;;  %v582_v34 = vmul.f32 %v581_v39, %v2001_v52  ;;  %s2447_s8 = sld [smem:[#allocation11 + $0x482]]  ;;  %s2455_s10 = sld [smem:[#allocation11 + $0x484]] }
  0xa2   :  { %v585_v40 = vmul.f32 %v584_v4, %v2001_v52  ;;  %v587_v26 = vstv %s2333_s2  ;;  %v590_v41 = vstv %s2335_s11  ;;  %v792_v42 = vstv %s2340_s12  ;;  %s2457_s2 = sld [smem:[#allocation11 + $0x485]]  ;;  %s2463_s11 = sld [smem:[#allocation11 + $0x486]] }
  0xa3   :  { %v588_v43 = vmul.f32 %v587_v26, %v2001_v52  ;;  %v591_v45 = vmul.f32 %v590_v41, %v2001_v52  ;;  %v795_v46 = vstv %s2342_s13  ;;  %v2389_v47 = vadd.f32 %v582_v34, %v571_v3  ;;  %s2465_s12 = sld [smem:[#allocation11 + $0x487]]  ;;  %s2485_s13 = sld [smem:[#allocation11 + $0x500]] }
  0xa4   :  { %v793_v50 = vmul.f32 %v792_v42, %v2001_v52  ;;  %v796_v54 = vmul.f32 %v795_v46, %v2001_v52  ;;  %v967_v55 = vadd.f32 %v966_v35, %v2312_v53  ;;  %v2398_v57 = vadd.f32 %v585_v40, %v574_v10 }
  0xa5   :  { %v2400_v37 = vadd.f32 %v588_v43, %v577_v11  ;;  %v798_v58 = vstv %s2346_s14  ;;  %v801_v59 = vstv %s2348_s15  ;;  %v2408_v49 = vadd.f32 %v591_v45, %v580_v17  ;;  %s2487_s14 = sld [smem:[#allocation11 + $0x501]]  ;;  %s2493_s15 = sld [smem:[#allocation11 + $0x502]] }
  0xa6   :  { %v2410_v53 = vadd.f32 %v793_v50, %v782_v18  ;;  %v799_v61 = vmul.f32 %v798_v58, %v2001_v52  ;;  %v802_v62 = vmul.f32 %v801_v59, %v2001_v52  ;;  %v969_v51 = vmul.f32 %v968_v38, %v1975_v36 }
  0xa7   :  { %v972_v63 = vmul.f32 %v971_v12, %v1975_v36  ;;  %v974_v1 = vstv %s2352_s3  ;;  %v977_v2 = vstv %s2354_s4  ;;  %v2424_v3 = vadd.f32 %v796_v54, %v785_v25  ;;  %s2495_s3 = sld [smem:[#allocation11 + $0x503]]  ;;  %s2499_s4 = sld [smem:[#allocation11 + $0x504]] }
  0xa8   :  { %v2426_v7 = vadd.f32 %v799_v61, %v788_v31  ;;  %v2428_v8 = vadd.f32 %v802_v62, %v791_v33  ;;  %v975_v9 = vmul.f32 %v974_v1, %v1975_v36  ;;  %v593_v10 = vstv %s2377_s18  ;;  %s2513_s18 = sld [smem:[#allocation11 + $0x389]] }
  0xa9   :  { %v595_v11 = vstv %s2379_s19  ;;  %v970_v15 = vadd.f32 %v969_v51, %v958_v27  ;;  %v978_v0 = vmul.f32 %v977_v2, %v1975_v36  ;;  %v594_v17 = vmul.f32 %v593_v10, %v2006_v56  ;;  %s2518_s19 = sld [smem:[#allocation11 + $0x38a]] }
  0xaa   :  { %v597_v18 = vstv %s2385_s20  ;;  %v599_v19 = vstv %s2387_s21  ;;  %v973_v23 = vadd.f32 %v972_v63, %v961_v29  ;;  %v596_v25 = vmul.f32 %v595_v11, %v2006_v56  ;;  %s2525_s20 = sld [smem:[#allocation11 + $0x38b]]  ;;  %s2531_s21 = sld [smem:[#allocation11 + $0x580]] }
  0xab   :  { %v598_v30 = vmul.f32 %v597_v18, %v2006_v56  ;;  %v804_v31 = vstv %s2394_s22  ;;  %v806_v27 = vstv %s2396_s23  ;;  %v600_v29 = vmul.f32 %v599_v19, %v2006_v56  ;;  %s2533_s22 = sld [smem:[#allocation11 + $0x581]]  ;;  %s2539_s23 = sld [smem:[#allocation11 + $0x582]] }
  0xac   :  { %v805_v33 = vmul.f32 %v804_v31, %v2006_v56  ;;  %v808_v35 = vstv %s2404_s24  ;;  %v810_v38 = vstv %s2406_s25  ;;  %v807_v39 = vmul.f32 %v806_v27, %v2006_v56  ;;  %s2541_s24 = sld [smem:[#allocation11 + $0x583]]  ;;  %s2545_s25 = sld [smem:[#allocation11 + $0x584]] }
  0xad   :  { %v809_v4 = vmul.f32 %v808_v35, %v2006_v56  ;;  %v811_v12 = vmul.f32 %v810_v38, %v2006_v56  ;;  %v976_v34 = vadd.f32 %v975_v9, %v2366_v6  ;;  %v980_v40 = vstv %s2360_s5  ;;  %s2501_s5 = sld [smem:[#allocation11 + $0x505]] }
  0xae   :  { %v983_v26 = vstv %s2362_s16  ;;  %v986_v41 = vstv %s2369_s17  ;;  %v989_v43 = vstv %s2371_s1  ;;  %v979_v45 = vadd.f32 %v978_v0, %v967_v55  ;;  %s2505_s16 = sld [smem:[#allocation11 + $0x506]]  ;;  %s2507_s17 = sld [smem:[#allocation11 + $0x507]] }
  0xaf   :  { %v981_v42 = vmul.f32 %v980_v40, %v1988_v44  ;;  %v984_v46 = vmul.f32 %v983_v26, %v1988_v44  ;;  %v987_v50 = vmul.f32 %v986_v41, %v1988_v44  ;;  %v990_v6 = vmul.f32 %v989_v43, %v1988_v44  ;;  %s2511_s1 = sld [smem:[#allocation11 + $0x388]] }
  0xb0   :  { %v992_v54 = vstv %s2414_s26  ;;  %v995_v58 = vstv %s2420_s27  ;;  %v998_v59 = vstv %s2422_s0  ;;  %v601_v61 = vstv %s2439_s29  ;;  %s2547_s26 = sld [smem:[#allocation11 + $0x585]]  ;;  %s2551_s27 = sld [smem:[#allocation11 + $0x586]] }
  0xb1   :  { %v604_v62 = vstv %s2441_s30  ;;  %v982_v51 = vadd.f32 %v981_v42, %v970_v15  ;;  %v1001_v63 = vstv %s2431_s28  ;;  %v602_v1 = vmul.f32 %v601_v61, %v2015_v60  ;;  %s2553_s0 = sld [smem:[#allocation11 + $0x587]]  ;;  %s2559_s28 = sld [smem:[#allocation11 + $0x408]] }
  0xb2   :  { %v605_v55 = vmul.f32 %v604_v62, %v2015_v60  ;;  %v607_v2 = vstv %s2447_s8  ;;  %v610_v9 = vstv %s2449_s9  ;;  %v812_v0 = vstv %s2455_s10  ;;  %s2564_s29 = sld [smem:[#allocation11 + $0x409]]  ;;  %s2574_s30 = sld [smem:[#allocation11 + $0x600]] }
  0xb3   :  { %v608_v10 = vmul.f32 %v607_v2, %v2015_v60  ;;  %v611_v11 = vmul.f32 %v610_v9, %v2015_v60  ;;  %v815_v18 = vstv %s2457_s2  ;;  %v603_v15 = vadd.f32 %v602_v1, %v594_v17  ;;  %s2576_s8 = sld [smem:[#allocation11 + $0x601]]  ;;  %s2582_s9 = sld [smem:[#allocation11 + $0x602]] }
  0xb4   :  { %v813_v19 = vmul.f32 %v812_v0, %v2015_v60  ;;  %v816_v31 = vmul.f32 %v815_v18, %v2015_v60  ;;  %v985_v27 = vadd.f32 %v984_v46, %v973_v23  ;;  %v606_v35 = vadd.f32 %v605_v55, %v596_v25  ;;  %s2584_s10 = sld [smem:[#allocation11 + $0x603]]  ;;  %s2589_s2 = sld [smem:[#allocation11 + $0x604]] }
  0xb5   :  { %v609_v38 = vadd.f32 %v608_v10, %v598_v30  ;;  %v818_v40 = vstv %s2463_s11  ;;  %v821_v26 = vstv %s2465_s12  ;;  %v612_v41 = vadd.f32 %v611_v11, %v600_v29  ;;  %s2591_s11 = sld [smem:[#allocation11 + $0x605]]  ;;  %s2595_s12 = sld [smem:[#allocation11 + $0x606]] }
  0xb6   :  { %v814_v17 = vadd.f32 %v813_v19, %v805_v33  ;;  %v819_v43 = vmul.f32 %v818_v40, %v2015_v60  ;;  %v822_v23 = vmul.f32 %v821_v26, %v2015_v60  ;;  %v817_v25 = vadd.f32 %v816_v31, %v807_v39 }
  0xb7   :  { %v988_v30 = vadd.f32 %v987_v50, %v976_v34  ;;  %v991_v42 = vadd.f32 %v990_v6, %v979_v45  ;;  %v993_v46 = vmul.f32 %v992_v54, %v1992_v48  ;;  %v996_v29 = vmul.f32 %v995_v58, %v1992_v48 }
  0xb8   :  { %v820_v61 = vadd.f32 %v819_v43, %v809_v4  ;;  %v823_v62 = vadd.f32 %v822_v23, %v811_v12  ;;  %v999_v33 = vmul.f32 %v998_v59, %v1992_v48  ;;  %v613_v1 = vstv %s2485_s13  ;;  %s2597_s13 = sld [smem:[#allocation11 + $0x607]] }
  0xb9   :  { %v616_v55 = vstv %s2487_s14  ;;  %v2522_v2 = vadd.f32 %v993_v46, %v982_v51  ;;  %v1002_v39 = vmul.f32 %v1001_v63, %v1992_v48  ;;  %v614_v34 = vmul.f32 %v613_v1, %v2029_v5  ;;  %s2601_s14 = sld [smem:[#allocation11 + $0x40a]] }
  0xba   :  { %v617_v4 = vmul.f32 %v616_v55, %v2029_v5  ;;  %v619_v12 = vstv %s2493_s15  ;;  %v622_v45 = vstv %s2495_s3  ;;  %v824_v54 = vstv %s2499_s4  ;;  %s2603_s15 = sld [smem:[#allocation11 + $0x40b]]  ;;  %s2613_s3 = sld [smem:[#allocation11 + $0x488]] }
  0xbb   :  { %v620_v50 = vmul.f32 %v619_v12, %v2029_v5  ;;  %v623_v6 = vmul.f32 %v622_v45, %v2029_v5  ;;  %v827_v58 = vstv %s2501_s5  ;;  %v615_v59 = vadd.f32 %v614_v34, %v603_v15  ;;  %s2620_s4 = sld [smem:[#allocation11 + $0x489]]  ;;  %s2626_s5 = sld [smem:[#allocation11 + $0x680]] }
  0xbc   :  { %v825_v51 = vmul.f32 %v824_v54, %v2029_v5  ;;  %v828_v63 = vmul.f32 %v827_v58, %v2029_v5  ;;  %v997_v9 = vadd.f32 %v996_v29, %v985_v27  ;;  %v618_v10 = vadd.f32 %v617_v4, %v606_v35 }
  0xbd   :  { %v621_v11 = vadd.f32 %v620_v50, %v609_v38  ;;  %v830_v0 = vstv %s2505_s16  ;;  %v833_v18 = vstv %s2507_s17  ;;  %v624_v15 = vadd.f32 %v623_v6, %v612_v41  ;;  %s2628_s16 = sld [smem:[#allocation11 + $0x681]]  ;;  %s2634_s17 = sld [smem:[#allocation11 + $0x682]] }
  0xbe   :  { %v826_v19 = vadd.f32 %v825_v51, %v814_v17  ;;  %v831_v31 = vmul.f32 %v830_v0, %v2029_v5  ;;  %v834_v27 = vmul.f32 %v833_v18, %v2029_v5  ;;  %v829_v40 = vadd.f32 %v828_v63, %v817_v25 }
  0xbf   :  { %v1000_v26 = vadd.f32 %v999_v33, %v988_v30  ;;  %v1004_v35 = vstv %s2511_s1  ;;  %v1007_v38 = vstv %s2513_s18  ;;  %v2561_v46 = vadd.f32 %v1002_v39, %v991_v42  ;;  %s2636_s1 = sld [smem:[#allocation11 + $0x683]]  ;;  %s2643_s18 = sld [smem:[#allocation11 + $0x684]] }
  0xc0   :  { %v832_v43 = vadd.f32 %v831_v31, %v820_v61  ;;  %v835_v23 = vadd.f32 %v834_v27, %v823_v62  ;;  %v1005_v41 = vmul.f32 %v1004_v35, %v2001_v52  ;;  %v625_v17 = vstv %s2531_s21  ;;  %s2651_s21 = sld [smem:[#allocation11 + $0x687]] }
  0xc1   :  { %v628_v29 = vstv %s2533_s22  ;;  %v1008_v25 = vmul.f32 %v1007_v38, %v2001_v52  ;;  %v1010_v30 = vstv %s2518_s19  ;;  %v626_v33 = vmul.f32 %v625_v17, %v2044_v13  ;;  %s2645_s19 = sld [smem:[#allocation11 + $0x685]]  ;;  %s2655_s22 = sld [smem:[#allocation11 + $0x48a]] }
  0xc2   :  { %v629_v1 = vmul.f32 %v628_v29, %v2044_v13  ;;  %v631_v61 = vstv %s2539_s23  ;;  %v634_v62 = vstv %s2541_s24  ;;  %v836_v39 = vstv %s2545_s25  ;;  %s2657_s23 = sld [smem:[#allocation11 + $0x48b]]  ;;  %s2678_s24 = sld [smem:[#allocation11 + $0x700]] }
  0xc3   :  { %v632_v42 = vmul.f32 %v631_v61, %v2044_v13  ;;  %v635_v55 = vmul.f32 %v634_v62, %v2044_v13  ;;  %v839_v34 = vstv %s2547_s26  ;;  %v627_v4 = vadd.f32 %v626_v33, %v615_v59  ;;  %s2680_s25 = sld [smem:[#allocation11 + $0x701]]  ;;  %s2686_s26 = sld [smem:[#allocation11 + $0x702]] }
  0xc4   :  { %v837_v12 = vmul.f32 %v836_v39, %v2044_v13  ;;  %v840_v45 = vmul.f32 %v839_v34, %v2044_v13  ;;  %v1013_v50 = vstv %s2525_s20  ;;  %v630_v6 = vadd.f32 %v629_v1, %v618_v10  ;;  %s2649_s20 = sld [smem:[#allocation11 + $0x686]] }
  0xc5   :  { %v633_v54 = vadd.f32 %v632_v42, %v621_v11  ;;  %v842_v58 = vstv %s2551_s27  ;;  %v845_v51 = vstv %s2553_s0  ;;  %v636_v59 = vadd.f32 %v635_v55, %v624_v15  ;;  %s2688_s27 = sld [smem:[#allocation11 + $0x703]]  ;;  %s2693_s0 = sld [smem:[#allocation11 + $0x704]] }
  0xc6   :  { %v838_v63 = vadd.f32 %v837_v12, %v826_v19  ;;  %v843_v0 = vmul.f32 %v842_v58, %v2044_v13  ;;  %v846_v18 = vmul.f32 %v845_v51, %v2044_v13  ;;  %v841_v10 = vadd.f32 %v840_v45, %v829_v40 }
  0xc7   :  { %v2606_v11 = vadd.f32 %v1005_v41, %v2522_v2  ;;  %v2608_v31 = vadd.f32 %v1008_v25, %v997_v9  ;;  %v1011_v15 = vmul.f32 %v1010_v30, %v2001_v52  ;;  %v1014_v35 = vmul.f32 %v1013_v50, %v2001_v52 }
  0xc8   :  { %v844_v19 = vadd.f32 %v843_v0, %v832_v43  ;;  %v847_v27 = vadd.f32 %v846_v18, %v835_v23  ;;  %v1016_v38 = vstv %s2559_s28  ;;  %v637_v17 = vstv %s2574_s30  ;;  %s2695_s28 = sld [smem:[#allocation11 + $0x705]]  ;;  %s2701_s30 = sld [smem:[#allocation11 + $0x707]] }
  0xc9   :  { %v640_v40 = vstv %s2576_s8  ;;  %v2617_v29 = vadd.f32 %v1011_v15, %v1000_v26  ;;  %v1018_v2 = vstv %s2564_s29  ;;  %v638_v9 = vmul.f32 %v637_v17, %v2046_v14  ;;  %s2699_s29 = sld [smem:[#allocation11 + $0x706]]  ;;  %s2705_s8 = sld [smem:[#allocation11 + $0x508]] }
  0xca   :  { %v641_v41 = vmul.f32 %v640_v40, %v2046_v14  ;;  %v643_v43 = vstv %s2582_s9  ;;  %v646_v23 = vstv %s2584_s10  ;;  %v848_v30 = vstv %s2589_s2  ;;  %s2707_s9 = sld [smem:[#allocation11 + $0x509]]  ;;  %s2714_s10 = sld [smem:[#allocation11 + $0x50a]] }
  0xcb   :  { %v644_v25 = vmul.f32 %v643_v43, %v2046_v14  ;;  %v647_v26 = vmul.f32 %v646_v23, %v2046_v14  ;;  %v851_v33 = vstv %s2591_s11  ;;  %v639_v1 = vadd.f32 %v638_v9, %v627_v4  ;;  %s2725_s2 = sld [smem:[#allocation11 + $0x780]]  ;;  %s2727_s11 = sld [smem:[#allocation11 + $0x781]] }
  0xcc   :  { %v849_v61 = vmul.f32 %v848_v30, %v2046_v14  ;;  %v852_v62 = vmul.f32 %v851_v33, %v2046_v14  ;;  %v2641_v42 = vadd.f32 %v1014_v35, %v2561_v46  ;;  %v642_v55 = vadd.f32 %v641_v41, %v630_v6 }
  0xcd   :  { %v645_v39 = vadd.f32 %v644_v25, %v633_v54  ;;  %v854_v34 = vstv %s2595_s12  ;;  %v857_v12 = vstv %s2597_s13  ;;  %v648_v4 = vadd.f32 %v647_v26, %v636_v59  ;;  %s2733_s12 = sld [smem:[#allocation11 + $0x782]]  ;;  %s2735_s13 = sld [smem:[#allocation11 + $0x783]] }
  0xce   :  { %v850_v45 = vadd.f32 %v849_v61, %v838_v63  ;;  %v855_v46 = vmul.f32 %v854_v34, %v2046_v14  ;;  %v858_v50 = vmul.f32 %v857_v12, %v2046_v14  ;;  %v853_v6 = vadd.f32 %v852_v62, %v841_v10 }
  0xcf   :  { %v1017_v54 = vmul.f32 %v1016_v38, %v2006_v56  ;;  %v1020_v58 = vstv %s2601_s14  ;;  %v1022_v51 = vstv %s2603_s15  ;;  %v2663_v63 = vmul.f32 %v1018_v2, %v2006_v56  ;;  %s2742_s14 = sld [smem:[#allocation11 + $0x784]]  ;;  %s2744_s15 = sld [smem:[#allocation11 + $0x785]] }
  0xd0   :  { %v856_v0 = vadd.f32 %v855_v46, %v844_v19  ;;  %v859_v59 = vadd.f32 %v858_v50, %v847_v27  ;;  %v2666_v18 = vmul.f32 %v1020_v58, %v2006_v56  ;;  %v649_v15 = vstv %s2626_s5  ;;  %s2759_s5 = sld [smem:[#allocation11 + $0x50b]] }
  0xd1   :  { %v652_v35 = vstv %s2628_s16  ;;  %v2671_v17 = vmul.f32 %v1022_v51, %v2006_v56  ;;  %v1024_v10 = vstv %s2613_s3  ;;  %v650_v38 = vmul.f32 %v649_v15, %v2052_v16  ;;  %s2748_s3 = sld [smem:[#allocation11 + $0x786]]  ;;  %s2773_s16 = sld [smem:[#allocation12]] }
  0xd2   :  { %v653_v19 = vmul.f32 %v652_v35, %v2052_v16  ;;  %v655_v40 = vstv %s2634_s17  ;;  %v658_v27 = vstv %s2636_s1  ;;  %v860_v41 = vstv %s2643_s18  ;;  %s2775_s17 = sld [smem:[#allocation12 + $0x1]]  ;;  %s2781_s1 = sld [smem:[#allocation12 + $0x2]] }
  0xd3   :  { %v656_v2 = vmul.f32 %v655_v40, %v2052_v16  ;;  %v659_v9 = vmul.f32 %v658_v27, %v2052_v16  ;;  %v863_v43 = vstv %s2645_s19  ;;  %v651_v23 = vadd.f32 %v650_v38, %v639_v1  ;;  %s2783_s18 = sld [smem:[#allocation12 + $0x3]]  ;;  %s2787_s19 = sld [smem:[#allocation12 + $0x4]] }
  0xd4   :  { %v861_v25 = vmul.f32 %v860_v41, %v2052_v16  ;;  %v864_v26 = vmul.f32 %v863_v43, %v2052_v16  ;;  %v1027_v30 = vstv %s2620_s4  ;;  %v654_v33 = vadd.f32 %v653_v19, %v642_v55  ;;  %s2750_s4 = sld [smem:[#allocation11 + $0x787]] }
  0xd5   :  { %v657_v61 = vadd.f32 %v656_v2, %v645_v39  ;;  %v866_v62 = vstv %s2649_s20  ;;  %v869_v34 = vstv %s2651_s21  ;;  %v660_v1 = vadd.f32 %v659_v9, %v648_v4  ;;  %s2789_s20 = sld [smem:[#allocation12 + $0x5]]  ;;  %s2793_s21 = sld [smem:[#allocation12 + $0x6]] }
  0xd6   :  { %v862_v12 = vadd.f32 %v861_v25, %v850_v45  ;;  %v867_v46 = vmul.f32 %v866_v62, %v2052_v16  ;;  %v870_v50 = vmul.f32 %v869_v34, %v2052_v16  ;;  %v865_v55 = vadd.f32 %v864_v26, %v853_v6 }
  0xd7   :  { %v1025_v39 = vmul.f32 %v1024_v10, %v2015_v60  ;;  %v1030_v58 = vstv %s2655_s22  ;;  %v1033_v51 = vstv %s2657_s23  ;;  %v1028_v4 = vmul.f32 %v1027_v30, %v2015_v60  ;;  %s2795_s22 = sld [smem:[#allocation12 + $0x7]]  ;;  %s2799_s23 = sld [smem:[#allocation11 + $0x588]] }
  0xd8   :  { %v868_v15 = vadd.f32 %v867_v46, %v856_v0  ;;  %v871_v35 = vadd.f32 %v870_v50, %v859_v59  ;;  %v1031_v45 = vmul.f32 %v1030_v58, %v2015_v60  ;;  %v661_v38 = vstv %s2678_s24  ;;  %s2805_s24 = sld [smem:[#allocation11 + $0x589]] }
  0xd9   :  { %v664_v19 = vstv %s2680_s25  ;;  %v2718_v40 = vadd.f32 %v1025_v39, %v1017_v54  ;;  %v1034_v6 = vmul.f32 %v1033_v51, %v2015_v60  ;;  %v662_v10 = vmul.f32 %v661_v38, %v2061_v21  ;;  %s2813_s25 = sld [smem:[#allocation11 + $0x58a]] }
  0xda   :  { %v665_v27 = vmul.f32 %v664_v19, %v2061_v21  ;;  %v667_v0 = vstv %s2686_s26  ;;  %v670_v59 = vstv %s2688_s27  ;;  %v872_v54 = vstv %s2693_s0  ;;  %s2817_s26 = sld [smem:[#allocation11 + $0x58b]]  ;;  %s2821_s27 = sld [smem:[#allocation13]] }
  0xdb   :  { %v668_v2 = vmul.f32 %v667_v0, %v2061_v21  ;;  %v671_v9 = vmul.f32 %v670_v59, %v2061_v21  ;;  %v875_v41 = vstv %s2695_s28  ;;  %v663_v43 = vadd.f32 %v662_v10, %v651_v23  ;;  %s2823_s0 = sld [smem:[#allocation13 + $0x1]]  ;;  %s2827_s28 = sld [smem:[#allocation13 + $0x2]] }
  0xdc   :  { %v873_v25 = vmul.f32 %v872_v54, %v2061_v21  ;;  %v876_v26 = vmul.f32 %v875_v41, %v2061_v21  ;;  %v2740_v30 = vadd.f32 %v1028_v4, %v2663_v63  ;;  %v666_v62 = vadd.f32 %v665_v27, %v654_v33 }
  0xdd   :  { %v669_v34 = vadd.f32 %v668_v2, %v657_v61  ;;  %v878_v46 = vstv %s2699_s29  ;;  %v881_v50 = vstv %s2701_s30  ;;  %v672_v23 = vadd.f32 %v671_v9, %v660_v1  ;;  %s2829_s29 = sld [smem:[#allocation13 + $0x3]]  ;;  %s2832_s30 = sld [smem:[#allocation13 + $0x4]] }
  0xde   :  { %v874_v39 = vadd.f32 %v873_v25, %v862_v12  ;;  %v879_v63 = vmul.f32 %v878_v46, %v2061_v21  ;;  %v882_v58 = vmul.f32 %v881_v50, %v2061_v21  ;;  %v877_v51 = vadd.f32 %v876_v26, %v865_v55 }
  0xdf   :  { %v2755_v33 = vadd.f32 %v1031_v45, %v2666_v18  ;;  %v1036_v61 = vstv %s2705_s8  ;;  %v1039_v4 = vstv %s2707_s9  ;;  %v2762_v1 = vadd.f32 %v1034_v6, %v2671_v17  ;;  %s2834_s8 = sld [smem:[#allocation13 + $0x5]]  ;;  %s2838_s9 = sld [smem:[#allocation13 + $0x6]] }
  0xe0   :  { %v880_v38 = vadd.f32 %v879_v63, %v868_v15  ;;  %v883_v19 = vadd.f32 %v882_v58, %v871_v35  ;;  %v1037_v12 = vmul.f32 %v1036_v61, %v2029_v5  ;;  %v673_v10 = vstv %s2725_s2  ;;  %s2840_s2 = sld [smem:[#allocation13 + $0x7]] }
  0xe1   :  { %v676_v27 = vstv %s2727_s11  ;;  %v1040_v55 = vmul.f32 %v1039_v4, %v2029_v5  ;;  %v1042_v0 = vstv %s2714_s10  ;;  %v674_v18 = vmul.f32 %v673_v10, %v2063_v22  ;;  %s2844_s11 = sld [smem:[#allocation11 + $0x608]] }
  0xe2   :  { %v677_v45 = vmul.f32 %v676_v27, %v2063_v22  ;;  %v679_v59 = vstv %s2733_s12  ;;  %v682_v2 = vstv %s2735_s13  ;;  %v884_v35 = vstv %s2742_s14  ;;  %s2846_s12 = sld [smem:[#allocation11 + $0x609]]  ;;  %s2857_s13 = sld [smem:[#allocation11 + $0x60a]] }
  0xe3   :  { %v680_v17 = vmul.f32 %v679_v59, %v2063_v22  ;;  %v683_v15 = vmul.f32 %v682_v2, %v2063_v22  ;;  %v887_v6 = vstv %s2744_s15  ;;  %v675_v9 = vadd.f32 %v674_v18, %v663_v43  ;;  %s2859_s14 = sld [smem:[#allocation11 + $0x60b]]  ;;  %s2866_s10 = sld [smem:[#allocation11 + $0x688]] }
  0xe4   :  { %v678_v54 = vadd.f32 %v677_v45, %v666_v62  ;;  %v885_v41 = vmul.f32 %v884_v35, %v2063_v22  ;;  %v888_v25 = vmul.f32 %v887_v6, %v2063_v22  ;;  %v890_v50 = vstv %s2748_s3  ;;  %s2868_s15 = sld [smem:[#allocation11 + $0x689]]  ;;  %s2873_s3 = sld [smem:[#allocation11 + $0x68a]] }
  0xe5   :  { %v681_v26 = vadd.f32 %v680_v17, %v669_v34  ;;  %v684_v46 = vadd.f32 %v683_v15, %v672_v23  ;;  %v893_v63 = vstv %s2750_s4  ;;  %v685_v43 = vadd.f32 %v675_v9, %v2389_v47  ;;  %s2876_s4 = sld [smem:[#allocation11 + $0x68b]] }
  0xe6   :  { %v691_v62 = vadd.f32 %v678_v54, %v2398_v57  ;;  %v886_v58 = vadd.f32 %v885_v41, %v874_v39  ;;  %v889_v61 = vadd.f32 %v888_v25, %v877_v51  ;;  %v891_v4 = vmul.f32 %v890_v50, %v2063_v22 }
  0xe7   :  { %v698_v34 = vadd.f32 %v681_v26, %v2400_v37  ;;  %v705_v23 = vadd.f32 %v684_v46, %v2408_v49  ;;  %v894_v10 = vmul.f32 %v893_v63, %v2063_v22  ;;  %v2810_v39 = vadd.f32 %v1037_v12, %v2718_v40 }
  0xe8   :  { %v896_v47 = vadd.f32 %v886_v58, %v2410_v53  ;;  %v903_v57 = vadd.f32 %v889_v61, %v2424_v3  ;;  %v1045_v51 = vstv %s2759_s5  ;;  %v686_v37 = vstv %s2773_s16  ;;  %s2878_s5 = sld [smem:[#allocation11 + $0x708]]  ;;  %s2885_s16 = sld [smem:[#allocation11 + $0x709]] }
  0xe9   :  { %v692_v49 = vstv %s2775_s17  ;;  %v892_v27 = vadd.f32 %v891_v4, %v880_v38  ;;  %v895_v18 = vadd.f32 %v894_v10, %v883_v19  ;;  %v687_v45 = vadd.f32 %v686_v37, %v685_v43  ;;  %s2887_s17 = sld [smem:[#allocation11 + $0x70a]] }
  0xea   :  { %v693_v59 = vadd.f32 %v692_v49, %v691_v62  ;;  %v699_v2 = vstv %s2781_s1  ;;  %v706_v53 = vstv %s2783_s18  ;;  %v897_v12 = vstv %s2787_s19  ;;  %s2894_s1 = sld [smem:[#allocation11 + $0x70b]]  ;;  %s2896_s18 = sld [smem:[#allocation11 + $0x788]] }
  0xeb   :  { %v700_v3 = vadd.f32 %v699_v2, %v698_v34  ;;  %v707_v40 = vadd.f32 %v706_v53, %v705_v23  ;;  %v904_v17 = vstv %s2789_s20  ;;  %v688_v38 = vmax.f32 %v687_v45, 0.0  ;;  %s2902_s19 = sld [smem:[#allocation11 + $0x789]]  ;;  %s2906_s20 = sld [smem:[#allocation11 + $0x78a]] }
  0xec   :  { %v898_v19 = vadd.f32 %v897_v12, %v896_v47  ;;  %v905_v15 = vadd.f32 %v904_v17, %v903_v57  ;;  %v1041_v35 = vadd.f32 %v1040_v55, %v2740_v30  ;;  %v694_v6 = vmax.f32 %v693_v59, 0.0 }
  0xed   :  { %v701_v9 = vmax.f32 %v700_v3, 0.0  ;;  %v910_v54 = vadd.f32 %v892_v27, %v2426_v7  ;;  %v911_v41 = vstv %s2793_s21  ;;  %v708_v25 = vmax.f32 %v707_v40, 0.0  ;;  %s2908_s21 = sld [smem:[#allocation11 + $0x78b]] }
  0xee   :  { %v899_v26 = vmax.f32 %v898_v19, 0.0  ;;  %v917_v30 = vadd.f32 %v895_v18, %v2428_v8  ;;  %v918_v55 = vstv %s2795_s22  ;;  %v906_v46 = vmax.f32 %v905_v15, 0.0  ;;  %s2913_s22 = sld [smem:[#allocation12 + $0x8]] }
  0xef   :  { %v912_v7 = vadd.f32 %v911_v41, %v910_v54  ;;  %v1043_v50 = vmul.f32 %v1042_v0, %v2029_v5  ;;  %v1048_v63 = vstv %s2799_s23  ;;  %v1046_v62 = vmul.f32 %v1045_v51, %v2029_v5  ;;  %s2919_s23 = sld [smem:[#allocation12 + $0x9]] }
  0xf0   :  { %v2852_v43 = vadd.f32 %v918_v55, %v917_v30  ;;  %v1049_v8 = vmul.f32 %v1048_v63, %v2044_v13  ;;  %v1051_v58 = vstv %s2805_s24  ;;  %v689_v61 = vstv %s2821_s27  ;;  %s2923_s24 = sld [smem:[#allocation11 + $0xc]]  ;;  %s2932_s27 = sld [smem:[#allocation11 + $0xe]] }
  0xf1   :  { %v695_v34 = vstv %s2823_s0  ;;  %v913_v23 = vmax.f32 %v912_v7, 0.0  ;;  %v1054_v4 = vstv %s2813_s25  ;;  %v690_v0 = vmul.f32 %v689_v61, %v688_v38  ;;  %s2925_s25 = sld [smem:[#allocation12 + $0xa]]  ;;  %s2935_s0 = sld [smem:[#allocation11 + $0xf]] }
  0xf2   :  { %v696_v10 = vmul.f32 %v695_v34, %v694_v6  ;;  %v702_v47 = vstv %s2827_s28  ;;  %v709_v57 = vstv %s2829_s29  ;;  %v900_v37 = vstv %s2832_s30  ;;  %s2937_s28 = sld [smem:[#allocation12 + $0xb]]  ;;  %s2942_s29 = sld [smem:[#allocation13 + $0x8]] }
  0xf3   :  { %v703_v51 = vmul.f32 %v702_v47, %v701_v9  ;;  %v907_v49 = vstv %s2834_s8  ;;  %v1044_v27 = vadd.f32 %v1043_v50, %v2755_v33  ;;  %v710_v45 = vmul.f32 %v709_v57, %v708_v25  ;;  %s2944_s30 = sld [smem:[#allocation13 + $0x9]]  ;;  %s2949_s8 = sld [smem:[#allocation13 + $0xa]] }
  0xf4   :  { %v697_v18 = vadd.f32 %v696_v10, %v690_v0  ;;  %v901_v59 = vmul.f32 %v900_v37, %v899_v26  ;;  %v914_v2 = vstv %s2838_s9  ;;  %v908_v53 = vmul.f32 %v907_v49, %v906_v46  ;;  %s2951_s9 = sld [smem:[#allocation13 + $0xb]] }
  0xf5   :  { %v915_v3 = vmul.f32 %v914_v2, %v913_v23  ;;  %v920_v40 = vmax.f32 %v2852_v43, 0.0  ;;  %v921_v12 = vstv %s2840_s2  ;;  %v1047_v33 = vadd.f32 %v1046_v62, %v2762_v1  ;;  %s2956_s2 = sld [smem:[#allocation11 + $0x8c]] }
  0xf6   :  { %v704_v17 = vadd.f32 %v703_v51, %v697_v18  ;;  %v1052_v38 = vmul.f32 %v1051_v58, %v2044_v13  ;;  %v1055_v19 = vmul.f32 %v1054_v4, %v2044_v13  ;;  %v1050_v15 = vadd.f32 %v1049_v8, %v2810_v39 }
  0xf7   :  { %v1057_v6 = vstv %s2817_s26  ;;  %v1060_v9 = vstv %s2844_s11  ;;  %v1063_v54 = vstv %s2846_s12  ;;  %v1066_v46 = vstv %s2857_s13  ;;  %s2930_s26 = sld [smem:[#allocation11 + $0xd]]  ;;  %s2962_s12 = sld [smem:[#allocation11 + $0x8e]] }
  0xf8   :  { %v711_v41 = vadd.f32 %v710_v45, %v704_v17  ;;  %v1053_v25 = vadd.f32 %v1052_v38, %v1041_v35  ;;  %v1056_v26 = vadd.f32 %v1055_v19, %v1044_v27  ;;  %v1058_v1 = vmul.f32 %v1057_v6, %v2044_v13  ;;  %s2960_s11 = sld [smem:[#allocation11 + $0x8d]]  ;;  %s2967_s13 = sld [smem:[#allocation11 + $0x8f]] }
  0xf9   :  { %v1061_v30 = vmul.f32 %v1060_v9, %v2046_v14  ;;  %v1064_v55 = vmul.f32 %v1063_v54, %v2046_v14  ;;  %v1069_v39 = vstv %s2859_s14  ;;  %v1067_v50 = vmul.f32 %v1066_v46, %v2046_v14  ;;  %s2969_s14 = sld [smem:[#allocation11 + $0x10c]] }
  0xfa   :  { %v902_v7 = vadd.f32 %v901_v59, %v711_v41  ;;  %v1059_v35 = vadd.f32 %v1058_v1, %v1047_v33  ;;  %v1070_v63 = vmul.f32 %v1069_v39, %v2046_v14  ;;  %v1072_v8 = vstv %s2866_s10  ;;  %s2977_s10 = sld [smem:[#allocation11 + $0x10d]] }
  0xfb   :  { %v1062_v43 = vadd.f32 %v1061_v30, %v1050_v15  ;;  %v1065_v62 = vadd.f32 %v1064_v55, %v1053_v25  ;;  %v1075_v58 = vstv %s2868_s15  ;;  %v1068_v34 = vadd.f32 %v1067_v50, %v1056_v26  ;;  %s2979_s15 = sld [smem:[#allocation11 + $0x10e]] }
  0xfc   :  { %v909_v61 = vadd.f32 %v908_v53, %v902_v7  ;;  %v1071_v23 = vadd.f32 %v1070_v63, %v1059_v35  ;;  %v1073_v4 = vmul.f32 %v1072_v8, %v2052_v16  ;;  %v1076_v0 = vmul.f32 %v1075_v58, %v2052_v16 }
  0xfd   :  { %v1078_v10 = vstv %s2873_s3  ;;  %v1081_v47 = vstv %s2876_s4  ;;  %v1084_v57 = vstv %s2878_s5  ;;  %v922_v51 = vmul.f32 %v921_v12, %v920_v40  ;;  %s2984_s3 = sld [smem:[#allocation11 + $0x10f]]  ;;  %s2990_s4 = sld [smem:[#allocation11 + $0x18c]] }
  0xfe   :  { %v1074_v37 = vadd.f32 %v1073_v4, %v1062_v43  ;;  %v1079_v49 = vmul.f32 %v1078_v10, %v2052_v16  ;;  %v1082_v27 = vmul.f32 %v1081_v47, %v2052_v16  ;;  %v1077_v18 = vadd.f32 %v1076_v0, %v1065_v62  ;;  %s2992_s5 = sld [smem:[#allocation11 + $0x18d]] }
  0xff   :  { %v1085_v45 = vmul.f32 %v1084_v57, %v2061_v21  ;;  %v1087_v59 = vstv %s2885_s16  ;;  %v1090_v2 = vstv %s2887_s17  ;;  %v916_v53 = vadd.f32 %v915_v3, %v909_v61  ;;  %s3002_s16 = sld [smem:[#allocation11 + $0x18e]]  ;;  %s3004_s17 = sld [smem:[#allocation11 + $0x18f]] }
 0x100   :  { %v1080_v40 = vadd.f32 %v1079_v49, %v1068_v34  ;;  %v1083_v12 = vadd.f32 %v1082_v27, %v1071_v23  ;;  %v1088_v17 = vmul.f32 %v1087_v59, %v2061_v21  ;;  %v1091_v38 = vmul.f32 %v1090_v2, %v2061_v21 }
 0x101   :  { %v1086_v33 = vadd.f32 %v1085_v45, %v1074_v37  ;;  %v1093_v19 = vstv %s2894_s1  ;;  %v1096_v15 = vstv %s2896_s18  ;;  %v1099_v54 = vstv %s2902_s19  ;;  %s3010_s1 = sld [smem:[#allocation11 + $0x20c]]  ;;  %s3015_s18 = sld [smem:[#allocation11 + $0x20d]] }
 0x102   :  { %v1089_v3 = vadd.f32 %v1088_v17, %v1077_v18  ;;  %v1094_v6 = vmul.f32 %v1093_v19, %v2061_v21  ;;  %v1097_v9 = vmul.f32 %v1096_v15, %v2063_v22  ;;  %v1092_v41 = vadd.f32 %v1091_v38, %v1080_v40  ;;  %s3017_s19 = sld [smem:[#allocation11 + $0x20e]] }
 0x103   :  { %v1100_v25 = vmul.f32 %v1099_v54, %v2063_v22  ;;  %v1102_v26 = vstv %s2906_s20  ;;  %v1105_v1 = vstv %s2908_s21  ;;  %v1109_v35 = vstv %s2913_s22  ;;  %s3023_s20 = sld [smem:[#allocation11 + $0x20f]]  ;;  %s3028_s21 = sld [smem:[#allocation11 + $0x28c]] }
 0x104   :  { %v1095_v30 = vadd.f32 %v1094_v6, %v1083_v12  ;;  %v1098_v55 = vadd.f32 %v1097_v9, %v1086_v33  ;;  %v1103_v46 = vmul.f32 %v1102_v26, %v2063_v22  ;;  %v1106_v39 = vmul.f32 %v1105_v1, %v2063_v22  ;;  %s3030_s22 = sld [smem:[#allocation11 + $0x28d]] }
 0x105   :  { %v1101_v7 = vadd.f32 %v1100_v25, %v1089_v3  ;;  %v1116_v62 = vstv %s2919_s23  ;;  %v1123_v58 = vstv %s2925_s25  ;;  %v2973_v61 = vadd.f32 %v922_v51, %v916_v53  ;;  %s3037_s23 = sld [smem:[#allocation11 + $0x28e]]  ;;  %s3045_s25 = sld [smem:[#allocation11 + $0x30c]] }
 0x106   :  { %v1104_v50 = vadd.f32 %v1103_v46, %v1092_v41  ;;  %v1107_v63 = vadd.f32 %v1106_v39, %v1095_v30  ;;  %v1108_v43 = vadd.f32 %v1098_v55, %v2606_v11  ;;  %v1130_v0 = vstv %s2937_s28  ;;  %s3063_s28 = sld [smem:[#allocation11 + $0x38c]] }
 0x107   :  { %v1115_v8 = vadd.f32 %v1101_v7, %v2608_v31  ;;  %v1136_v31 = vstv %s2923_s24  ;;  %v1138_v10 = vstv %s2930_s26  ;;  %v1112_v57 = vstv %s2942_s29  ;;  %s3039_s24 = sld [smem:[#allocation11 + $0x28f]]  ;;  %s3052_s26 = sld [smem:[#allocation11 + $0x30d]] }
 0x108   :  { %v1110_v34 = vadd.f32 %v1109_v35, %v1108_v43  ;;  %v1122_v23 = vadd.f32 %v1104_v50, %v2617_v29  ;;  %v1129_v4 = vadd.f32 %v1107_v63, %v2641_v42  ;;  %v1140_v29 = vstv %s2932_s27  ;;  %s3054_s27 = sld [smem:[#allocation11 + $0x30e]]  ;;  %s3065_s29 = sld [smem:[#allocation11 + $0x38d]] }
 0x109   :  { %v1117_v11 = vadd.f32 %v1116_v62, %v1115_v8  ;;  %v1119_v42 = vstv %s2944_s30  ;;  %v1126_v37 = vstv %s2949_s8  ;;  %v1133_v49 = vstv %s2951_s9  ;;  %s3072_s30 = sld [smem:[#allocation11 + $0x38e]]  ;;  %s3143_s8 = sld [smem:[#allocation11 + $0x58d]] }
 0x10a   :  { %v1111_v47 = vmax.f32 %v1110_v34, 0.0  ;;  %v2987_v51 = vadd.f32 %v1123_v58, %v1122_v23  ;;  %v1142_v27 = vstv %s2935_s0  ;;  %v2998_v45 = vadd.f32 %v1130_v0, %v1129_v4  ;;  %s3059_s0 = sld [smem:[#allocation11 + $0x30f]] }
 0x10b   :  { %v1118_v18 = vmax.f32 %v1117_v11, 0.0  ;;  %v1137_v59 = vmul.f32 %v1136_v31, %v1944_v20  ;;  %v1139_v2 = vmul.f32 %v1138_v10, %v1944_v20  ;;  %v1141_v53 = vmul.f32 %v1140_v29, %v1944_v20 }
 0x10c   :  { %v1144_v40 = vstv %s2956_s2  ;;  %v1147_v12 = vstv %s2960_s11  ;;  %v1150_v17 = vstv %s2962_s12  ;;  %v1113_v33 = vmul.f32 %v1112_v57, %v1111_v47  ;;  %s3074_s2 = sld [smem:[#allocation11 + $0x38f]]  ;;  %s3080_s11 = sld [smem:[#allocation11 + $0x40c]] }
 0x10d   :  { %v1125_v38 = vmax.f32 %v2987_v51, 0.0  ;;  %v1143_v19 = vmul.f32 %v1142_v27, %v1944_v20  ;;  %v1145_v15 = vmul.f32 %v1144_v40, %v1950_v24  ;;  %v1148_v3 = vmul.f32 %v1147_v12, %v1950_v24  ;;  %s3084_s12 = sld [smem:[#allocation11 + $0x40d]] }
 0x10e   :  { %v1151_v6 = vmul.f32 %v1150_v17, %v1950_v24  ;;  %v1153_v9 = vstv %s2967_s13  ;;  %v1156_v54 = vstv %s2969_s14  ;;  %v1132_v41 = vmax.f32 %v2998_v45, 0.0  ;;  %s3086_s13 = sld [smem:[#allocation11 + $0x40e]]  ;;  %s3091_s14 = sld [smem:[#allocation11 + $0x40f]] }
 0x10f   :  { %v1146_v25 = vadd.f32 %v1145_v15, %v1137_v59  ;;  %v1154_v20 = vmul.f32 %v1153_v9, %v1950_v24  ;;  %v1157_v26 = vmul.f32 %v1156_v54, %v1958_v28  ;;  %v1149_v1 = vadd.f32 %v1148_v3, %v1139_v2 }
 0x110   :  { %v1152_v30 = vadd.f32 %v1151_v6, %v1141_v53  ;;  %v1159_v55 = vstv %s2977_s10  ;;  %v1162_v46 = vstv %s2979_s15  ;;  %v3034_v39 = vmul.f32 %v1119_v42, %v1118_v18  ;;  %s3095_s10 = sld [smem:[#allocation11 + $0x48c]]  ;;  %s3097_s15 = sld [smem:[#allocation11 + $0x48d]] }
 0x111   :  { %v1155_v7 = vadd.f32 %v1154_v20, %v1143_v19  ;;  %v1158_v35 = vadd.f32 %v1157_v26, %v1146_v25  ;;  %v1160_v50 = vmul.f32 %v1159_v55, %v1958_v28  ;;  %v1163_v24 = vmul.f32 %v1162_v46, %v1958_v28 }
 0x112   :  { %v1165_v63 = vstv %s2984_s3  ;;  %v1168_v43 = vstv %s2990_s4  ;;  %v1171_v62 = vstv %s2992_s5  ;;  %v3048_v8 = vadd.f32 %v1113_v33, %v2973_v61  ;;  %s3102_s3 = sld [smem:[#allocation11 + $0x48e]]  ;;  %s3104_s4 = sld [smem:[#allocation11 + $0x48f]] }
 0x113   :  { %v1161_v58 = vadd.f32 %v1160_v50, %v1149_v1  ;;  %v1166_v34 = vmul.f32 %v1165_v63, %v1958_v28  ;;  %v1169_v23 = vmul.f32 %v1168_v43, %v1966_v32  ;;  %v1164_v4 = vadd.f32 %v1163_v24, %v1152_v30  ;;  %s3108_s5 = sld [smem:[#allocation11 + $0x50c]] }
 0x114   :  { %v1172_v11 = vmul.f32 %v1171_v62, %v1966_v32  ;;  %v1174_v0 = vstv %s3002_s16  ;;  %v1177_v31 = vstv %s3004_s17  ;;  %v1180_v29 = vstv %s3010_s1  ;;  %s3110_s16 = sld [smem:[#allocation11 + $0x50d]]  ;;  %s3118_s17 = sld [smem:[#allocation11 + $0x50e]] }
 0x115   :  { %v1167_v61 = vadd.f32 %v1166_v34, %v1155_v7  ;;  %v1170_v10 = vadd.f32 %v1169_v23, %v1158_v35  ;;  %v1175_v28 = vmul.f32 %v1174_v0, %v1966_v32  ;;  %v1178_v47 = vmul.f32 %v1177_v31, %v1966_v32  ;;  %s3120_s1 = sld [smem:[#allocation11 + $0x50f]] }
 0x116   :  { %v1173_v57 = vadd.f32 %v1172_v11, %v1161_v58  ;;  %v1183_v42 = vstv %s3015_s18  ;;  %v1186_v27 = vstv %s3017_s19  ;;  %v1181_v2 = vmul.f32 %v1180_v29, %v1975_v36  ;;  %s3131_s18 = sld [smem:[#allocation11 + $0x58c]]  ;;  %s3145_s19 = sld [smem:[#allocation11 + $0x58e]] }
 0x117   :  { %v1176_v18 = vadd.f32 %v1175_v28, %v1164_v4  ;;  %v1179_v59 = vadd.f32 %v1178_v47, %v1167_v61  ;;  %v1184_v53 = vmul.f32 %v1183_v42, %v1975_v36  ;;  %v1187_v32 = vmul.f32 %v1186_v27, %v1975_v36 }
 0x118   :  { %v1189_v40 = vstv %s3023_s20  ;;  %v1192_v12 = vstv %s3028_s21  ;;  %v1195_v17 = vstv %s3030_s22  ;;  %v1182_v33 = vadd.f32 %v1181_v2, %v1170_v10  ;;  %s3153_s20 = sld [smem:[#allocation11 + $0x58f]]  ;;  %s3162_s21 = sld [smem:[#allocation11 + $0x60c]] }
 0x119   :  { %v1185_v19 = vadd.f32 %v1184_v53, %v1173_v57  ;;  %v1190_v15 = vmul.f32 %v1189_v40, %v1975_v36  ;;  %v1193_v3 = vmul.f32 %v1192_v12, %v1988_v44  ;;  %v1188_v6 = vadd.f32 %v1187_v32, %v1176_v18  ;;  %s3164_s22 = sld [smem:[#allocation11 + $0x60d]] }
 0x11a   :  { %v1196_v9 = vmul.f32 %v1195_v17, %v1988_v44  ;;  %v1198_v54 = vstv %s3037_s23  ;;  %v1201_v25 = vstv %s3039_s24  ;;  %v1204_v55 = vstv %s3045_s25  ;;  %s3174_s23 = sld [smem:[#allocation11 + $0x60e]]  ;;  %s3176_s24 = sld [smem:[#allocation11 + $0x60f]] }
 0x11b   :  { %v1191_v20 = vadd.f32 %v1190_v15, %v1179_v59  ;;  %v1194_v26 = vadd.f32 %v1193_v3, %v1182_v33  ;;  %v1199_v36 = vmul.f32 %v1198_v54, %v1988_v44  ;;  %v1202_v1 = vmul.f32 %v1201_v25, %v1988_v44  ;;  %s3182_s25 = sld [smem:[#allocation11 + $0x68c]] }
 0x11c   :  { %v1197_v30 = vadd.f32 %v1196_v9, %v1185_v19  ;;  %v1207_v46 = vstv %s3052_s26  ;;  %v1210_v7 = vstv %s3054_s27  ;;  %v1205_v44 = vmul.f32 %v1204_v55, %v1992_v48  ;;  %s3186_s26 = sld [smem:[#allocation11 + $0x68d]]  ;;  %s3188_s27 = sld [smem:[#allocation11 + $0x68e]] }
 0x11d   :  { %v1200_v35 = vadd.f32 %v1199_v36, %v1188_v6  ;;  %v1203_v50 = vadd.f32 %v1202_v1, %v1191_v20  ;;  %v1208_v24 = vmul.f32 %v1207_v46, %v1992_v48  ;;  %v1211_v63 = vmul.f32 %v1210_v7, %v1992_v48 }
 0x11e   :  { %v1213_v43 = vstv %s3059_s0  ;;  %v1216_v62 = vstv %s3063_s28  ;;  %v1219_v58 = vstv %s3065_s29  ;;  %v1206_v34 = vadd.f32 %v1205_v44, %v1194_v26  ;;  %s3193_s0 = sld [smem:[#allocation11 + $0x68f]]  ;;  %s3197_s28 = sld [smem:[#allocation11 + $0x70c]] }
 0x11f   :  { %v1209_v23 = vadd.f32 %v1208_v24, %v1197_v30  ;;  %v1214_v4 = vmul.f32 %v1213_v43, %v1992_v48  ;;  %v1217_v11 = vmul.f32 %v1216_v62, %v2001_v52  ;;  %v3126_v0 = vmul.f32 %v1126_v37, %v1125_v38  ;;  %s3199_s29 = sld [smem:[#allocation11 + $0x70d]] }
 0x120   :  { %v1220_v31 = vmul.f32 %v1219_v58, %v2001_v52  ;;  %v1222_v61 = vstv %s3072_s30  ;;  %v1225_v10 = vstv %s3074_s2  ;;  %v3135_v48 = vadd.f32 %v3034_v39, %v3048_v8  ;;  %s3206_s30 = sld [smem:[#allocation11 + $0x70e]]  ;;  %s3208_s2 = sld [smem:[#allocation11 + $0x70f]] }
 0x121   :  { %v3137_v28 = vadd.f32 %v1211_v63, %v1200_v35  ;;  %v3139_v47 = vadd.f32 %v1214_v4, %v1203_v50  ;;  %v3141_v57 = vadd.f32 %v1217_v11, %v1206_v34  ;;  %v3148_v51 = vmul.f32 %v1222_v61, %v2001_v52 }
 0x122   :  { %v1228_v37 = vstv %s3080_s11  ;;  %v1230_v38 = vstv %s3084_s12  ;;  %v1232_v39 = vstv %s3086_s13  ;;  %v3155_v8 = vadd.f32 %v1220_v31, %v1209_v23  ;;  %s3214_s11 = sld [smem:[#allocation11 + $0x78c]]  ;;  %s3218_s12 = sld [smem:[#allocation11 + $0x78d]] }
 0x123   :  { %v3158_v29 = vmul.f32 %v1225_v10, %v2001_v52  ;;  %v1229_v42 = vmul.f32 %v1228_v37, %v2006_v56  ;;  %v1231_v27 = vmul.f32 %v1230_v38, %v2006_v56  ;;  %v1233_v18 = vmul.f32 %v1232_v39, %v2006_v56  ;;  %s3220_s13 = sld [smem:[#allocation11 + $0x78e]] }
 0x124   :  { %v1234_v59 = vstv %s3091_s14  ;;  %v1236_v2 = vstv %s3095_s10  ;;  %v1239_v53 = vstv %s3097_s15  ;;  %v1242_v12 = vstv %s3102_s3  ;;  %s3227_s14 = sld [smem:[#allocation11 + $0x78f]]  ;;  %s3234_s10 = sld [smem:[#allocation12 + $0xc]] }
 0x125   :  { %v1235_v32 = vmul.f32 %v1234_v59, %v2006_v56  ;;  %v1237_v52 = vmul.f32 %v1236_v2, %v2015_v60  ;;  %v1240_v40 = vmul.f32 %v1239_v53, %v2015_v60  ;;  %v1243_v17 = vmul.f32 %v1242_v12, %v2015_v60  ;;  %s3236_s15 = sld [smem:[#allocation12 + $0xd]]  ;;  %s3242_s3 = sld [smem:[#allocation12 + $0xe]] }
 0x126   :  { %v1245_v33 = vstv %s3104_s4  ;;  %v1248_v19 = vstv %s3108_s5  ;;  %v1251_v15 = vstv %s3110_s16  ;;  %v1254_v20 = vstv %s3118_s17  ;;  %s3246_s4 = sld [smem:[#allocation12 + $0xf]]  ;;  %s3253_s5 = sld [smem:[#allocation13 + $0xc]] }
 0x127   :  { %v1238_v3 = vadd.f32 %v1237_v52, %v1229_v42  ;;  %v1241_v56 = vadd.f32 %v1240_v40, %v1231_v27  ;;  %v1246_v6 = vmul.f32 %v1245_v33, %v2015_v60  ;;  %v1249_v9 = vmul.f32 %v1248_v19, %v2029_v5  ;;  %s3255_s16 = sld [smem:[#allocation13 + $0xd]]  ;;  %s3262_s17 = sld [smem:[#allocation13 + $0xe]] }
 0x128   :  { %v1244_v54 = vadd.f32 %v1243_v17, %v1233_v18  ;;  %v1252_v25 = vmul.f32 %v1251_v15, %v2029_v5  ;;  %v1257_v26 = vstv %s3120_s1  ;;  %v1255_v60 = vmul.f32 %v1254_v20, %v2029_v5  ;;  %s1685_s1 = sld [smem:[#allocation13 + $0xf]] }
 0x129   :  { %v1247_v36 = vadd.f32 %v1246_v6, %v1235_v32  ;;  %v1250_v1 = vadd.f32 %v1249_v9, %v1238_v3  ;;  %v1258_v30 = vmul.f32 %v1257_v26, %v2029_v5  ;;  %v1260_v46 = vstv %s3131_s18 }
 0x12a   :  { %v1253_v55 = vadd.f32 %v1252_v25, %v1241_v56  ;;  %v1263_v7 = vstv %s3143_s8  ;;  %v1266_v35 = vstv %s3145_s19  ;;  %v1256_v50 = vadd.f32 %v1255_v60, %v1244_v54  ;;  %s1819_s8 = smov [#allocation15]  }
 0x12b   :  { %v1259_v44 = vadd.f32 %v1258_v30, %v1247_v36  ;;  %v1261_v24 = vmul.f32 %v1260_v46, %v2044_v13  ;;  %v1264_v63 = vmul.f32 %v1263_v7, %v2044_v13  ;;  %v1267_v5 = vmul.f32 %v1266_v35, %v2044_v13  ;;  %s1358_s19 = sshll.u32 %s1819_s8, 4  ;;  %s1359_s19 = int_to_ptr.vmem [resolvable:$true] %s1358_s19 }
 0x12c   :  { %v1269_v43 = vstv %s3153_s20  ;;  %v1272_v62 = vstv %s3162_s21  ;;  %v1275_v58 = vstv %s3164_s22  ;;  %v1278_v10 = vstv %s3174_s23  ;;  %s1775_s20 = scalar_lea.vmem %s1359_s19, 128  ;;  %p1780_p4 = scmp.lt.s32.totalorder %s1359_s19, %s1359_s19 }
 0x12d   :  { %v1262_v34 = vadd.f32 %v1261_v24, %v1250_v1  ;;  %v1265_v23 = vadd.f32 %v1264_v63, %v1253_v55  ;;  %v1270_v4 = vmul.f32 %v1269_v43, %v2044_v13  ;;  %v1273_v11 = vmul.f32 %v1272_v62, %v2046_v14  ;;  %p1776_p3 = scmp.ne.s32.totalorder %s1359_s19, %s1775_s20  ;;  %p1781_p5 = scmp.lt.s32.totalorder %s1775_s20, %s1775_s20 }
 0x12e   :  { %v1268_v31 = vadd.f32 %v1267_v5, %v1256_v50  ;;  %v1276_v61 = vmul.f32 %v1275_v58, %v2046_v14  ;;  %v1281_v37 = vstv %s3176_s24  ;;  %v1279_v42 = vmul.f32 %v1278_v10, %v2046_v14 }
 0x12f   :  { %v1271_v38 = vadd.f32 %v1270_v4, %v1259_v44  ;;  %v1274_v39 = vadd.f32 %v1273_v11, %v1262_v34  ;;  %v1282_v13 = vmul.f32 %v1281_v37, %v2046_v14  ;;  %v1284_v18 = vstv %s3182_s25  ;;  %p1782_p6 = por %p1781_p5, %p1780_p4 }
 0x130   :  { %v1277_v27 = vadd.f32 %v1276_v61, %v1265_v23  ;;  %v1287_v59 = vstv %s3186_s26  ;;  %v1290_v2 = vstv %s3188_s27  ;;  %v1280_v53 = vadd.f32 %v1279_v42, %v1268_v31 }
 0x131   :  { %v1283_v32 = vadd.f32 %v1282_v13, %v1271_v38  ;;  %v1285_v52 = vmul.f32 %v1284_v18, %v2052_v16  ;;  %v1288_v40 = vmul.f32 %v1287_v59, %v2052_v16  ;;  %v1291_v14 = vmul.f32 %v1290_v2, %v2052_v16  ;;  %p1783_p7 = pnand %p1782_p6, %p1776_p3 }
 0x132   :  { %v1293_v12 = vstv %s3193_s0  ;;  %v1296_v17 = vstv %s3197_s28  ;;  %v1299_v33 = vstv %s3199_s29  ;;  %v1302_v54 = vstv %s3206_s30 }
 0x133   :  { %v1286_v19 = vadd.f32 %v1285_v52, %v1274_v39  ;;  %v1289_v15 = vadd.f32 %v1288_v40, %v1277_v27  ;;  %v1294_v3 = vmul.f32 %v1293_v12, %v2052_v16  ;;  %v1297_v56 = vmul.f32 %v1296_v17, %v2061_v21 }
 0x134   :  { %v1292_v6 = vadd.f32 %v1291_v14, %v1280_v53  ;;  %v1300_v9 = vmul.f32 %v1299_v33, %v2061_v21  ;;  %v1305_v25 = vstv %s3208_s2  ;;  %v1303_v36 = vmul.f32 %v1302_v54, %v2061_v21 }
 0x135   :  { %v1295_v20 = vadd.f32 %v1294_v3, %v1283_v32  ;;  %v1298_v26 = vadd.f32 %v1297_v56, %v1286_v19  ;;  %v1306_v1 = vmul.f32 %v1305_v25, %v2061_v21  ;;  %v1308_v60 = vstv %s3214_s11 }
 0x136   :  { %v1301_v16 = vadd.f32 %v1300_v9, %v1289_v15  ;;  %v1311_v30 = vstv %s3218_s12  ;;  %v1314_v55 = vstv %s3220_s13  ;;  %v1304_v46 = vadd.f32 %v1303_v36, %v1292_v6 }
 0x137   :  { %v1307_v7 = vadd.f32 %v1306_v1, %v1295_v20  ;;  %v1309_v35 = vmul.f32 %v1308_v60, %v2063_v22  ;;  %v1312_v50 = vmul.f32 %v1311_v30, %v2063_v22  ;;  %v1134_v21 = vmul.f32 %v1133_v49, %v1132_v41 }
 0x138   :  { %v1224_v44 = vadd.f32 %v3148_v51, %v3137_v28  ;;  %v1315_v24 = vmul.f32 %v1314_v55, %v2063_v22  ;;  %v1317_v63 = vstv %s3227_s14  ;;  %v1227_v5 = vadd.f32 %v3158_v29, %v3139_v47 }
 0x139   :  { %v1310_v43 = vadd.f32 %v1309_v35, %v1298_v26  ;;  %v1313_v62 = vadd.f32 %v1312_v50, %v1301_v16  ;;  %v1318_v58 = vmul.f32 %v1317_v63, %v2063_v22  ;;  %v1128_v49 = vadd.f32 %v3126_v0, %v3135_v48 }
 0x13a   :  { %v1316_v45 = vadd.f32 %v1315_v24, %v1304_v46  ;;  %v1321_v41 = vstv %s3234_s10  ;;  %v1328_v28 = vstv %s3236_s15  ;;  %v1335_v47 = vstv %s3242_s3 }
 0x13b   :  { %v1319_v51 = vadd.f32 %v1318_v58, %v1307_v7  ;;  %v1320_v34 = vadd.f32 %v1310_v43, %v3141_v57  ;;  %v1327_v23 = vadd.f32 %v1313_v62, %v3155_v8  ;;  %v1342_v4 = vstv %s3246_s4 }
 0x13c   :  { %v1334_v29 = vadd.f32 %v1316_v45, %v1224_v44  ;;  %v1324_v61 = vstv %s3253_s5  ;;  %v1331_v10 = vstv %s3255_s16  ;;  %v1135_v38 = vadd.f32 %v1134_v21, %v1128_v49 }
 0x13d   :  { %v1322_v11 = vadd.f32 %v1321_v41, %v1320_v34  ;;  %v1329_v31 = vadd.f32 %v1328_v28, %v1327_v23  ;;  %v1341_v22 = vadd.f32 %v1319_v51, %v1227_v5  ;;  %v1338_v13 = vstv %s3262_s17 }
 0x13e   :  { %v1336_v37 = vadd.f32 %v1335_v47, %v1334_v29  ;;  %v1345_v59 = vstv %s1685_s1  ;;  %v1349_v40 = vstv %s3307_s6 }
 0x13f   :  { %v1323_v0 = vmax.f32 %v1322_v11, 0.0  ;;  %v1330_v48 = vmax.f32 %v1329_v31, 0.0  ;;  %v1343_v39 = vadd.f32 %v1342_v4, %v1341_v22 }
 0x140   :  { %v1337_v42 = vmax.f32 %v1336_v37, 0.0 }
 0x141   :  { %v1325_v27 = vmul.f32 %v1324_v61, %v1323_v0  ;;  %v1332_v57 = vmul.f32 %v1331_v10, %v1330_v48  ;;  %v1344_v18 = vmax.f32 %v1343_v39, 0.0 }
 0x142   :  { %v1339_v2 = vmul.f32 %v1338_v13, %v1337_v42 }
 0x143   :  { %v1326_v8 = vadd.f32 %v1325_v27, %v1135_v38  ;;  %v1346_v32 = vmul.f32 %v1345_v59, %v1344_v18 }
 0x145   :  { %v1333_v53 = vadd.f32 %v1332_v57, %v1326_v8 }
 0x147   :  { %v1340_v52 = vadd.f32 %v1339_v2, %v1333_v53 }
 0x149   :  { %v1347_v14 = vadd.f32 %v1346_v32, %v1340_v52 }
 0x14b   :  { %v1350_v12 = vadd.f32 %v1349_v40, %v1347_v14 }
 0x14d   :  { %1351 = vst [vmem:[#allocation15] sm:$0xff] %v1350_v12 }
 0x14e   :  { %1786 = shalt.err (!%p1783_p7)
}
 0x14f   :  { %s1787_s23 = scalar_lea.hbm %s3308_s7, 128 }
 0x150   :  { %p1788_p8 = scmp.ne.s32.totalorder %s3308_s7, %s1787_s23  ;;  %p1791_p9 = scmp.lt.u32.totalorder %s1787_s23, %s3308_s7 }
 0x152   :  { %p1793_p10 = pnand %p1791_p9, %p1788_p8 }
 0x154   :  { %1796 = shalt.err (!%p1793_p10)
}
 0x155   :  { %1361 = dma.vmem_to_hbm [thread:$0]  %s1359_s19, 128, %s3308_s7, [#allocation5]  }
 0x156   :  { %1809 = dma.done.wait [#allocation5], 128  }
 0x157   :  { %1810 = vsyncadd [#allocation5], 4294967168 }
 0x158   :  { %1365 = vsyncpa [#allocation4], 1 }
 0x159   :  { %1366 = vsyncpa [#allocation5], 1 }
 0x15a   :  { %1367 = vsyncpa [#allocation6], 1 }
 0x15b   :  { %1368 = vsyncpa [#allocation7], 1 }
 0x15c   :  { %1369 = vsyncpa [#allocation10], 1 }
 0x15d   :  { %1370 = vsyncpa [#allocation14], 1 }

</bundles_post_ra>
